<compile_context>
chip_gen: v7x
topology: tpu7x:2x2x1
jax: 0.10.0
libtpu: 0.0.40
codegen_flags: <defaults>
</compile_context>

<pallas_src>
import jax
import jax.numpy as jnp
from jax.experimental import pallas as pl
from jax.experimental.pallas import tpu as pltpu


def _se_basic_block_kernel(xp_ref, w1_ref, b1_ref, w2_ref, b2_ref,
                           fc1_ref, fc2_ref, o_ref, pad_ref, out2_ref):
    B, H, WC = o_ref.shape
    WpC = xp_ref.shape[2]            # (W + 2) * C
    C = (WpC - WC) // 2
    Kt = w1_ref.shape[1]             # (Wt + 2) * C
    Nt = w1_ref.shape[2]             # Wt * C
    nT = WC // Nt
    M = B * H

    # Re-zero the H/W borders of the padded scratch every step (interior is fully
    # rewritten below; per-step re-zero is cheap and megacore-safe).
    zrow = jnp.zeros((B, 1, WpC), pad_ref.dtype)
    pad_ref[:, 0:1, :] = zrow
    pad_ref[:, H + 1:H + 2, :] = zrow
    zcol = jnp.zeros((B, H, C), pad_ref.dtype)
    pad_ref[:, 1:1 + H, 0:C] = zcol
    pad_ref[:, 1:1 + H, WpC - C:WpC] = zcol

    bias1 = b1_ref[...]              # (1, Nt) f32, same for every width tile
    bias2 = b2_ref[...]

    # ---- conv1 (BN1 scale folded into weights) + bias + ReLU -----------------
    # Width-tiled banded matmuls: output tile t (Nt lanes) reads the 128-aligned
    # K = (Wt+2)*C input slice; 3 vertical taps accumulate as values.
    for t in range(nT):
        lo = t * Nt
        acc = jnp.dot(xp_ref[:, 0:H, lo:lo + Kt].reshape(M, Kt), w1_ref[0],
                      preferred_element_type=jnp.float32)
        for ky in (1, 2):
            acc = acc + jnp.dot(xp_ref[:, ky:ky + H, lo:lo + Kt].reshape(M, Kt),
                                w1_ref[ky], preferred_element_type=jnp.float32)
        out1_t = jnp.maximum(acc + bias1, 0.0)
        pad_ref[:, 1:1 + H, C + lo:C + lo + Nt] = (
            out1_t.reshape(B, H, Nt).astype(pad_ref.dtype))

    # ---- conv2 (BN2 scale folded into weights) + bias -> f32 scratch ----------
    for t in range(nT):
        lo = t * Nt
        acc = jnp.dot(pad_ref[:, 0:H, lo:lo + Kt].reshape(M, Kt), w2_ref[0],
                      preferred_element_type=jnp.float32)
        for ky in (1, 2):
            acc = acc + jnp.dot(pad_ref[:, ky:ky + H, lo:lo + Kt].reshape(M, Kt),
                                w2_ref[ky], preferred_element_type=jnp.float32)
        out2_ref[:, lo:lo + Nt] = acc + bias2

    # ---- SE: avg-pool (H here; 1/W folded into fc1) -> fc1 -> relu -> fc2 -> σ
    rowmean = jnp.mean(out2_ref[...].reshape(B, H, WC), axis=1)          # (B, WC)
    y1 = jnp.maximum(
        jnp.dot(rowmean.astype(jnp.bfloat16), fc1_ref[...],
                preferred_element_type=jnp.float32), 0.0)                # (B, Chp)
    gate = jax.nn.sigmoid(
        jnp.dot(y1.astype(jnp.bfloat16), fc2_ref[...],
                preferred_element_type=jnp.float32))                     # (B, WC)

    # ---- SE rescale + identity shortcut + final ReLU (bf16 lane-dense store) --
    for t in range(nT):
        lo = t * Nt
        o2 = out2_ref[:, lo:lo + Nt].reshape(B, H, Nt)
        sc = xp_ref[:, 1:1 + H, C + lo:C + lo + Nt].astype(jnp.float32)
        res = jnp.maximum(o2 * gate[:, None, lo:lo + Nt] + sc, 0.0)
        o_ref[:, :, lo:lo + Nt] = res.astype(o_ref.dtype)


def _band_weights(w_hwio, wt):
    """(3,3,Cin,Cout) HWIO -> (3, (wt+2)*Cin, wt*Cout) width-tiled banded matrices.

    For a tile of wt output width positions read against its (wt+2)-wide padded
    input slice:  band[ky, (u+kx)*Cin+ci, u*Cout+co] = w[ky, kx, ci, co].
    The band is translation-invariant, so one matrix is shared by all tiles.
    """
    kh, kw, cin, cout = w_hwio.shape
    assert kh == 3 and kw == 3, "3x3 kernels only"
    q = jnp.arange(wt + 2)[None, :, None]
    u = jnp.arange(wt)[None, None, :]
    kx = jnp.arange(kw)[:, None, None]
    mask = (q == u + kx).astype(w_hwio.dtype)              # (kw, wt+2, wt)
    band = jnp.einsum('xqu,yxio->yqiuo', mask, w_hwio)     # (kh, wt+2, Cin, wt, Cout)
    return band.reshape(kh, (wt + 2) * cin, wt * cout)


def _vmem_bytes_estimate(bb, H, W, C, wt, chp):
    wpc = (W + 2) * C
    wc = W * C
    kt = (wt + 2) * C
    nt = wt * C
    xp_blk = bb * (H + 2) * wpc * 2          # bf16 input block (double-buffered)
    out_blk = bb * H * wc * 2                # bf16 output block (double-buffered)
    pad = bb * (H + 2) * wpc * 2             # bf16 scratch
    out2 = bb * H * wc * 4                   # f32 scratch
    wts = 2 * 3 * kt * nt * 2 + wc * chp * 2 + chp * wc * 2 + 2 * nt * 4
    return 2 * xp_blk + 2 * out_blk + pad + out2 + wts


def _pick_block_batch(N, H, W, C, wt, chp, vmem_budget=40 * 2**20):
    divs = [d for d in range(1, N + 1) if N % d == 0]
    fits = [d for d in divs if _vmem_bytes_estimate(d, H, W, C, wt, chp) <= vmem_budget]
    if not fits:
        fits = [1]
    target = -(-256 // H)                    # Bb*H >= 256 fills the MXU rows
    c = [d for d in fits if d >= target and N // d >= 2]
    if c:
        return min(c)                        # fill MXU and keep >= 2 grid steps (v7x)
    c = [d for d in fits if d >= target]
    if c:
        return min(c)                        # fill MXU even if the grid collapses to 1
    c = [d for d in fits if N // d >= 2]
    if c:
        return max(c)                        # can't fill MXU; keep both v7x cores busy
    return max(fits)


def se_basic_block(x_nchw, params, *, eps=1e-5, block_batch=None,
                   width_tile=None, raw_output=False):
    """Fused SEBasicBlock forward (stride=1, identity shortcut).  x: (N,C,H,W)."""
    (w1, g1, b1, m1, v1,
     w2, g2, b2, m2, v2,
     fc1_t, fc2_t) = params
    N, Cin, H, W = x_nchw.shape
    C = w1.shape[-1]
    Ch = fc1_t.shape[1]
    WC = W * C
    WpC = (W + 2) * C
    assert Cin == C, "this kernel covers the identity-shortcut configuration"
    # TODO(synk): strided conv1 / 1x1 projection shortcut (stride!=1 or
    # in_planes!=planes) and training-mode (batch-stat) BatchNorm not implemented.

    # Width tile: Nt = Wt*C ~ 256 (v6e/v7x MXU width); pass width_tile=4 on v5e.
    if width_tile is None:
        wt = 256 // C if (0 < C <= 256 and 256 % C == 0) else W
        if wt <= 0 or W % wt != 0 or wt > W:
            wt = W
    else:
        wt = width_tile
        assert W % wt == 0
    Kt = (wt + 2) * C
    Nt = wt * C
    Chp = max(128, ((Ch + 127) // 128) * 128)   # pad SE hidden dim to lane width

    Bb = _pick_block_batch(N, H, W, C, wt, Chp) if block_batch is None else block_batch
    assert N % Bb == 0

    # NHWC f32, pad H and W by 1, fuse (W_pad, C) onto the lane axis, cast bf16.
    x = jnp.transpose(x_nchw, (0, 2, 3, 1)).astype(jnp.float32)
    xp = jnp.pad(x, ((0, 0), (1, 1), (1, 1), (0, 0)))
    xp = xp.reshape(N, H + 2, WpC).astype(jnp.bfloat16)

    # Fold BN (inference) scale into the conv output channels; bias stays separate.
    s1 = g1 / jnp.sqrt(v1 + eps)
    s2 = g2 / jnp.sqrt(v2 + eps)
    w1b = _band_weights(w1 * s1[None, None, None, :], wt).astype(jnp.bfloat16)
    w2b = _band_weights(w2 * s2[None, None, None, :], wt).astype(jnp.bfloat16)
    b1e = jnp.tile(b1 - m1 * s1, wt).reshape(1, Nt).astype(jnp.float32)
    b2e = jnp.tile(b2 - m2 * s2, wt).reshape(1, Nt).astype(jnp.float32)

    # SE FC weights: 1/W pooling folded into fc1, W-broadcast folded into fc2,
    # hidden dim zero-padded to Chp for lane-dense MXU shapes.
    fc1_eff = jnp.pad(jnp.tile(fc1_t, (W, 1)) / W,
                      ((0, 0), (0, Chp - Ch))).astype(jnp.bfloat16)        # (WC, Chp)
    fc2_eff = jnp.pad(jnp.tile(fc2_t, (1, W)),
                      ((0, Chp - Ch), (0, 0))).astype(jnp.bfloat16)        # (Chp, WC)

    est = _vmem_bytes_estimate(Bb, H, W, C, wt, Chp)
    vmem_limit = int(max(32 * 2**20, min(48 * 2**20, 2 * est)))

    def inv_spec(shape):
        # Grid-invariant operand: single-buffer it (saves VMEM; no per-step DMA).
        idx = lambda n, _r=len(shape): (0,) * _r
        try:
            return pl.BlockSpec(shape, idx, pipeline_mode=pl.Buffered(1))
        except TypeError:
            return pl.BlockSpec(shape, idx)

    out = pl.pallas_call(
        _se_basic_block_kernel,
        out_shape=jax.ShapeDtypeStruct((N, H, WC), jnp.bfloat16),
        grid_spec=pltpu.PrefetchScalarGridSpec(
            num_scalar_prefetch=0,
            grid=(N // Bb,),
            in_specs=[
                pl.BlockSpec((Bb, H + 2, WpC), lambda n: (n, 0, 0)),   # padded input
                inv_spec((3, Kt, Nt)),                                 # conv1 band (bn1 scale folded)
                inv_spec((1, Nt)),                                     # bn1 bias
                inv_spec((3, Kt, Nt)),                                 # conv2 band (bn2 scale folded)
                inv_spec((1, Nt)),                                     # bn2 bias
                inv_spec((WC, Chp)),                                   # fc1 (pool folded, padded)
                inv_spec((Chp, WC)),                                   # fc2 (bcast folded, padded)
            ],
            out_specs=pl.BlockSpec((Bb, H, WC), lambda n: (n, 0, 0)),
            scratch_shapes=[
                pltpu.VMEM((Bb, H + 2, WpC), jnp.bfloat16),            # H/W-padded out1
                pltpu.VMEM((Bb * H, WC), jnp.float32),                 # conv2 + bn2 result
            ],
        ),
        compiler_params=pltpu.CompilerParams(
            dimension_semantics=("parallel",),
            vmem_limit_bytes=vmem_limit),
    )(xp, w1b, b1e, w2b, b2e, fc1_eff, fc2_eff)

    if raw_output:
        return out                            # (N, H, W*C) bf16, NHWC-flat
    out = out.reshape(N, H, W, C).astype(jnp.float32)
    return jnp.transpose(out, (0, 3, 1, 2))   # back to NCHW f32


def _reference(x_nchw, params, *, eps=1e-5):
    """Pure-JAX reference matching the PyTorch forward (eval-mode BN)."""
    (w1, g1, b1, m1, v1,
     w2, g2, b2, m2, v2,
     fc1_t, fc2_t) = params
    x = jnp.transpose(x_nchw, (0, 2, 3, 1)).astype(jnp.float32)

    def conv3(a, w):
        return jax.lax.conv_general_dilated(
            a, w, (1, 1), "SAME", dimension_numbers=("NHWC", "HWIO", "NHWC"))

    def bn(a, g, b, m, v):
        return (a - m) / jnp.sqrt(v + eps) * g + b

    out = jax.nn.relu(bn(conv3(x, w1), g1, b1, m1, v1))
    out = bn(conv3(out, w2), g2, b2, m2, v2)
    y = jnp.mean(out, axis=(1, 2))                    # (N, C) global avg pool
    y = jax.nn.relu(y @ fc1_t)
    y = jax.nn.sigmoid(y @ fc2_t)
    out = out * y[:, None, None, :]
    out = jax.nn.relu(out + x)                        # identity shortcut
    return jnp.transpose(out, (0, 3, 1, 2))


if __name__ == "__main__":
    # Small config consistent with SEBasicBlock(in_planes=32, planes=32, stride=1)
    N, C, H, W = 4, 32, 16, 16
    reduction = 16
    Ch = C // reduction

    key = jax.random.PRNGKey(0)
    ks = jax.random.split(key, 16)

    w1 = 0.1 * jax.random.normal(ks[0], (3, 3, C, C), jnp.float32)     # HWIO
    w2 = 0.1 * jax.random.normal(ks[1], (3, 3, C, C), jnp.float32)
    g1 = 1.0 + 0.1 * jax.random.normal(ks[2], (C,), jnp.float32)
    b1 = 0.1 * jax.random.normal(ks[3], (C,), jnp.float32)
    m1 = 0.1 * jax.random.normal(ks[4], (C,), jnp.float32)
    v1 = jnp.abs(jax.random.normal(ks[5], (C,), jnp.float32)) + 0.5
    g2 = 1.0 + 0.1 * jax.random.normal(ks[6], (C,), jnp.float32)
    b2 = 0.1 * jax.random.normal(ks[7], (C,), jnp.float32)
    m2 = 0.1 * jax.random.normal(ks[8], (C,), jnp.float32)
    v2 = jnp.abs(jax.random.normal(ks[9], (C,), jnp.float32)) + 0.5
    fc1_t = 0.3 * jax.random.normal(ks[10], (C, Ch), jnp.float32)      # fc1.weight.T
    fc2_t = 0.3 * jax.random.normal(ks[11], (Ch, C), jnp.float32)      # fc2.weight.T

    params = (w1, g1, b1, m1, v1, w2, g2, b2, m2, v2, fc1_t, fc2_t)

    x = jax.random.normal(ks[12], (N, C, H, W), jnp.float32)           # NCHW input

    out = jax.block_until_ready(se_basic_block(x, params))
    ref = jax.block_until_ready(_reference(x, params))

    assert out.shape == (N, C, H, W), out.shape
    max_err = float(jnp.max(jnp.abs(out - ref)))
    # bf16 MXU inputs + bf16 output (f32 accumulation / element-wise math).
    assert jnp.allclose(out, ref, atol=5e-2, rtol=5e-2), max_err
    print("KERNEL_OK")
</pallas_src>

<mosaic_0001>
module attributes {stable_mosaic.version = 11 : i64} {
  func.func @_se_basic_block_kernel(%arg0: i32, %arg1: memref<2x18x576xbf16, #tpu.memory_space<vmem>>, %arg2: memref<3x320x256xbf16, #tpu.memory_space<vmem>>, %arg3: memref<1x256xf32, #tpu.memory_space<vmem>>, %arg4: memref<3x320x256xbf16, #tpu.memory_space<vmem>>, %arg5: memref<1x256xf32, #tpu.memory_space<vmem>>, %arg6: memref<512x128xbf16, #tpu.memory_space<vmem>>, %arg7: memref<128x512xbf16, #tpu.memory_space<vmem>>, %arg8: memref<2x16x512xbf16, #tpu.memory_space<vmem>>, %arg9: memref<2x18x576xbf16, #tpu.memory_space<vmem>>, %arg10: memref<32x512xf32, #tpu.memory_space<vmem>>) attributes {dimension_semantics = [#tpu.dimension_semantics<parallel>], iteration_bounds = array<i64: 2>, scalar_prefetch = 0 : i64, scratch_operands = 2 : i64, tpu.core_type = #tpu.core_type<tc>, window_params = [{transform_indices = @transform_0, window_bounds = array<i64: 2, 18, 576>}, {pipeline_mode = #tpu.pipeline_mode<synchronous>, transform_indices = @transform_1, window_bounds = array<i64: 3, 320, 256>}, {pipeline_mode = #tpu.pipeline_mode<synchronous>, transform_indices = @transform_2, window_bounds = array<i64: 1, 256>}, {pipeline_mode = #tpu.pipeline_mode<synchronous>, transform_indices = @transform_3, window_bounds = array<i64: 3, 320, 256>}, {pipeline_mode = #tpu.pipeline_mode<synchronous>, transform_indices = @transform_4, window_bounds = array<i64: 1, 256>}, {pipeline_mode = #tpu.pipeline_mode<synchronous>, transform_indices = @transform_5, window_bounds = array<i64: 512, 128>}, {pipeline_mode = #tpu.pipeline_mode<synchronous>, transform_indices = @transform_6, window_bounds = array<i64: 128, 512>}, {transform_indices = @transform_7, window_bounds = array<i64: 2, 16, 512>}]} {
    %cst = arith.constant 0.000000e+00 : bf16
    %0 = vector.broadcast %cst : bf16 to vector<2x1x576xbf16>
    %c0 = arith.constant 0 : index
    %c0_0 = arith.constant 0 : index
    %c0_1 = arith.constant 0 : index
    %1 = vector.load %arg9[%c0, %c0_0, %c0_1] : memref<2x18x576xbf16, #tpu.memory_space<vmem>>, vector<2x1x576xbf16>
    tpu.vector_store %arg9[%c0, %c0_0, %c0_1], %0 {strides = array<i32>} : memref<2x18x576xbf16, #tpu.memory_space<vmem>>, vector<2x1x576xbf16>,
    %c0_2 = arith.constant 0 : index
    %c17 = arith.constant 17 : index
    %c0_3 = arith.constant 0 : index
    %2 = vector.load %arg9[%c0_2, %c17, %c0_3] : memref<2x18x576xbf16, #tpu.memory_space<vmem>>, vector<2x1x576xbf16>
    tpu.vector_store %arg9[%c0_2, %c17, %c0_3], %0 {strides = array<i32>} : memref<2x18x576xbf16, #tpu.memory_space<vmem>>, vector<2x1x576xbf16>,
    %cst_4 = arith.constant 0.000000e+00 : bf16
    %3 = vector.broadcast %cst_4 : bf16 to vector<2x16x32xbf16>
    %c0_5 = arith.constant 0 : index
    %c1 = arith.constant 1 : index
    %c0_6 = arith.constant 0 : index
    %4 = vector.load %arg9[%c0_5, %c1, %c0_6] : memref<2x18x576xbf16, #tpu.memory_space<vmem>>, vector<2x16x32xbf16>
    tpu.vector_store %arg9[%c0_5, %c1, %c0_6], %3 {strides = array<i32>} : memref<2x18x576xbf16, #tpu.memory_space<vmem>>, vector<2x16x32xbf16>,
    %c0_7 = arith.constant 0 : index
    %c1_8 = arith.constant 1 : index
    %c544 = arith.constant 544 : index
    %5 = vector.load %arg9[%c0_7, %c1_8, %c544] : memref<2x18x576xbf16, #tpu.memory_space<vmem>>, vector<2x16x32xbf16>
    tpu.vector_store %arg9[%c0_7, %c1_8, %c544], %3 {strides = array<i32>} : memref<2x18x576xbf16, #tpu.memory_space<vmem>>, vector<2x16x32xbf16>,
    %c0_9 = arith.constant 0 : index
    %c0_10 = arith.constant 0 : index
    %6 = vector.load %arg3[%c0_9, %c0_10] : memref<1x256xf32, #tpu.memory_space<vmem>>, vector<1x256xf32>
    %c0_11 = arith.constant 0 : index
    %c0_12 = arith.constant 0 : index
    %7 = vector.load %arg5[%c0_11, %c0_12] : memref<1x256xf32, #tpu.memory_space<vmem>>, vector<1x256xf32>
    %c0_13 = arith.constant 0 : index
    %c0_14 = arith.constant 0 : index
    %c0_15 = arith.constant 0 : index
    %8 = vector.load %arg1[%c0_13, %c0_14, %c0_15] : memref<2x18x576xbf16, #tpu.memory_space<vmem>>, vector<2x16x320xbf16>
    %9 = vector.shape_cast %8 : vector<2x16x320xbf16> to vector<32x320xbf16>
    %c0_16 = arith.constant 0 : index
    %c0_17 = arith.constant 0 : index
    %c0_18 = arith.constant 0 : index
    %10 = vector.load %arg2[%c0_16, %c0_17, %c0_18] : memref<3x320x256xbf16, #tpu.memory_space<vmem>>, vector<1x320x256xbf16>
    %11 = vector.shape_cast %10 : vector<1x320x256xbf16> to vector<320x256xbf16>
    %cst_19 = arith.constant dense<0.000000e+00> : vector<32x256xf32>
    %12 = tpu.matmul %9, %11, %cst_19 {dimension_numbers = #tpu.dot_dimension_numbers<[1], [0], [0], [1], [0, 0, 1, 1], [], []>} : vector<32x320xbf16>, vector<320x256xbf16>, vector<32x256xf32> -> vector<32x256xf32>
    %c0_20 = arith.constant 0 : index
    %c1_21 = arith.constant 1 : index
    %c0_22 = arith.constant 0 : index
    %13 = vector.load %arg1[%c0_20, %c1_21, %c0_22] : memref<2x18x576xbf16, #tpu.memory_space<vmem>>, vector<2x16x320xbf16>
    %14 = vector.shape_cast %13 : vector<2x16x320xbf16> to vector<32x320xbf16>
    %c1_23 = arith.constant 1 : index
    %c0_24 = arith.constant 0 : index
    %c0_25 = arith.constant 0 : index
    %15 = vector.load %arg2[%c1_23, %c0_24, %c0_25] : memref<3x320x256xbf16, #tpu.memory_space<vmem>>, vector<1x320x256xbf16>
    %16 = vector.shape_cast %15 : vector<1x320x256xbf16> to vector<320x256xbf16>
    %cst_26 = arith.constant dense<0.000000e+00> : vector<32x256xf32>
    %17 = tpu.matmul %14, %16, %cst_26 {dimension_numbers = #tpu.dot_dimension_numbers<[1], [0], [0], [1], [0, 0, 1, 1], [], []>} : vector<32x320xbf16>, vector<320x256xbf16>, vector<32x256xf32> -> vector<32x256xf32>
    %18 = arith.addf %12, %17 : vector<32x256xf32>
    %c0_27 = arith.constant 0 : index
    %c2 = arith.constant 2 : index
    %c0_28 = arith.constant 0 : index
    %19 = vector.load %arg1[%c0_27, %c2, %c0_28] : memref<2x18x576xbf16, #tpu.memory_space<vmem>>, vector<2x16x320xbf16>
    %20 = vector.shape_cast %19 : vector<2x16x320xbf16> to vector<32x320xbf16>
    %c2_29 = arith.constant 2 : index
    %c0_30 = arith.constant 0 : index
    %c0_31 = arith.constant 0 : index
    %21 = vector.load %arg2[%c2_29, %c0_30, %c0_31] : memref<3x320x256xbf16, #tpu.memory_space<vmem>>, vector<1x320x256xbf16>
    %22 = vector.shape_cast %21 : vector<1x320x256xbf16> to vector<320x256xbf16>
    %cst_32 = arith.constant dense<0.000000e+00> : vector<32x256xf32>
    %23 = tpu.matmul %20, %22, %cst_32 {dimension_numbers = #tpu.dot_dimension_numbers<[1], [0], [0], [1], [0, 0, 1, 1], [], []>} : vector<32x320xbf16>, vector<320x256xbf16>, vector<32x256xf32> -> vector<32x256xf32>
    %24 = arith.addf %18, %23 : vector<32x256xf32>
    %25 = vector.broadcast %6 : vector<1x256xf32> to vector<32x256xf32>
    %26 = arith.addf %24, %25 : vector<32x256xf32>
    %cst_33 = arith.constant 0.000000e+00 : f32
    %27 = vector.broadcast %cst_33 : f32 to vector<32x256xf32>
    %28 = arith.maximumf %26, %27 : vector<32x256xf32>
    %29 = vector.shape_cast %28 : vector<32x256xf32> to vector<2x16x256xf32>
    %30 = arith.truncf %29 : vector<2x16x256xf32> to vector<2x16x256xbf16>
    %c0_34 = arith.constant 0 : index
    %c1_35 = arith.constant 1 : index
    %c32 = arith.constant 32 : index
    %31 = vector.load %arg9[%c0_34, %c1_35, %c32] : memref<2x18x576xbf16, #tpu.memory_space<vmem>>, vector<2x16x256xbf16>
    tpu.vector_store %arg9[%c0_34, %c1_35, %c32], %30 {strides = array<i32>} : memref<2x18x576xbf16, #tpu.memory_space<vmem>>, vector<2x16x256xbf16>,
    %c0_36 = arith.constant 0 : index
    %c0_37 = arith.constant 0 : index
    %c256 = arith.constant 256 : index
    %32 = vector.load %arg1[%c0_36, %c0_37, %c256] : memref<2x18x576xbf16, #tpu.memory_space<vmem>>, vector<2x16x320xbf16>
    %33 = vector.shape_cast %32 : vector<2x16x320xbf16> to vector<32x320xbf16>
    %c0_38 = arith.constant 0 : index
    %c0_39 = arith.constant 0 : index
    %c0_40 = arith.constant 0 : index
    %34 = vector.load %arg2[%c0_38, %c0_39, %c0_40] : memref<3x320x256xbf16, #tpu.memory_space<vmem>>, vector<1x320x256xbf16>
    %35 = vector.shape_cast %34 : vector<1x320x256xbf16> to vector<320x256xbf16>
    %cst_41 = arith.constant dense<0.000000e+00> : vector<32x256xf32>
    %36 = tpu.matmul %33, %35, %cst_41 {dimension_numbers = #tpu.dot_dimension_numbers<[1], [0], [0], [1], [0, 0, 1, 1], [], []>} : vector<32x320xbf16>, vector<320x256xbf16>, vector<32x256xf32> -> vector<32x256xf32>
    %c0_42 = arith.constant 0 : index
    %c1_43 = arith.constant 1 : index
    %c256_44 = arith.constant 256 : index
    %37 = vector.load %arg1[%c0_42, %c1_43, %c256_44] : memref<2x18x576xbf16, #tpu.memory_space<vmem>>, vector<2x16x320xbf16>
    %38 = vector.shape_cast %37 : vector<2x16x320xbf16> to vector<32x320xbf16>
    %c1_45 = arith.constant 1 : index
    %c0_46 = arith.constant 0 : index
    %c0_47 = arith.constant 0 : index
    %39 = vector.load %arg2[%c1_45, %c0_46, %c0_47] : memref<3x320x256xbf16, #tpu.memory_space<vmem>>, vector<1x320x256xbf16>
    %40 = vector.shape_cast %39 : vector<1x320x256xbf16> to vector<320x256xbf16>
    %cst_48 = arith.constant dense<0.000000e+00> : vector<32x256xf32>
    %41 = tpu.matmul %38, %40, %cst_48 {dimension_numbers = #tpu.dot_dimension_numbers<[1], [0], [0], [1], [0, 0, 1, 1], [], []>} : vector<32x320xbf16>, vector<320x256xbf16>, vector<32x256xf32> -> vector<32x256xf32>
    %42 = arith.addf %36, %41 : vector<32x256xf32>
    %c0_49 = arith.constant 0 : index
    %c2_50 = arith.constant 2 : index
    %c256_51 = arith.constant 256 : index
    %43 = vector.load %arg1[%c0_49, %c2_50, %c256_51] : memref<2x18x576xbf16, #tpu.memory_space<vmem>>, vector<2x16x320xbf16>
    %44 = vector.shape_cast %43 : vector<2x16x320xbf16> to vector<32x320xbf16>
    %c2_52 = arith.constant 2 : index
    %c0_53 = arith.constant 0 : index
    %c0_54 = arith.constant 0 : index
    %45 = vector.load %arg2[%c2_52, %c0_53, %c0_54] : memref<3x320x256xbf16, #tpu.memory_space<vmem>>, vector<1x320x256xbf16>
    %46 = vector.shape_cast %45 : vector<1x320x256xbf16> to vector<320x256xbf16>
    %cst_55 = arith.constant dense<0.000000e+00> : vector<32x256xf32>
    %47 = tpu.matmul %44, %46, %cst_55 {dimension_numbers = #tpu.dot_dimension_numbers<[1], [0], [0], [1], [0, 0, 1, 1], [], []>} : vector<32x320xbf16>, vector<320x256xbf16>, vector<32x256xf32> -> vector<32x256xf32>
    %48 = arith.addf %42, %47 : vector<32x256xf32>
    %49 = vector.broadcast %6 : vector<1x256xf32> to vector<32x256xf32>
    %50 = arith.addf %48, %49 : vector<32x256xf32>
    %cst_56 = arith.constant 0.000000e+00 : f32
    %51 = vector.broadcast %cst_56 : f32 to vector<32x256xf32>
    %52 = arith.maximumf %50, %51 : vector<32x256xf32>
    %53 = vector.shape_cast %52 : vector<32x256xf32> to vector<2x16x256xf32>
    %54 = arith.truncf %53 : vector<2x16x256xf32> to vector<2x16x256xbf16>
    %c0_57 = arith.constant 0 : index
    %c1_58 = arith.constant 1 : index
    %c288 = arith.constant 288 : index
    %55 = vector.load %arg9[%c0_57, %c1_58, %c288] : memref<2x18x576xbf16, #tpu.memory_space<vmem>>, vector<2x16x256xbf16>
    tpu.vector_store %arg9[%c0_57, %c1_58, %c288], %54 {strides = array<i32>} : memref<2x18x576xbf16, #tpu.memory_space<vmem>>, vector<2x16x256xbf16>,
    %c0_59 = arith.constant 0 : index
    %c0_60 = arith.constant 0 : index
    %c0_61 = arith.constant 0 : index
    %56 = vector.load %arg9[%c0_59, %c0_60, %c0_61] : memref<2x18x576xbf16, #tpu.memory_space<vmem>>, vector<2x16x320xbf16>
    %57 = vector.shape_cast %56 : vector<2x16x320xbf16> to vector<32x320xbf16>
    %c0_62 = arith.constant 0 : index
    %c0_63 = arith.constant 0 : index
    %c0_64 = arith.constant 0 : index
    %58 = vector.load %arg4[%c0_62, %c0_63, %c0_64] : memref<3x320x256xbf16, #tpu.memory_space<vmem>>, vector<1x320x256xbf16>
    %59 = vector.shape_cast %58 : vector<1x320x256xbf16> to vector<320x256xbf16>
    %cst_65 = arith.constant dense<0.000000e+00> : vector<32x256xf32>
    %60 = tpu.matmul %57, %59, %cst_65 {dimension_numbers = #tpu.dot_dimension_numbers<[1], [0], [0], [1], [0, 0, 1, 1], [], []>} : vector<32x320xbf16>, vector<320x256xbf16>, vector<32x256xf32> -> vector<32x256xf32>
    %c0_66 = arith.constant 0 : index
    %c1_67 = arith.constant 1 : index
    %c0_68 = arith.constant 0 : index
    %61 = vector.load %arg9[%c0_66, %c1_67, %c0_68] : memref<2x18x576xbf16, #tpu.memory_space<vmem>>, vector<2x16x320xbf16>
    %62 = vector.shape_cast %61 : vector<2x16x320xbf16> to vector<32x320xbf16>
    %c1_69 = arith.constant 1 : index
    %c0_70 = arith.constant 0 : index
    %c0_71 = arith.constant 0 : index
    %63 = vector.load %arg4[%c1_69, %c0_70, %c0_71] : memref<3x320x256xbf16, #tpu.memory_space<vmem>>, vector<1x320x256xbf16>
    %64 = vector.shape_cast %63 : vector<1x320x256xbf16> to vector<320x256xbf16>
    %cst_72 = arith.constant dense<0.000000e+00> : vector<32x256xf32>
    %65 = tpu.matmul %62, %64, %cst_72 {dimension_numbers = #tpu.dot_dimension_numbers<[1], [0], [0], [1], [0, 0, 1, 1], [], []>} : vector<32x320xbf16>, vector<320x256xbf16>, vector<32x256xf32> -> vector<32x256xf32>
    %66 = arith.addf %60, %65 : vector<32x256xf32>
    %c0_73 = arith.constant 0 : index
    %c2_74 = arith.constant 2 : index
    %c0_75 = arith.constant 0 : index
    %67 = vector.load %arg9[%c0_73, %c2_74, %c0_75] : memref<2x18x576xbf16, #tpu.memory_space<vmem>>, vector<2x16x320xbf16>
    %68 = vector.shape_cast %67 : vector<2x16x320xbf16> to vector<32x320xbf16>
    %c2_76 = arith.constant 2 : index
    %c0_77 = arith.constant 0 : index
    %c0_78 = arith.constant 0 : index
    %69 = vector.load %arg4[%c2_76, %c0_77, %c0_78] : memref<3x320x256xbf16, #tpu.memory_space<vmem>>, vector<1x320x256xbf16>
    %70 = vector.shape_cast %69 : vector<1x320x256xbf16> to vector<320x256xbf16>
    %cst_79 = arith.constant dense<0.000000e+00> : vector<32x256xf32>
    %71 = tpu.matmul %68, %70, %cst_79 {dimension_numbers = #tpu.dot_dimension_numbers<[1], [0], [0], [1], [0, 0, 1, 1], [], []>} : vector<32x320xbf16>, vector<320x256xbf16>, vector<32x256xf32> -> vector<32x256xf32>
    %72 = arith.addf %66, %71 : vector<32x256xf32>
    %73 = vector.broadcast %7 : vector<1x256xf32> to vector<32x256xf32>
    %74 = arith.addf %72, %73 : vector<32x256xf32>
    %c0_80 = arith.constant 0 : index
    %c0_81 = arith.constant 0 : index
    %75 = vector.load %arg10[%c0_80, %c0_81] : memref<32x512xf32, #tpu.memory_space<vmem>>, vector<32x256xf32>
    tpu.vector_store %arg10[%c0_80, %c0_81], %74 {strides = array<i32>} : memref<32x512xf32, #tpu.memory_space<vmem>>, vector<32x256xf32>,
    %c0_82 = arith.constant 0 : index
    %c0_83 = arith.constant 0 : index
    %c256_84 = arith.constant 256 : index
    %76 = vector.load %arg9[%c0_82, %c0_83, %c256_84] : memref<2x18x576xbf16, #tpu.memory_space<vmem>>, vector<2x16x320xbf16>
    %77 = vector.shape_cast %76 : vector<2x16x320xbf16> to vector<32x320xbf16>
    %c0_85 = arith.constant 0 : index
    %c0_86 = arith.constant 0 : index
    %c0_87 = arith.constant 0 : index
    %78 = vector.load %arg4[%c0_85, %c0_86, %c0_87] : memref<3x320x256xbf16, #tpu.memory_space<vmem>>, vector<1x320x256xbf16>
    %79 = vector.shape_cast %78 : vector<1x320x256xbf16> to vector<320x256xbf16>
    %cst_88 = arith.constant dense<0.000000e+00> : vector<32x256xf32>
    %80 = tpu.matmul %77, %79, %cst_88 {dimension_numbers = #tpu.dot_dimension_numbers<[1], [0], [0], [1], [0, 0, 1, 1], [], []>} : vector<32x320xbf16>, vector<320x256xbf16>, vector<32x256xf32> -> vector<32x256xf32>
    %c0_89 = arith.constant 0 : index
    %c1_90 = arith.constant 1 : index
    %c256_91 = arith.constant 256 : index
    %81 = vector.load %arg9[%c0_89, %c1_90, %c256_91] : memref<2x18x576xbf16, #tpu.memory_space<vmem>>, vector<2x16x320xbf16>
    %82 = vector.shape_cast %81 : vector<2x16x320xbf16> to vector<32x320xbf16>
    %c1_92 = arith.constant 1 : index
    %c0_93 = arith.constant 0 : index
    %c0_94 = arith.constant 0 : index
    %83 = vector.load %arg4[%c1_92, %c0_93, %c0_94] : memref<3x320x256xbf16, #tpu.memory_space<vmem>>, vector<1x320x256xbf16>
    %84 = vector.shape_cast %83 : vector<1x320x256xbf16> to vector<320x256xbf16>
    %cst_95 = arith.constant dense<0.000000e+00> : vector<32x256xf32>
    %85 = tpu.matmul %82, %84, %cst_95 {dimension_numbers = #tpu.dot_dimension_numbers<[1], [0], [0], [1], [0, 0, 1, 1], [], []>} : vector<32x320xbf16>, vector<320x256xbf16>, vector<32x256xf32> -> vector<32x256xf32>
    %86 = arith.addf %80, %85 : vector<32x256xf32>
    %c0_96 = arith.constant 0 : index
    %c2_97 = arith.constant 2 : index
    %c256_98 = arith.constant 256 : index
    %87 = vector.load %arg9[%c0_96, %c2_97, %c256_98] : memref<2x18x576xbf16, #tpu.memory_space<vmem>>, vector<2x16x320xbf16>
    %88 = vector.shape_cast %87 : vector<2x16x320xbf16> to vector<32x320xbf16>
    %c2_99 = arith.constant 2 : index
    %c0_100 = arith.constant 0 : index
    %c0_101 = arith.constant 0 : index
    %89 = vector.load %arg4[%c2_99, %c0_100, %c0_101] : memref<3x320x256xbf16, #tpu.memory_space<vmem>>, vector<1x320x256xbf16>
    %90 = vector.shape_cast %89 : vector<1x320x256xbf16> to vector<320x256xbf16>
    %cst_102 = arith.constant dense<0.000000e+00> : vector<32x256xf32>
    %91 = tpu.matmul %88, %90, %cst_102 {dimension_numbers = #tpu.dot_dimension_numbers<[1], [0], [0], [1], [0, 0, 1, 1], [], []>} : vector<32x320xbf16>, vector<320x256xbf16>, vector<32x256xf32> -> vector<32x256xf32>
    %92 = arith.addf %86, %91 : vector<32x256xf32>
    %93 = vector.broadcast %7 : vector<1x256xf32> to vector<32x256xf32>
    %94 = arith.addf %92, %93 : vector<32x256xf32>
    %c0_103 = arith.constant 0 : index
    %c256_104 = arith.constant 256 : index
    %95 = vector.load %arg10[%c0_103, %c256_104] : memref<32x512xf32, #tpu.memory_space<vmem>>, vector<32x256xf32>
    tpu.vector_store %arg10[%c0_103, %c256_104], %94 {strides = array<i32>} : memref<32x512xf32, #tpu.memory_space<vmem>>, vector<32x256xf32>,
    %c0_105 = arith.constant 0 : index
    %c0_106 = arith.constant 0 : index
    %96 = vector.load %arg10[%c0_105, %c0_106] : memref<32x512xf32, #tpu.memory_space<vmem>>, vector<32x512xf32>
    %97 = vector.shape_cast %96 : vector<32x512xf32> to vector<2x16x512xf32>
    %cst_107 = arith.constant dense<0.000000e+00> : vector<2x512xf32>
    %98 = vector.multi_reduction <add>, %97, %cst_107 [1] : vector<2x16x512xf32> to vector<2x512xf32>
    %cst_108 = arith.constant 1.600000e+01 : f32
    %99 = vector.broadcast %cst_108 : f32 to vector<2x512xf32>
    %100 = arith.divf %98, %99 : vector<2x512xf32>
    %101 = arith.truncf %100 : vector<2x512xf32> to vector<2x512xbf16>
    %c0_109 = arith.constant 0 : index
    %c0_110 = arith.constant 0 : index
    %102 = vector.load %arg6[%c0_109, %c0_110] : memref<512x128xbf16, #tpu.memory_space<vmem>>, vector<512x128xbf16>
    %cst_111 = arith.constant dense<0.000000e+00> : vector<2x128xf32>
    %103 = tpu.matmul %101, %102, %cst_111 {dimension_numbers = #tpu.dot_dimension_numbers<[1], [0], [0], [1], [0, 0, 1, 1], [], []>} : vector<2x512xbf16>, vector<512x128xbf16>, vector<2x128xf32> -> vector<2x128xf32>
    %cst_112 = arith.constant 0.000000e+00 : f32
    %104 = vector.broadcast %cst_112 : f32 to vector<2x128xf32>
    %105 = arith.maximumf %103, %104 : vector<2x128xf32>
    %106 = arith.truncf %105 : vector<2x128xf32> to vector<2x128xbf16>
    %c0_113 = arith.constant 0 : index
    %c0_114 = arith.constant 0 : index
    %107 = vector.load %arg7[%c0_113, %c0_114] : memref<128x512xbf16, #tpu.memory_space<vmem>>, vector<128x512xbf16>
    %cst_115 = arith.constant dense<0.000000e+00> : vector<2x512xf32>
    %108 = tpu.matmul %106, %107, %cst_115 {dimension_numbers = #tpu.dot_dimension_numbers<[1], [0], [0], [1], [0, 0, 1, 1], [], []>} : vector<2x128xbf16>, vector<128x512xbf16>, vector<2x512xf32> -> vector<2x512xf32>
    %109 = arith.negf %108 : vector<2x512xf32>
    %110 = math.exp %109 : vector<2x512xf32>
    %cst_116 = arith.constant 1.000000e+00 : f32
    %111 = vector.broadcast %cst_116 : f32 to vector<2x512xf32>
    %112 = arith.addf %111, %110 : vector<2x512xf32>
    %113 = arith.divf %111, %112 : vector<2x512xf32>
    %c0_117 = arith.constant 0 : index
    %c0_118 = arith.constant 0 : index
    %114 = vector.load %arg10[%c0_117, %c0_118] : memref<32x512xf32, #tpu.memory_space<vmem>>, vector<32x256xf32>
    %115 = vector.shape_cast %114 : vector<32x256xf32> to vector<2x16x256xf32>
    %c0_119 = arith.constant 0 : index
    %c1_120 = arith.constant 1 : index
    %c32_121 = arith.constant 32 : index
    %116 = vector.load %arg1[%c0_119, %c1_120, %c32_121] : memref<2x18x576xbf16, #tpu.memory_space<vmem>>, vector<2x16x256xbf16>
    %117 = arith.extf %116 : vector<2x16x256xbf16> to vector<2x16x256xf32>
    %118 = vector.extract_strided_slice %113 {offsets = [0, 0], sizes = [2, 256], strides = [1, 1]} : vector<2x512xf32> to vector<2x256xf32>
    %119 = vector.shape_cast %118 : vector<2x256xf32> to vector<2x1x256xf32>
    %120 = vector.broadcast %119 : vector<2x1x256xf32> to vector<2x16x256xf32>
    %121 = arith.mulf %115, %120 : vector<2x16x256xf32>
    %122 = arith.addf %121, %117 : vector<2x16x256xf32>
    %cst_122 = arith.constant 0.000000e+00 : f32
    %123 = vector.broadcast %cst_122 : f32 to vector<2x16x256xf32>
    %124 = arith.maximumf %122, %123 : vector<2x16x256xf32>
    %125 = arith.truncf %124 : vector<2x16x256xf32> to vector<2x16x256xbf16>
    %c0_123 = arith.constant 0 : index
    %c0_124 = arith.constant 0 : index
    %c0_125 = arith.constant 0 : index
    %126 = vector.load %arg8[%c0_123, %c0_124, %c0_125] : memref<2x16x512xbf16, #tpu.memory_space<vmem>>, vector<2x16x256xbf16>
    tpu.vector_store %arg8[%c0_123, %c0_124, %c0_125], %125 {strides = array<i32>} : memref<2x16x512xbf16, #tpu.memory_space<vmem>>, vector<2x16x256xbf16>,
    %c0_126 = arith.constant 0 : index
    %c256_127 = arith.constant 256 : index
    %127 = vector.load %arg10[%c0_126, %c256_127] : memref<32x512xf32, #tpu.memory_space<vmem>>, vector<32x256xf32>
    %128 = vector.shape_cast %127 : vector<32x256xf32> to vector<2x16x256xf32>
    %c0_128 = arith.constant 0 : index
    %c1_129 = arith.constant 1 : index
    %c288_130 = arith.constant 288 : index
    %129 = vector.load %arg1[%c0_128, %c1_129, %c288_130] : memref<2x18x576xbf16, #tpu.memory_space<vmem>>, vector<2x16x256xbf16>
    %130 = arith.extf %129 : vector<2x16x256xbf16> to vector<2x16x256xf32>
    %131 = vector.extract_strided_slice %113 {offsets = [0, 256], sizes = [2, 256], strides = [1, 1]} : vector<2x512xf32> to vector<2x256xf32>
    %132 = vector.shape_cast %131 : vector<2x256xf32> to vector<2x1x256xf32>
    %133 = vector.broadcast %132 : vector<2x1x256xf32> to vector<2x16x256xf32>
    %134 = arith.mulf %128, %133 : vector<2x16x256xf32>
    %135 = arith.addf %134, %130 : vector<2x16x256xf32>
    %cst_131 = arith.constant 0.000000e+00 : f32
    %136 = vector.broadcast %cst_131 : f32 to vector<2x16x256xf32>
    %137 = arith.maximumf %135, %136 : vector<2x16x256xf32>
    %138 = arith.truncf %137 : vector<2x16x256xf32> to vector<2x16x256xbf16>
    %c0_132 = arith.constant 0 : index
    %c0_133 = arith.constant 0 : index
    %c256_134 = arith.constant 256 : index
    %139 = vector.load %arg8[%c0_132, %c0_133, %c256_134] : memref<2x16x512xbf16, #tpu.memory_space<vmem>>, vector<2x16x256xbf16>
    tpu.vector_store %arg8[%c0_132, %c0_133, %c256_134], %138 {strides = array<i32>} : memref<2x16x512xbf16, #tpu.memory_space<vmem>>, vector<2x16x256xbf16>,
    return
  }
  func.func @transform_0(%arg0: i32) -> (i32, i32, i32) {
    %c0_i32 = arith.constant 0 : i32
    %c0_i32_0 = arith.constant 0 : i32
    %c0_i32_1 = arith.constant 0 : i32
    return %arg0, %c0_i32, %c0_i32_0 : i32, i32, i32
  }
  func.func @transform_1(%arg0: i32) -> (i32, i32, i32) {
    %c0_i32 = arith.constant 0 : i32
    %c0_i32_0 = arith.constant 0 : i32
    %c0_i32_1 = arith.constant 0 : i32
    %c0_i32_2 = arith.constant 0 : i32
    return %c0_i32, %c0_i32_0, %c0_i32_1 : i32, i32, i32
  }
  func.func @transform_2(%arg0: i32) -> (i32, i32) {
    %c0_i32 = arith.constant 0 : i32
    %c0_i32_0 = arith.constant 0 : i32
    %c0_i32_1 = arith.constant 0 : i32
    return %c0_i32, %c0_i32_0 : i32, i32
  }
  func.func @transform_3(%arg0: i32) -> (i32, i32, i32) {
    %c0_i32 = arith.constant 0 : i32
    %c0_i32_0 = arith.constant 0 : i32
    %c0_i32_1 = arith.constant 0 : i32
    %c0_i32_2 = arith.constant 0 : i32
    return %c0_i32, %c0_i32_0, %c0_i32_1 : i32, i32, i32
  }
  func.func @transform_4(%arg0: i32) -> (i32, i32) {
    %c0_i32 = arith.constant 0 : i32
    %c0_i32_0 = arith.constant 0 : i32
    %c0_i32_1 = arith.constant 0 : i32
    return %c0_i32, %c0_i32_0 : i32, i32
  }
  func.func @transform_5(%arg0: i32) -> (i32, i32) {
    %c0_i32 = arith.constant 0 : i32
    %c0_i32_0 = arith.constant 0 : i32
    %c0_i32_1 = arith.constant 0 : i32
    return %c0_i32, %c0_i32_0 : i32, i32
  }
  func.func @transform_6(%arg0: i32) -> (i32, i32) {
    %c0_i32 = arith.constant 0 : i32
    %c0_i32_0 = arith.constant 0 : i32
    %c0_i32_1 = arith.constant 0 : i32
    return %c0_i32, %c0_i32_0 : i32, i32
  }
  func.func @transform_7(%arg0: i32) -> (i32, i32, i32) {
    %c0_i32 = arith.constant 0 : i32
    %c0_i32_0 = arith.constant 0 : i32
    %c0_i32_1 = arith.constant 0 : i32
    return %arg0, %c0_i32, %c0_i32_0 : i32, i32, i32
  }
}

</mosaic_0001>

<bundles_post_ra>
// kernel: tpu_custom_call.1
= control target key start
LH: loop header
LB: loop body
LE: loop exit
PB: predicated region body
PF: predicated region fallthrough
CT: control target
= control target key end

     0   :  { %12 = vsyncpa [#allocation5], 0  ;;  %s10489_s0 = inlined_call_operand.vmem [shape: bf16[4,18,576], index: 0, kind: input, shape index: {}]   ;;  %s10490_s1 = inlined_call_operand.hbm [shape: bf16[3,320,256], index: 1, kind: input, shape index: {}]   ;;  %s10491_s2 = inlined_call_operand.vmem [shape: f32[1,256], index: 2, kind: input, shape index: {}]   ;;  %s10492_s3 = inlined_call_operand.hbm [shape: bf16[3,320,256], index: 3, kind: input, shape index: {}]   ;;  %s10493_s4 = inlined_call_operand.vmem [shape: f32[1,256], index: 4, kind: input, shape index: {}]   ;;  %s10494_s5 = inlined_call_operand.vmem [shape: bf16[512,128], index: 5, kind: input, shape index: {}]   ;;  %s10495_s6 = inlined_call_operand.hbm [shape: bf16[128,512], index: 6, kind: input, shape index: {}]   ;;  %s10496_s7 = inlined_call_operand.hbm [shape: bf16[4,16,512], index: 7, kind: output, shape index: {}]  }
   0x1   :  { %13 = vsyncpa [#allocation8], 0 }
   0x2   :  { %14 = vsyncpa [#allocation6], 0 }
   0x3   :  { %16 = vsyncpa [#allocation6 + $0x1], 0  ;;  %s8969_s24 = smov 0   ;;  %s8971_s25 = smov 0  }
   0x4   :  { %s8973_s26 = smov 0   ;;  %s8975_s27 = smov 0  }
   0x5 LB: > { %10506 = sst [smem:[#allocation14_spill]] %s8909_s26  ;;  %s8990_s28 = sadd.s32 4294967295, %s8913_s27   ;;  %s8913_s27 = sphi %s8975_s27, %s10576_s27   ;;  %s8909_s26 = sphi %s8973_s26, %s10581_s26   ;;  %s8905_s25 = sphi %s8971_s25, %s10580_s25   ;;  %s8901_s24 = sphi %s8969_s24, %s10579_s24  }
   0x6   : > { %s7220_s29 = sadd.s32 4294967294, %s8913_s27   ;;  %s8994_s30 = sadd.s32 1, %s8913_s27  }
   0x7   : > { %10507 = sst [smem:[#allocation15_spill]] %s8994_s30  ;;  %s181_s8 = sadd.s32 1, %s8909_s26 }
   0x8   : > { %s178_s9 = ssub.s32 %s8913_s27, %s8994_s30  ;;  %p191_p0 = scmp.ne.s32.totalorder %s8909_s26, %s8905_s25 }
   0x9   : > { %p179_p1 = scmp.eq.s32.totalorder %s178_s9, 0  ;;  %p192_p2 = scmp.eq.s32.totalorder %s8990_s28, 1 }
   0xa   : > { %p197_p3 = scmp.ne.s32.totalorder %s8905_s25, %s8901_s24  ;;  %p198_p4 = scmp.eq.s32.totalorder %s7220_s29, 1 }
   0xb   : > { %s9005_s10 = scalar_select %p179_p1, %s8909_s26, %s181_s8  }
   0xc   : > { %p9007_p5 = por %p192_p2, %p191_p0  ;;  %p9011_p6 = por %p198_p4, %p197_p3 }
   0xd   : > { %10508 = sst [smem:[#allocation16_spill]] %s9005_s10  ;;  %p7221_p7 = scmp.ge.s32.totalorder %s8913_s27, 1 }
   0xe   : > { %s10509_s11 = scalar_select %p9007_p5, 1, 0 }
   0xf   : > { %s10510_s12 = scalar_select %p9011_p6, 1, 0 }
  0x10   : > { %p205_p8 = scmp.lt.s32.totalorder %s8913_s27, 3  ;;  %p10497_p9 = scmp.eq.s32.totalorder %s8990_s28, 0 }
  0x11   : > { %s8915_s14 = smov [#allocation7]   ;;  %s8916_s17 = smov [#allocation4]  }
  0x12   : > { %p9018_p10 = pnand %p7221_p7, %p205_p8  ;;  %s233_s15 = sshll.u32 %s8915_s14, 4  ;;  %s9024_s15 = int_to_ptr.vmem [resolvable:$true] %s233_s15 }
  0x13   : > { %s217_s18 = sshll.u32 %s8916_s17, 4  ;;  %s8917_s19 = smov [#allocation9]   ;;  %s9032_s18 = int_to_ptr.vmem [resolvable:$true] %s217_s18 }
  0x14   : > { %s10511_s13 = scalar_select %p9018_p10, 1, 0 }
  0x15   : > { %p8152_p11 = pneg %p9018_p10  ;;  %s9034_s20 = sshll.u32 %s8917_s19, 4  ;;  %s253_s20 = int_to_ptr.vmem [resolvable:$true] %s9034_s20 }
  0x16   : > { %s8759_s23 = scalar_lea.hbm %s10492_s3, 15360 }
  0x17   : > { %p9028_p12 = pnand %p10497_p9, %p8152_p11  ;;  %p8760_p13 = scmp.ne.s32.totalorder %s10492_s3, %s8759_s23 }
  0x18   : > { %p8766_p3 = scmp.lt.u32.totalorder %s8759_s23, %s10492_s3 }
  0x19   : > { %p9044_p0 = pneg %p9028_p12 }
  0x1b   : > { %p8762_p1 = pnand %p9044_p0, %p8760_p13 }
  0x1d   : > { %p8763_p2 = pneg %p8762_p1 }
  0x1f   : > { %p8768_p4 = pnand %p8766_p3, %p8763_p2 }
  0x21   : > { %8771 = shalt.err (!%p8768_p4)
}
  0x22   : > { %s8772_s19 = scalar_lea.vmem %s9024_s15, 15360  ;;  %p8780_p9 = scmp.lt.s32.totalorder %s9024_s15, %s9024_s15 }
  0x23   : > { %p8773_p7 = scmp.ne.s32.totalorder %s9024_s15, %s8772_s19  ;;  %p8781_p6 = scmp.lt.s32.totalorder %s8772_s19, %s8772_s19 }
  0x25   : > { %p8775_p8 = pnand %p8773_p7, %p9044_p0  ;;  %p8782_p13 = por %p8781_p6, %p8780_p9 }
  0x27   : > { %p8776_p11 = pneg %p8775_p8 }
  0x29   : > { %p8783_p1 = pnand %p8782_p13, %p8776_p11 }
  0x2b   : > { %8786 = shalt.err (!%p8783_p1)
}
  0x2c   : > { %s8918_s21 = smov 128   ;;  %s8919_s22 = smov 8  }
  0x2d   : > { %8158 = dma.hbm_to_vmem [thread:$0]  (!%p9028_p12), %s10492_s3, 15360, %s9024_s15, [#allocation8], %s8918_s21, %s8918_s21, %s8919_s22  }
  0x2e   : > { %s8787_s17 = scalar_lea.hbm %s10490_s1, 15360 }
  0x2f   : > { %p8788_p6 = scmp.ne.s32.totalorder %s10490_s1, %s8787_s17  ;;  %p8794_p3 = scmp.lt.u32.totalorder %s8787_s17, %s10490_s1 }
  0x31   : > { %p8790_p9 = pnand %p8788_p6, %p9044_p0 }
  0x33   : > { %p8791_p2 = pneg %p8790_p9 }
  0x35   : > { %p8796_p4 = pnand %p8794_p3, %p8791_p2 }
  0x37   : > { %8799 = shalt.err (!%p8796_p4)
}
  0x38   : > { %s8800_s15 = scalar_lea.vmem %s9032_s18, 15360  ;;  %p8808_p13 = scmp.lt.s32.totalorder %s9032_s18, %s9032_s18 }
  0x39   : > { %p8801_p7 = scmp.ne.s32.totalorder %s9032_s18, %s8800_s15  ;;  %p8809_p1 = scmp.lt.s32.totalorder %s8800_s15, %s8800_s15 }
  0x3b   : > { %p8803_p8 = pnand %p8801_p7, %p9044_p0  ;;  %p8810_p6 = por %p8809_p1, %p8808_p13 }
  0x3d   : > { %p8804_p11 = pneg %p8803_p8 }
  0x3f   : > { %p8811_p9 = pnand %p8810_p6, %p8804_p11 }
  0x41   : > { %8814 = shalt.err (!%p8811_p9)
}
  0x42   : > { %8155 = dma.hbm_to_vmem [thread:$0]  (!%p9028_p12), %s10490_s1, 15360, %s9032_s18, [#allocation5], %s8918_s21, %s8918_s21, %s8919_s22  }
  0x43   : > { %s8815_s29 = scalar_lea.hbm %s10495_s6, 4096 }
  0x44   : > { %p8816_p2 = scmp.ne.s32.totalorder %s10495_s6, %s8815_s29  ;;  %p8822_p7 = scmp.lt.u32.totalorder %s8815_s29, %s10495_s6 }
  0x46   : > { %p8818_p3 = pnand %p8816_p2, %p9044_p0 }
  0x48   : > { %p8819_p4 = pneg %p8818_p3 }
  0x4a   : > { %p8824_p8 = pnand %p8822_p7, %p8819_p4 }
  0x4c   : > { %8827 = shalt.err (!%p8824_p8)
}
  0x4d   : > { %s8828_s15 = scalar_lea.vmem %s253_s20, 4096  ;;  %p8836_p6 = scmp.lt.s32.totalorder %s253_s20, %s253_s20 }
  0x4e   : > { %p8829_p11 = scmp.ne.s32.totalorder %s253_s20, %s8828_s15  ;;  %p8837_p9 = scmp.lt.s32.totalorder %s8828_s15, %s8828_s15 }
  0x50   : > { %p8831_p13 = pnand %p8829_p11, %p9044_p0  ;;  %p8838_p5 = por %p8837_p9, %p8836_p6 }
  0x52   : > { %p8832_p1 = pneg %p8831_p13 }
  0x54   : > { %p8839_p10 = pnand %p8838_p5, %p8832_p1 }
  0x56   : > { %8842 = shalt.err (!%p8839_p10)
}
  0x57   : > { %s8920_s18 = smov 256   ;;  %s8921_s21 = smov 16  }
  0x58   : > { %8161 = dma.hbm_to_vmem [thread:$0]  (!%p9028_p12), %s10495_s6, 4096, %s253_s20, [#allocation8], %s8920_s18, %s8920_s18, %s8921_s21  }
  0x59   : > { %p10514_p2 = scmp.ne.s32.totalorder %s10511_s13, 0 }
  0x5a   : > { %p10515_p3 = scmp.eq.s32.totalorder (!%p10514_p2), %s8990_s28, 0 }
  0x5b   : > { %278 = sbr.rel (%p10514_p2) target bundleno = 1653 (0x675), region = 48 }
  0x62   : > { %8888 = dma.done.wait (%p10515_p3), [#allocation5], 15360   ;;  %p10516_p0 = pmov %p10515_p3 }
  0x64   : > { %8890 = vsyncadd (%p10516_p0), [#allocation5], 4294951936  ;;  %p10517_p5 = pmov %p10516_p0 }
  0x65   : > { %p10518_p10 = pmov %p10516_p0 }
  0x66   : > { %8892 = dma.done.wait (%p10517_p5), [#allocation8], 19456  }
  0x67   : > { %8894 = vsyncadd (%p10518_p10), [#allocation8], 4294947840  ;;  %v8278_v0 = vld [vmem:[#allocation4 + $0x144] ss:$8 sps:$4 sm:$0xff]   ;;  %v8280_v1 = vld [vmem:[#allocation4 + $0x140] ss:$8 sps:$4 sm:$0xff]  }
  0x68   : > { %840 = vmatprep.subr.bf16.mxu0 %v8278_v0  ;;  %2289 = vmatprep.subr.bf16.mxu1 %v8278_v0  ;;  %v8281_v2 = vld [vmem:[#allocation4 + $0x154] ss:$8 sps:$4 sm:$0xff]   ;;  %v8283_v3 = vld [vmem:[#allocation4 + $0x150] ss:$8 sps:$4 sm:$0xff]   ;;  %s7231_s13 = sshll.u32 %s8990_s28, 1  ;;  %vm10503_vm3 = vcmask 523264  }
  0x69   : > { %841 = vmatpush1.bf16.msra.mxu0 %v8280_v1  ;;  %2290 = vmatpush1.bf16.msra.mxu1 %v8280_v1  ;;  %v8284_v4 = vld [vmem:[#allocation4 + $0x164] ss:$8 sps:$4 sm:$0xff]   ;;  %p320_p12 = scmp.lt.s32.totalorder %s7231_s13, 3  ;;  %v8286_v5 = vld [vmem:[#allocation4 + $0x160] ss:$8 sps:$4 sm:$0xff]   ;;  %vm1300_vm4 = vcmask 1042432  }
  0x6a   : > { %842 = vmatprep.subr.bf16.mxu0 %v8281_v2  ;;  %2291 = vmatprep.subr.bf16.mxu1 %v8281_v2  ;;  %v8287_v6 = vld [vmem:[#allocation4 + $0x174] ss:$8 sps:$4 sm:$0xff]   ;;  %v8289_v7 = vld [vmem:[#allocation4 + $0x170] ss:$8 sps:$4 sm:$0xff]   ;;  %v8290_v8 = vld [vmem:[#allocation4 + $0x184] ss:$8 sps:$4 sm:$0xff]  }
  0x6b   : > { %s10583_s13 = smov (!%p320_p12, %s7231_s13), 3  ;;  %v8292_v9 = vld [vmem:[#allocation4 + $0x180] ss:$8 sps:$4 sm:$0xff]   ;;  %v8293_v10 = vld [vmem:[#allocation4 + $0x194] ss:$8 sps:$4 sm:$0xff]   ;;  %vm1301_vm5 = vcmask 1046532  }
  0x6c   : > { %s8137_s16 = smul.u32 60, %s10583_s13  ;;  %v8295_v11 = vld [vmem:[#allocation4 + $0x190] ss:$8 sps:$4 sm:$0xff]   ;;  %v8296_v12 = vld [vmem:[#allocation4 + $0x1a4] ss:$8 sps:$4 sm:$0xff]   ;;  %vm9325_vm6 = vmor %vm1300_vm4, %vm1301_vm5  ;;  %vm10505_vm7 = vcmask 257024  }
  0x6d   : > { %843 = vmatpush1.bf16.msra.mxu0 %v8283_v3  ;;  %2292 = vmatpush1.bf16.msra.mxu1 %v8283_v3  ;;  %vm471_vm0 = vsmask.f32 3328  ;;  %vm472_vm1 = vsmask.f32 7440  ;;  %v8298_v20 = vld [vmem:[#allocation4 + $0x1a0] ss:$8 sps:$4 sm:$0xff]  }
  0x6e   : > { %844 = vmatprep.subr.bf16.mxu0 %v8284_v4  ;;  %2293 = vmatprep.subr.bf16.mxu1 %v8284_v4  ;;  %s9121_s30 = scalar_lea.vmem %s10489_s0, %s8137_s16  ;;  %v8299_v22 = vld [vmem:[#allocation4 + $0x1b4] ss:$8 sps:$4 sm:$0xff]   ;;  %v8301_v35 = vld [vmem:[#allocation4 + $0x1b0] ss:$8 sps:$4 sm:$0xff]   ;;  %vm9147_vm2 = vmor %vm471_vm0, %vm472_vm1  ;;  %vm398_vm8 = vcmask 519424   ;;  %vm10504_vm9 = vcmask 516096  }
  0x6f   : > { %v9124_v13 = vld [vmem:[%s9121_s30] sm:$0xff]  ;;  %v9127_v14 = vld [vmem:[%s9121_s30 + $0x14] sm:$0xff]  ;;  %v467_v15 = vld [vmem:[%s9121_s30 + $0x28] sm:$0x11]  ;;  %vm329_vm10 = vsmask.f32 256 }
  0x70   : > { %v475_v16 = vshrl.u32 %v9124_v13, 16  ;;  %v478_v17 = vshll.u32 %v9124_v13, 16  ;;  %v484_v18 = vshll.u32 %v9127_v14, 16  ;;  %v502_v19 = vshrl.u32 %v9127_v14, 16  ;;  %v9135_v28 = vld [vmem:[%s9121_s30 + $0x8] sm:$0xff]  ;;  %v9138_v29 = vld [vmem:[%s9121_s30 + $0x1c] sm:$0xff]  ;;  %vm9513_vm11 = vmand %vm10504_vm9, %vm329_vm10 }
  0x71   : > { %845 = vmatpush1.bf16.msra.mxu0 %v8286_v5  ;;  %2294 = vmatpush1.bf16.msra.mxu1 %v8286_v5  ;;  %v508_v21 = vshll.u32 %v467_v15, 16  ;;  %v9141_v30 = vld [vmem:[%s9121_s30 + $0x30] sm:$0x11]  ;;  %v1926_v33 = vshrl.u32 %v9135_v28, 16  ;;  %v1929_v34 = vshll.u32 %v9135_v28, 16  ;;  %v1935_v37 = vshll.u32 %v9138_v29, 16 }
  0x72   : > { %846 = vmatprep.subr.bf16.mxu0 %v8287_v6  ;;  %2295 = vmatprep.subr.bf16.mxu1 %v8287_v6  ;;  %v477_v23 = vrot.slane %v475_v16, 4  ;;  %v480_v24 = vrot.slane %v478_v17, 5  ;;  %v486_v25 = vrot.slane %v484_v18, 5  ;;  %v504_v26 = vrot.slane %v502_v19, 4  ;;  %v8302_v40 = vld [vmem:[#allocation4 + $0x1c4] ss:$8 sps:$4 sm:$0xff]  }
  0x73   : > { %v510_v27 = vrot.slane %v508_v21, 5  ;;  %v1953_v38 = vshrl.u32 %v9138_v29, 16  ;;  %v1959_v39 = vshll.u32 %v9141_v30, 16  ;;  %v1928_v43 = vrot.slane %v1926_v33, 4  ;;  %v8304_v50 = vld [vmem:[#allocation4 + $0x1c0] ss:$8 sps:$4 sm:$0xff]  }
  0x74   : > { %v481_v31 = vor.u32 %v480_v24, %v477_v23  ;;  %v505_v32 = vor.u32 %v504_v26, %v486_v25  ;;  %v1931_v44 = vrot.slane %v1929_v34, 5  ;;  %v1937_v45 = vrot.slane %v1935_v37, 5  ;;  %v8305_v54 = vld [vmem:[#allocation4 + $0x1d4] ss:$8 sps:$4 sm:$0xff]   ;;  %v8307_v57 = vld [vmem:[#allocation4 + $0x1d0] ss:$8 sps:$4 sm:$0xff]  }
  0x75   : > { %847 = vmatpush1.bf16.msra.mxu0 %v8289_v7  ;;  %2296 = vmatpush1.bf16.msra.mxu1 %v8289_v7  ;;  %v1955_v46 = vrot.slane %v1953_v38, 4  ;;  %v1961_v53 = vrot.slane %v1959_v39, 5  ;;  %v8308_v60 = vld [vmem:[#allocation4 + $0x1e4] ss:$8 sps:$4 sm:$0xff]   ;;  %v7434_v62 = vcombine.high %v9135_v28, %v9138_v29  ;;  %v8310_v63 = vld [vmem:[#allocation4 + $0x1e0] ss:$8 sps:$4 sm:$0xff]   ;;  %v7433_v19 = vcombine.low %v9135_v28, %v9138_v29 }
  0x76   : > { %848 = vmatprep.subr.bf16.mxu0 %v8290_v8  ;;  %2297 = vmatprep.subr.bf16.mxu1 %v8290_v8  ;;  %v482_v41 = vrot.slane %v481_v31, 4  ;;  %v506_v42 = vrot.slane %v505_v32, 4  ;;  %v1932_v49 = vor.u32 %v1931_v44, %v1928_v43  ;;  %v8311_v0 = vld [vmem:[#allocation4 + $0x1f4] ss:$8 sps:$4 sm:$0xff]   ;;  %v423_v1 = vld [vmem:[%s9121_s30 + $0x3c] sm:$0xff]  ;;  %v9179_v3 = vld [vmem:[%s9121_s30 + $0x44] sm:$0xff] }
  0x77   : > { %v1956_v52 = vor.u32 %v1955_v46, %v1937_v45  ;;  %v425_v2 = vld [vmem:[%s9121_s30 + $0x50] sm:$0xff]  ;;  %v8314_v5 = vld [vmem:[#allocation4 + $0x204] ss:$8 sps:$4 sm:$0xff]   ;;  %v523_v6 = vshrl.u32 %v423_v1, 16  ;;  %v526_v8 = vshll.u32 %v423_v1, 16  ;;  %vm328_vm12 = vcmask 1040384  }
  0x78   : > { %v9156_v47 = vsel %vm9147_vm2, %v482_v41, %v486_v25  ;;  %v9160_v48 = vsel %vm9147_vm2, %v506_v42, %v510_v27  ;;  %v1933_v55 = vrot.slane %v1932_v49, 4  ;;  %v8313_v4 = vld [vmem:[#allocation4 + $0x1f0] ss:$8 sps:$4 sm:$0xff]   ;;  %v9182_v7 = vld [vmem:[%s9121_s30 + $0x58] sm:$0xff]  ;;  %v9198_v32 = vld [vmem:[%s9121_s30 + $0x24] sm:$0xf] }
  0x79   : > { %849 = vmatpush1.bf16.msra.mxu0 %v8292_v9  ;;  %2298 = vmatpush1.bf16.msra.mxu1 %v8292_v9  ;;  %v7234_v51 = vcombine.high %v9156_v47, %v9160_v48  ;;  %v1957_v56 = vrot.slane %v1956_v52, 4  ;;  %v532_v9 = vshll.u32 %v425_v2, 16  ;;  %v1983_v15 = vshll.u32 %v9182_v7, 16  ;;  %v8316_v17 = vld [vmem:[#allocation4 + $0x200] ss:$8 sps:$4 sm:$0xff]   ;;  %vm330_vm15 = vmand %vm328_vm12, %vm329_vm10  ;;  %s8923_s29 = smov 32  }
  0x7a   : > { %850 = vmatprep.subr.bf16.mxu0 %v8293_v10  ;;  %2299 = vmatprep.subr.bf16.mxu1 %v8293_v10  ;;  %v9166_v58 = vsel %vm9147_vm2, %v1933_v55, %v1937_v45  ;;  %v550_v10 = vshrl.u32 %v425_v2, 16  ;;  %v2001_v16 = vshrl.u32 %v9182_v7, 16  ;;  %v525_v18 = vrot.slane %v523_v6, 4  ;;  %v8319_v25 = vld [vmem:[#allocation4 + $0x210] ss:$8 sps:$4 sm:$0xff]   ;;  %s8924_s17 = smov 96  }
  0x7b   : > { %872 = vmatprep.mubr.bf16.mxu0 %v7234_v51  ;;  %v9170_v59 = vsel %vm9147_vm2, %v1957_v56, %v1961_v53  ;;  %v528_v21 = vrot.slane %v526_v8, 5  ;;  %v7437_v24 = vcombine.high %v9179_v3, %v9182_v7  ;;  %v9195_v31 = vld [vmem:[%s9121_s30 + $0x10] sm:$0xf]  ;;  %v469_v33 = vld [vmem:[%s9121_s30 + $0x64] sm:$0x11]  ;;  %v1985_v34 = vrot.slane %v1983_v15, 5 }
  0x7c   : > { %v7386_v61 = vcombine.high %v9166_v58, %v9170_v59  ;;  %v552_v23 = vrot.slane %v550_v10, 4  ;;  %v7436_v37 = vcombine.low %v9179_v3, %v9182_v7  ;;  %v7435_v38 = vcombine.low %v9195_v31, %v9198_v32  ;;  %v9206_v39 = vld [vmem:[%s9121_s30 + $0x6c] sm:$0x11]  ;;  %v420_v41 = vld [vmem:[%s9121_s30 + $0x8] sm:$0xf]  ;;  %s7932_s18 = sshll.u32 %s8990_s28, 10 }
  0x7d   : > { %851 = vmatpush1.bf16.msra.mxu0 %v8295_v11  ;;  %2300 = vmatpush1.bf16.msra.mxu1 %v8295_v11  ;;  %v1974_v11 = vshrl.u32 %v9179_v3, 16  ;;  %v529_v42 = vor.u32 %v528_v21, %v525_v18  ;;  %v556_v43 = vshll.u32 %v469_v33, 16  ;;  %v422_v44 = vld [vmem:[%s9121_s30 + $0x1c] sm:$0xf]  ;;  %v8322_v45 = vld [vmem:[#allocation4 + $0x220] ss:$8 sps:$4 sm:$0xff]   ;;  %v7233_v18 = vcombine.low %v9156_v47, %v9160_v48  ;;  %s10440_s13 = scalar_lea.hbm %s10496_s7, %s7932_s18 }
  0x7e   : > { %852 = vmatprep.subr.bf16.mxu0 %v8296_v12  ;;  %2301 = vmatprep.subr.bf16.mxu1 %v8296_v12  ;;  %v1977_v12 = vshll.u32 %v9179_v3, 16  ;;  %v2007_v51 = vshll.u32 %v9206_v39, 16  ;;  %v8323_v52 = vld [vmem:[#allocation4 + $0x234] ss:$8 sps:$4 sm:$0xff]   ;;  %v489_v53 = vshrl.u32 %v420_v41, 16  ;;  %v498_v55 = vshll.u32 %v422_v44, 16 }
  0x7f   : > { %2321 = vmatprep.mubr.bf16.mxu1 %v7386_v61  ;;  %v1976_v26 = vrot.slane %v1974_v11, 4  ;;  %v512_v56 = vshrl.u32 %v422_v44, 16  ;;  %v530_v61 = vrot.slane %v529_v42, 4  ;;  %v1963_v1 = vshrl.u32 %v9198_v32, 16  ;;  %v8325_v8 = vld [vmem:[#allocation4 + $0x230] ss:$8 sps:$4 sm:$0xff]  }
  0x80   : > { %v1979_v27 = vrot.slane %v1977_v12, 5  ;;  %v2009_v6 = vrot.slane %v2007_v51, 5  ;;  %v8328_v11 = vld [vmem:[#allocation4 + $0x244] ss:$8 sps:$4 sm:$0xff]   ;;  %v9216_v12 = vrot.slane %v498_v55, 5  ;;  %v7385_v21 = vcombine.low %v9166_v58, %v9170_v59  ;;  %p10574_p7 = scmp.ne.s32.totalorder %s10509_s11, 0 }
  0x81   : > { %853 = vmatpush1.bf16.msra.mxu0 %v8298_v20  ;;  %2302 = vmatpush1.bf16.msra.mxu1 %v8298_v20  ;;  %v8317_v20 = vld [vmem:[#allocation4 + $0x214] ss:$8 sps:$4 sm:$0xff]   ;;  %v514_v15 = vrot.slane %v512_v56, 4  ;;  %v9243_v58 = vld [vmem:[%s9121_s30 + $0x38] sm:$0x1]  ;;  %vm331_vm13 = vcmask 1044484  }
  0x82   : > { %854 = vmatprep.subr.bf16.mxu0 %v8299_v22  ;;  %2303 = vmatprep.subr.bf16.mxu1 %v8299_v22  ;;  %v9190_v22 = vrot.slane %v532_v9, 5  ;;  %v1980_v49 = vor.u32 %v1979_v27, %v1976_v26  ;;  %v491_v9 = vrot.slane %v489_v53, 4  ;;  %v1965_v26 = vrot.slane %v1963_v1, 4  ;;  %v8331_v27 = vld [vmem:[#allocation4 + $0x254] ss:$8 sps:$4 sm:$0xff]   ;;  %s8926_s20 = smov [#allocation10]  }
  0x83   : > { %v9246_v59 = vld [vmem:[%s9121_s30 + $0x44] sm:$0xf]  ;;  %v9256_v44 = vld [vmem:[%s9121_s30 + $0x60] sm:$0xf]  ;;  %v8329_v51 = vld [vmem:[#allocation4 + $0x250] ss:$8 sps:$4 sm:$0xff]  }
  0x84   : > { %v553_v46 = vor.u32 %v552_v23, %v9190_v22  ;;  %v468_v23 = vld [vmem:[%s9121_s30 + $0x30] sm:$0x1]  ;;  %v9228_v33 = vsel %vm9147_vm2, %v530_v61, %v9190_v22  ;;  %v9249_v22 = vld [vmem:[%s9121_s30 + $0x58] sm:$0xf]  ;;  %v540_v53 = vshll.u32 %v9246_v59, 16  ;;  %v1997_v61 = vshll.u32 %v9256_v44, 16 }
  0x85   : > { %855 = vmatpush1.bf16.msra.mxu0 %v8301_v35  ;;  %2304 = vmatpush1.bf16.msra.mxu1 %v8301_v35  ;;  %v2003_v35 = vrot.slane %v2001_v16, 4  ;;  %v518_v42 = vshll.u32 %v468_v23, 16  ;;  %v560_v55 = vshrl.u32 %v9249_v22, 16  ;;  %v8334_v56 = vld [vmem:[#allocation4 + $0x264] ss:$8 sps:$4 sm:$0xff]   ;;  %s8847_s9 = sshll.u32 %s8926_s20, 4  ;;  %s8848_s9 = int_to_ptr.vmem [resolvable:$false] %s8847_s9 }
  0x86   : > { %856 = vmatprep.subr.bf16.mxu0 %v8302_v40  ;;  %2305 = vmatprep.subr.bf16.mxu1 %v8302_v40  ;;  %v8320_v40 = vld [vmem:[#allocation4 + $0x224] ss:$8 sps:$4 sm:$0xff]   ;;  %v554_v2 = vrot.slane %v553_v46, 4  ;;  %v1999_v23 = vrot.slane %v1997_v61, 5  ;;  %v8403_v28 = vld [vmem:[#allocation4 + $0x130] ss:$8 sps:$4 sm:$0xff]  }
  0x87   : > { %v8411_v3 = vld [vmem:[#allocation4 + $0x290] ss:$8 sps:$4 sm:$0xff]   ;;  %vm332_vm14 = vsmask.f32 4352  ;;  %vm355_vm0 = vsmask.f32 7938 }
  0x88   : > { %vm9524_vm1 = vmand %vm331_vm13, %vm332_vm14  ;;  %vm357_vm5 = vsmask.f32 7954  ;;  %s8849_s10 = scalar_lea.vmem %s8848_s9, 2048 }
  0x89   : > { %857 = vmatpush1.bf16.msra.mxu0 %v8304_v50  ;;  %2306 = vmatpush1.bf16.msra.mxu1 %v8304_v50  ;;  %v2004_v50 = vor.u32 %v2003_v35, %v1985_v34  ;;  %vm9530_vm4 = vmor %vm9524_vm1, %vm330_vm15 }
  0x8a   : > { %858 = vmatprep.subr.bf16.mxu0 %v8305_v54  ;;  %2307 = vmatprep.subr.bf16.mxu1 %v8305_v54  ;;  %v492_v54 = vshll.u32 %v420_v41, 16  ;;  %vm356_vm14 = vmand %vm328_vm12, %vm355_vm0 }
  0x8b   : > { %vm358_vm15 = vmand %vm331_vm13, %vm357_vm5 }
  0x8c   : > { %v494_v10 = vrot.slane %v492_v54, 5  ;;  %v546_v54 = vshll.u32 %v9249_v22, 16  ;;  %vm9555_vm9 = vmand %vm398_vm8, %vm355_vm0 }
  0x8d   : > { %859 = vmatpush1.bf16.msra.mxu0 %v8307_v57  ;;  %2308 = vmatpush1.bf16.msra.mxu1 %v8307_v57  ;;  %v1940_v57 = vshrl.u32 %v9195_v31, 16  ;;  %vm9566_vm12 = vmand %vm10505_vm7, %vm355_vm0 }
  0x8e   : > { %860 = vmatprep.subr.bf16.mxu0 %v8308_v60  ;;  %2309 = vmatprep.subr.bf16.mxu1 %v8308_v60  ;;  %v1943_v60 = vshll.u32 %v9195_v31, 16  ;;  %v495_v41 = vor.u32 %v494_v10, %v491_v9 }
  0x8f   : > { %v1942_v16 = vrot.slane %v1940_v57, 4 }
  0x91   : > { %861 = vmatpush1.bf16.msra.mxu0 %v8310_v63  ;;  %2310 = vmatpush1.bf16.msra.mxu1 %v8310_v63  ;;  %v558_v63 = vrot.slane %v556_v43, 5 }
  0x92   : > { %862 = vmatprep.subr.bf16.mxu0 %v8311_v0  ;;  %2311 = vmatprep.subr.bf16.mxu1 %v8311_v0  ;;  %v1949_v0 = vshll.u32 %v9198_v32, 16 }
  0x93   : > { %v9232_v35 = vsel %vm9147_vm2, %v554_v2, %v558_v63  ;;  %v2011_v63 = vshrl.u32 %v9256_v44, 16  ;;  %v520_v2 = vrot.slane %v518_v42, 5 }
  0x95   : > { %863 = vmatpush1.bf16.msra.mxu0 %v8313_v4  ;;  %2312 = vmatpush1.bf16.msra.mxu1 %v8313_v4  ;;  %v1981_v4 = vrot.slane %v1980_v49, 4 }
  0x96   : > { %864 = vmatprep.subr.bf16.mxu0 %v8314_v5  ;;  %2313 = vmatprep.subr.bf16.mxu1 %v8314_v5  ;;  %v2005_v5 = vrot.slane %v2004_v50, 4  ;;  %v1969_v50 = vshll.u32 %v9243_v58, 16 }
  0x97   : > { %v9236_v47 = vsel %vm9147_vm2, %v1981_v4, %v1985_v34  ;;  %v515_v34 = vor.u32 %v514_v15, %v9216_v12 }
  0x98   : > { %v9240_v48 = vsel %vm9147_vm2, %v2005_v5, %v2009_v6  ;;  %v8332_v5 = vld [vmem:[#allocation4 + $0x260] ss:$8 sps:$4 sm:$0xff]   ;;  %v7236_v6 = vcombine.low %v9228_v33, %v9232_v35  ;;  %v1971_v10 = vrot.slane %v1969_v50, 5  ;;  %v8340_v50 = vld [vmem:[#allocation4 + $0x4] ss:$8 sps:$4 sm:$0xff]  }
  0x99   : > { %865 = vmatpush1.bf16.msra.mxu0 %v8316_v17  ;;  %2314 = vmatpush1.bf16.msra.mxu1 %v8316_v17  ;;  %v1945_v17 = vrot.slane %v1943_v60, 5  ;;  %v7389_v46 = vcombine.high %v9236_v47, %v9240_v48  ;;  %v516_v1 = vrot.slane %v515_v34, 4 }
  0x9a   : > { %866 = vmatprep.subr.bf16.mxu0 %v8317_v20  ;;  %2315 = vmatprep.subr.bf16.mxu1 %v8317_v20  ;;  %v8326_v20 = vld [vmem:[#allocation4 + $0x240] ss:$8 sps:$4 sm:$0xff]  }
  0x9b   : > { %v1946_v43 = vor.u32 %v1945_v17, %v1942_v16  ;;  %v542_v16 = vrot.slane %v540_v53, 5  ;;  %v9279_v17 = vrot.slane %v546_v54, 5 }
  0x9d   : > { %867 = vmatpush1.bf16.msra.mxu0 %v8319_v25  ;;  %2316 = vmatpush1.bf16.msra.mxu1 %v8319_v25  ;;  %v9223_v25 = vrot.slane %v1949_v0, 5  ;;  %v496_v0 = vrot.slane %v495_v41, 4  ;;  %v1947_v4 = vrot.slane %v1946_v43, 4  ;;  %v8335_v43 = vld [vmem:[#allocation4 + $0x270] ss:$8 sps:$4 sm:$0xff]  }
  0x9e   : > { %868 = vmatprep.subr.bf16.mxu0 %v8320_v40  ;;  %2317 = vmatprep.subr.bf16.mxu1 %v8320_v40  ;;  %v9252_v40 = vld [vmem:[%s9121_s30 + $0x4c] sm:$0xf] }
  0x9f   : > { %v1966_v49 = vor.u32 %v1965_v26, %v9223_v25  ;;  %v1988_v57 = vshrl.u32 %v9252_v40, 16  ;;  %v1991_v60 = vshll.u32 %v9252_v40, 16  ;;  %v2013_v26 = vrot.slane %v2011_v63, 4  ;;  %v8343_v63 = vld [vmem:[#allocation4 + $0x14] ss:$8 sps:$4 sm:$0xff]  }
  0xa1   : > { %869 = vmatpush1.bf16.msra.mxu0 %v8322_v45  ;;  %2318 = vmatpush1.bf16.msra.mxu1 %v8322_v45  ;;  %v7237_v45 = vcombine.high %v9228_v33, %v9232_v35  ;;  %v1967_v9 = vrot.slane %v1966_v49, 4  ;;  %v9282_v33 = vld [vmem:[%s9121_s30 + $0x74] sm:$0x1]  ;;  %v501_v35 = vsel %vm9147_vm2, %v496_v0, %v9216_v12 }
  0xa2   : > { %870 = vmatprep.subr.bf16.mxu0 %v8323_v52  ;;  %2319 = vmatprep.subr.bf16.mxu1 %v8323_v52  ;;  %v537_v52 = vshrl.u32 %v9246_v59, 16  ;;  %v2017_v49 = vshll.u32 %v9282_v33, 16 }
  0xa3   : > { %v1972_v41 = vsel %vm9147_vm2, %v1967_v9, %v1971_v10  ;;  %v8344_v10 = vld [vmem:[#allocation4 + $0x20] ss:$8 sps:$4 sm:$0xff]  }
  0xa4   : > { %v539_v15 = vrot.slane %v537_v52, 4  ;;  %v2019_v61 = vrot.slane %v2017_v49, 5  ;;  %v8356_v49 = vld [vmem:[#allocation4 + $0x60] ss:$8 sps:$4 sm:$0xff]  }
  0xa5   : > { %871 = vmatpush1.bf16.msra.mxu0 %v8325_v8  ;;  %2320 = vmatpush1.bf16.msra.mxu1 %v8325_v8  ;;  %v7388_v8 = vcombine.low %v9236_v47, %v9240_v48  ;;  %v521_v47 = vsel %vm9147_vm2, %v516_v1, %v520_v2  ;;  %v1952_v48 = vsel %vm9147_vm2, %v1947_v4, %v9223_v25  ;;  %v8338_v25 = vld [vmem:[#allocation4] ss:$8 sps:$4 sm:$0xff]   ;;  %v8341_v1 = vld [vmem:[#allocation4 + $0x10] ss:$8 sps:$4 sm:$0xff]  }
  0xa6   : > { %893 = vmatprep.subr.bf16.mxu0 %v8328_v11  ;;  %2342 = vmatprep.subr.bf16.mxu1 %v8328_v11  ;;  %v9277_v11 = vld [vmem:[%s9121_s30 + $0x6c] sm:$0x1]  ;;  %v543_v34 = vor.u32 %v542_v16, %v539_v15  ;;  %v7235_v52 = vcombine.low %v501_v35, %v521_v47  ;;  %v7387_v53 = vcombine.low %v1952_v48, %v1972_v41 }
  0xa7   : > { %v566_v42 = vshll.u32 %v9277_v11, 16  ;;  %v7286_v15 = vcombine.low %v9246_v59, %v9249_v22  ;;  %v8349_v16 = vld [vmem:[#allocation4 + $0x34] ss:$8 sps:$4 sm:$0xff]  }
  0xa8   : > { %873 = vmatmul.mubr.bf16.vlgmr.msra.gmra.mrb[0].mxu0 %v7233_v18  ;;  %2322 = vmatmul.mubr.bf16.vlgmr.msra.gmra.mrb[0].mxu1 %v7385_v21  ;;  %v562_v18 = vrot.slane %v560_v55, 4  ;;  %v1993_v21 = vrot.slane %v1991_v60, 5  ;;  %v544_v54 = vrot.slane %v543_v34, 4  ;;  %v8355_v48 = vld [vmem:[#allocation4 + $0x54] ss:$8 sps:$4 sm:$0xff]  }
  0xa9   : > { %894 = vmatpush1.bf16.msra.mxu0 %v8326_v20  ;;  %2343 = vmatpush1.bf16.msra.mxu1 %v8326_v20  ;;  %v1990_v20 = vrot.slane %v1988_v57, 4  ;;  %v568_v55 = vrot.slane %v566_v42, 5  ;;  %v2765_v42 = vrot.slane %v9182_v7, 5  ;;  %v8416_v7 = vld [vmem:[#allocation4 + $0x2a4] ss:$8 sps:$4 sm:$0xff]  }
  0xaa   : > { %895 = vmatprep.subr.bf16.mxu0 %v8331_v27  ;;  %2344 = vmatprep.subr.bf16.mxu1 %v8331_v27  ;;  %v8337_v27 = vld [vmem:[#allocation4 + $0x274] ss:$8 sps:$4 sm:$0xff]   ;;  %v563_v12 = vor.u32 %v562_v18, %v9279_v17  ;;  %v549_v0 = vsel %vm9147_vm2, %v544_v54, %v9279_v17  ;;  %v7438_v17 = vcombine.low %v9252_v40, %v9256_v44  ;;  %v8428_v40 = vld [vmem:[#allocation4 + $0x2e4] ss:$8 sps:$4 sm:$0xff]  }
  0xab   : > { %882 = vmatprep.mubr.bf16.mxu0 %v7237_v45  ;;  %2331 = vmatprep.mubr.bf16.mxu1 %v7389_v46  ;;  %v1994_v45 = vor.u32 %v1993_v21, %v1990_v20  ;;  %v2014_v46 = vor.u32 %v2013_v26, %v1999_v23  ;;  %v7282_v18 = vcombine.high %v9124_v13, %v9127_v14  ;;  %v2758_v20 = vrot.slane %v9141_v30, 5  ;;  %v8347_v21 = vld [vmem:[#allocation4 + $0x30] ss:$8 sps:$4 sm:$0xff]   ;;  %v8352_v26 = vld [vmem:[#allocation4 + $0x44] ss:$8 sps:$4 sm:$0xff]  }
  0xac   : > { %v2737_v30 = vld [vmem:[%s9121_s30 + $0x8] sm:$0xee] }
  0xad   : > { %896 = vmatpush1.bf16.msra.mxu0 %v8329_v51  ;;  %2345 = vmatpush1.bf16.msra.mxu1 %v8329_v51  ;;  %v8922_v51 = vmov 0   ;;  %v1995_v57 = vrot.slane %v1994_v45, 4  ;;  %v2015_v60 = vrot.slane %v2014_v46, 4  ;;  %v7481_v35 = vrot.slane %v2737_v30, 9  ;;  %v2739_v45 = vld [vmem:[%s9121_s30 + $0x44] sm:$0xee] }
  0xae   : > { %897 = vmatprep.subr.bf16.mxu0 %v8334_v56  ;;  %2346 = vmatprep.subr.bf16.mxu1 %v8334_v56  ;;  %v564_v56 = vrot.slane %v563_v12, 4  ;;  %v8358_v12 = vld [vmem:[#allocation4 + $0x64] ss:$8 sps:$4 sm:$0xff]   ;;  %v2771_v46 = vrot.slane %v2765_v42, 4  ;;  %v8361_v54 = vld [vmem:[#allocation4 + $0x74] ss:$8 sps:$4 sm:$0xff]  }
  0xaf   : > { %v2000_v4 = vsel %vm9147_vm2, %v1995_v57, %v1999_v23  ;;  %v2751_v23 = vrot.slane %v9138_v29, 5  ;;  %v2755_v57 = vrot.slane %v9198_v32, 5  ;;  %v8408_v29 = vld [vmem:[#allocation4 + $0x284] ss:$8 sps:$4 sm:$0xff]   ;;  %v8417_v32 = vld [vmem:[#allocation4 + $0x2b0] ss:$8 sps:$4 sm:$0xff]  }
  0xb0   : > { %883 = vmatmul.mubr.bf16.gmra.mrb[4].mxu0 %v7236_v6  ;;  %2332 = vmatmul.mubr.bf16.gmra.mrb[4].mxu1 %v7388_v8  ;;  %v569_v2 = vsel %vm9147_vm2, %v564_v56, %v568_v55  ;;  %v8346_v6 = vld [vmem:[#allocation4 + $0x24] ss:$8 sps:$4 sm:$0xff]   ;;  %v8359_v56 = vld [vmem:[#allocation4 + $0x70] ss:$8 sps:$4 sm:$0xff]   ;;  %v8425_v59 = vld [vmem:[#allocation4 + $0x2d4] ss:$8 sps:$4 sm:$0xff]  }
  0xb1   : > { %898 = vmatpush1.bf16.msra.mxu0 %v8332_v5  ;;  %2347 = vmatpush1.bf16.msra.mxu1 %v8332_v5  ;;  %v2020_v5 = vsel %vm9147_vm2, %v2015_v60, %v2019_v61  ;;  %v7238_v8 = vcombine.low %v549_v0, %v569_v2  ;;  %v2757_v14 = vrot.slane %v2751_v23, 4  ;;  %v8364_v60 = vld [vmem:[#allocation4 + $0x84] ss:$8 sps:$4 sm:$0xff]   ;;  %v2738_v61 = vld [vmem:[%s9121_s30 + $0x10] sm:$0xe]  ;;  %v2760_v2 = vrot.slane %v2755_v57, 4 }
  0xb2   : > { %899 = vmatprep.subr.bf16.mxu0 %v8337_v27  ;;  %2348 = vmatprep.subr.bf16.mxu1 %v8337_v27  ;;  %v7390_v9 = vcombine.low %v2000_v4, %v2020_v5  ;;  %v8350_v27 = vld [vmem:[#allocation4 + $0x40] ss:$8 sps:$4 sm:$0xff]   ;;  %v7482_v0 = vrot.slane %v2738_v61, 9  ;;  %v2761_v4 = vrot.slane %v9243_v58, 5  ;;  %v1291_v58 = vld [vmem:[%s9121_s30 + $0x44] sm:$0xe] }
  0xb3   : > { %925 = vmatprep.mubr.bf16.mxu0 %v8922_v51  ;;  %2374 = vmatprep.mubr.bf16.mxu1 %v8922_v51  ;;  %v9332_v47 = vsel %vm9325_vm6, %v2757_v14, %v2758_v20  ;;  %v2769_v20 = vrot.slane %v9256_v44, 5  ;;  %v8383_v61 = vld [vmem:[#allocation4 + $0xf0] ss:$8 sps:$4 sm:$0xff]   ;;  %v8426_v44 = vld [vmem:[#allocation4 + $0x2e0] ss:$8 sps:$4 sm:$0xff]  }
  0xb4   : > { %v9362_v5 = vsel %vm9325_vm6, %v7482_v0, %v2755_v57  ;;  %v8380_v57 = vld [vmem:[#allocation4 + $0xe0] ss:$8 sps:$4 sm:$0xff]   ;;  %385 = vst.msk [vmem:[#allocation2 + $0x14] sm:$0xf] %vm10505_vm7, %v8922_v51  ;;  %394 = vst.msk [vmem:[#allocation2 + $0x50] sm:$0xf] %vm10505_vm7, %v8922_v51 }
  0xb5   : > { %900 = vmatpush1.bf16.msra.mxu0 %v8335_v43  ;;  %2349 = vmatpush1.bf16.msra.mxu1 %v8335_v43  ;;  %v8353_v43 = vld [vmem:[#allocation4 + $0x50] ss:$8 sps:$4 sm:$0xff]   ;;  %v2774_v30 = vrot.slane %v2769_v20, 4  ;;  %v9397_v0 = vld [vmem:[%s9121_s30] sm:$0xee] }
  0xb6   : > { %1182 = vmatprep.subr.bf16.mxu0 %v8340_v50  ;;  %2631 = vmatprep.subr.bf16.mxu1 %v8340_v50  ;;  %v7483_v50 = vrot.slane %v2739_v45, 9  ;;  %404 = vst.msk [vmem:[#allocation2 + $0x24] sm:$0xf] %vm398_vm8, %v8922_v51  ;;  %413 = vst.msk [vmem:[#allocation2 + $0x60] sm:$0xf] %vm398_vm8, %v8922_v51 }
  0xb7   : > { %vm1761_vm8 = vsmask.f32 4368  ;;  %v8557_v13 = vld [vmem:[#allocation7 + $0x90] ss:$8 sps:$4 sm:$0xff]  }
  0xb8   : > { %7279 = vmatmul.mubr.msk.bf16.vlgmr.msra.gmra.mrb[0].mxu0 %vm10503_vm3, %v7235_v52  ;;  %7431 = vmatmul.mubr.msk.bf16.vlgmr.msra.gmra.mrb[0].mxu1 %vm10503_vm3, %v7387_v53  ;;  %v9347_v52 = vsel %vm9325_vm6, %v7483_v50, %v2765_v42  ;;  %v8374_v50 = vld [vmem:[#allocation4 + $0xc0] ss:$8 sps:$4 sm:$0xff]   ;;  %vm9620_vm13 = vmor %vm329_vm10, %vm1761_vm8  ;;  %vm386_vm8 = vcmask 253952  }
  0xb9   : > { %1183 = vmatpush1.bf16.msra.mxu0 %v8338_v25  ;;  %2632 = vmatpush1.bf16.msra.mxu1 %v8338_v25  ;;  %v2772_v25 = vrot.slane %v9206_v39, 5 }
  0xba   : > { %1184 = vmatprep.subr.bf16.mxu0 %v8343_v63  ;;  %2633 = vmatprep.subr.bf16.mxu1 %v8343_v63  ;;  %v8362_v63 = vld [vmem:[#allocation4 + $0x80] ss:$8 sps:$4 sm:$0xff]  }
  0xbb   : > { %935 = vmatprep.mubr.bf16.mxu0 %v8922_v51  ;;  %2384 = vmatprep.mubr.bf16.mxu1 %v8922_v51  ;;  %v9351_v53 = vsel %vm9325_vm6, %v2771_v46, %v2772_v25  ;;  %v8371_v46 = vld [vmem:[#allocation4 + $0xb0] ss:$8 sps:$4 sm:$0xff]   ;;  %v8379_v25 = vld [vmem:[#allocation4 + $0xd4] ss:$8 sps:$4 sm:$0xff]  }
  0xbc   : > { %v7489_v55 = vcombine.high %v9347_v52, %v9351_v53  ;;  %v7488_v39 = vcombine.low %v9347_v52, %v9351_v53  ;;  %v8470_v52 = vld [vmem:[#allocation7 + $0x140] ss:$8 sps:$4 sm:$0xff]   ;;  %v8472_v53 = vld [vmem:[#allocation7 + $0x144] ss:$8 sps:$4 sm:$0xff]  }
  0xbd   : > { %1185 = vmatpush1.bf16.msra.mxu0 %v8341_v1  ;;  %2634 = vmatpush1.bf16.msra.mxu1 %v8341_v1  ;;  %v8367_v1 = vld [vmem:[#allocation4 + $0x94] ss:$8 sps:$4 sm:$0xff]  }
  0xbe   : > { %1186 = vmatprep.subr.bf16.mxu0 %v8346_v6  ;;  %2635 = vmatprep.subr.bf16.mxu1 %v8346_v6  ;;  %v9366_v6 = vsel %vm9325_vm6, %v2760_v2, %v2761_v4  ;;  %v8387_v4 = vld [vmem:[#allocation4 + $0x100] ss:$8 sps:$4 sm:$0xff]  }
  0xc0   : > { %7280 = vmatmul.mubr.msk.bf16.gmra.mrb[4].mxu0 %vm10503_vm3, %v7238_v8  ;;  %7432 = vmatmul.mubr.msk.bf16.gmra.mrb[4].mxu1 %vm10503_vm3, %v7390_v9  ;;  %v8365_v8 = vld [vmem:[#allocation4 + $0x90] ss:$8 sps:$4 sm:$0xff]   ;;  %v7487_v9 = vcombine.low %v9362_v5, %v9366_v6  ;;  %v8478_v6 = vld [vmem:[#allocation7 + $0x164] ss:$8 sps:$4 sm:$0xff]  }
  0xc1   : > { %1187 = vmatpush1.bf16.msra.mxu0 %v8344_v10  ;;  %2636 = vmatpush1.bf16.msra.mxu1 %v8344_v10  ;;  %v8370_v10 = vld [vmem:[#allocation4 + $0xa4] ss:$8 sps:$4 sm:$0xff]   ;;  %v8473_v5 = vld [vmem:[#allocation7 + $0x150] ss:$8 sps:$4 sm:$0xff]  }
  0xc2   : > { %1188 = vmatprep.subr.bf16.mxu0 %v8349_v16  ;;  %2637 = vmatprep.subr.bf16.mxu1 %v8349_v16  ;;  %v1323_v16 = vrot.slane %v9249_v22, 5  ;;  %v8423_v22 = vld [vmem:[#allocation4 + $0x2d0] ss:$8 sps:$4 sm:$0xff]  }
  0xc3   : > { %1214 = vmatprep.mubr.bf16.mxu0 %v7282_v18  ;;  %2663 = vmatprep.mubr.bf16.mxu1 %v7434_v62  ;;  %v9336_v62 = vsel %vm9325_vm6, %v7481_v35, %v2751_v23  ;;  %v1329_v18 = vrot.slane %v9277_v11, 5  ;;  %v2740_v23 = vld [vmem:[%s9121_s30 + $0x4c] sm:$0xe]  ;;  %v2775_v35 = vrot.slane %v9282_v33, 5 }
  0xc4   : > { %v7485_v41 = vcombine.low %v9336_v62, %v9332_v47  ;;  %v7486_v34 = vcombine.high %v9336_v62, %v9332_v47  ;;  %v7484_v14 = vrot.slane %v2740_v23, 9  ;;  %v8393_v23 = vld [vmem:[#allocation4 + $0x110] ss:$8 sps:$4 sm:$0xff]   ;;  %v8464_v47 = vld [vmem:[#allocation4 + $0x3a0] ss:$8 sps:$4 sm:$0xff]  }
  0xc5   : > { %1189 = vmatpush1.bf16.msra.mxu0 %v8347_v21  ;;  %2638 = vmatpush1.bf16.msra.mxu1 %v8347_v21  ;;  %v7332_v21 = vrot.slane %v1291_v58, 9  ;;  %v8395_v58 = vld [vmem:[#allocation4 + $0x114] ss:$8 sps:$4 sm:$0xff]  }
  0xc6   : > { %1190 = vmatprep.subr.bf16.mxu0 %v8352_v26  ;;  %2639 = vmatprep.subr.bf16.mxu1 %v8352_v26  ;;  %v8368_v26 = vld [vmem:[#allocation4 + $0xa0] ss:$8 sps:$4 sm:$0xff]  }
  0xc7   : > { %v9378_v42 = vsel %vm9325_vm6, %v7332_v21, %v1323_v16 }
  0xc9   : > { %1191 = vmatpush1.bf16.msra.mxu0 %v8350_v27  ;;  %2640 = vmatpush1.bf16.msra.mxu1 %v8350_v27  ;;  %v1328_v27 = vrot.slane %v1323_v16, 4  ;;  %v8752_v16 = vld [vmem:[%s9121_s30 + $0x28] sm:$0x11] }
  0xca   : > { %1192 = vmatprep.subr.bf16.mxu0 %v8355_v48  ;;  %2641 = vmatprep.subr.bf16.mxu1 %v8355_v48  ;;  %v8373_v48 = vld [vmem:[#allocation4 + $0xb4] ss:$8 sps:$4 sm:$0xff]  }
  0xcb   : > { %v9382_v11 = vsel %vm9325_vm6, %v1328_v27, %v1329_v18  ;;  %v1312_v18 = vrot.slane %v8752_v16, 5  ;;  %v9411_v27 = vld [vmem:[%s9121_s30 + $0x50] sm:$0xff] }
  0xcc   : > { %v7338_v33 = vcombine.low %v9378_v42, %v9382_v11  ;;  %v8449_v16 = vld [vmem:[#allocation4 + $0x354] ss:$8 sps:$4 sm:$0xff]   ;;  %v8479_v11 = vld [vmem:[#allocation7 + $0x170] ss:$8 sps:$4 sm:$0xff]  }
  0xcd   : > { %1193 = vmatpush1.bf16.msra.mxu0 %v8353_v43  ;;  %2642 = vmatpush1.bf16.msra.mxu1 %v8353_v43  ;;  %v9386_v43 = vsel %vm9325_vm6, %v7484_v14, %v2769_v20  ;;  %v7329_v20 = vrot.slane %v9397_v0, 9  ;;  %v8435_v0 = vld [vmem:[#allocation4 + $0x310] ss:$8 sps:$4 sm:$0xff]   ;;  %v8481_v42 = vld [vmem:[#allocation7 + $0x174] ss:$8 sps:$4 sm:$0xff]  }
  0xce   : > { %1194 = vmatprep.subr.bf16.mxu0 %v8358_v12  ;;  %2643 = vmatprep.subr.bf16.mxu1 %v8358_v12  ;;  %v9390_v12 = vsel %vm9325_vm6, %v2774_v30, %v2775_v35  ;;  %v8399_v30 = vld [vmem:[#allocation4 + $0x124] ss:$8 sps:$4 sm:$0xff]   ;;  %v8397_v35 = vld [vmem:[#allocation4 + $0x120] ss:$8 sps:$4 sm:$0xff]  }
  0xcf   : > { %v7490_v45 = vcombine.low %v9386_v43, %v9390_v12  ;;  %v8484_v43 = vld [vmem:[#allocation7 + $0x184] ss:$8 sps:$4 sm:$0xff]   ;;  %v8482_v12 = vld [vmem:[#allocation7 + $0x180] ss:$8 sps:$4 sm:$0xff]  }
  0xd1   : > { %1195 = vmatpush1.bf16.msra.mxu0 %v8356_v49  ;;  %2644 = vmatpush1.bf16.msra.mxu1 %v8356_v49  ;;  %v8376_v49 = vld [vmem:[#allocation4 + $0xc4] ss:$8 sps:$4 sm:$0xff]  }
  0xd2   : > { %1196 = vmatprep.subr.bf16.mxu0 %v8361_v54  ;;  %2645 = vmatprep.subr.bf16.mxu1 %v8361_v54  ;;  %v8377_v54 = vld [vmem:[#allocation4 + $0xd0] ss:$8 sps:$4 sm:$0xff]  }
  0xd5   : > { %1197 = vmatpush1.bf16.msra.mxu0 %v8359_v56  ;;  %2646 = vmatpush1.bf16.msra.mxu1 %v8359_v56  ;;  %v8382_v56 = vld [vmem:[#allocation4 + $0xe4] ss:$8 sps:$4 sm:$0xff]  }
  0xd6   : > { %1198 = vmatprep.subr.bf16.mxu0 %v8364_v60  ;;  %2647 = vmatprep.subr.bf16.mxu1 %v8364_v60  ;;  %v8385_v60 = vld [vmem:[#allocation4 + $0xf4] ss:$8 sps:$4 sm:$0xff]  }
  0xd9   : > { %1199 = vmatpush1.bf16.msra.mxu0 %v8362_v63  ;;  %2648 = vmatpush1.bf16.msra.mxu1 %v8362_v63  ;;  %v8389_v63 = vld [vmem:[#allocation4 + $0x104] ss:$8 sps:$4 sm:$0xff]  }
  0xda   : > { %1200 = vmatprep.subr.bf16.mxu0 %v8367_v1  ;;  %2649 = vmatprep.subr.bf16.mxu1 %v8367_v1  ;;  %v9400_v1 = vld [vmem:[%s9121_s30 + $0x14] sm:$0xff] }
  0xdb   : > { %v1305_v2 = vrot.slane %v9400_v1, 5 }
  0xdd   : > { %1201 = vmatpush1.bf16.msra.mxu0 %v8365_v8  ;;  %2650 = vmatpush1.bf16.msra.mxu1 %v8365_v8  ;;  %v8751_v8 = vld [vmem:[%s9121_s30] sm:$0xff]  ;;  %v1311_v21 = vrot.slane %v1305_v2, 4 }
  0xde   : > { %1202 = vmatprep.subr.bf16.mxu0 %v8370_v10  ;;  %2651 = vmatprep.subr.bf16.mxu1 %v8370_v10  ;;  %v7281_v10 = vcombine.low %v8751_v8, %v9400_v1  ;;  %v8440_v1 = vld [vmem:[#allocation4 + $0x324] ss:$8 sps:$4 sm:$0xff]   ;;  %v8441_v8 = vld [vmem:[#allocation4 + $0x330] ss:$8 sps:$4 sm:$0xff]  }
  0xdf   : > { %v9446_v31 = vsel %vm9325_vm6, %v1311_v21, %v1312_v18  ;;  %v8447_v18 = vld [vmem:[#allocation4 + $0x350] ss:$8 sps:$4 sm:$0xff]   ;;  %v1319_v21 = vrot.slane %v9411_v27, 5 }
  0xe1   : > { %1203 = vmatpush1.bf16.msra.mxu0 %v8368_v26  ;;  %2652 = vmatpush1.bf16.msra.mxu1 %v8368_v26  ;;  %v8753_v26 = vld [vmem:[%s9121_s30 + $0x3c] sm:$0xff] }
  0xe2   : > { %1204 = vmatprep.subr.bf16.mxu0 %v8373_v48  ;;  %2653 = vmatprep.subr.bf16.mxu1 %v8373_v48  ;;  %v7285_v14 = vcombine.high %v8753_v26, %v9411_v27  ;;  %v7284_v48 = vcombine.low %v8753_v26, %v9411_v27  ;;  %v1290_v26 = vld [vmem:[%s9121_s30 + $0x3c] sm:$0xee] }
  0xe5   : > { %1205 = vmatpush1.bf16.msra.mxu0 %v8371_v46  ;;  %2654 = vmatpush1.bf16.msra.mxu1 %v8371_v46  ;;  %v8405_v46 = vld [vmem:[#allocation4 + $0x134] ss:$8 sps:$4 sm:$0xff]  }
  0xe6   : > { %1206 = vmatprep.subr.bf16.mxu0 %v8376_v49  ;;  %2655 = vmatprep.subr.bf16.mxu1 %v8376_v49  ;;  %v9428_v49 = vld [vmem:[%s9121_s30 + $0x1c] sm:$0xf] }
  0xe9   : > { %1207 = vmatpush1.bf16.msra.mxu0 %v8374_v50  ;;  %2656 = vmatpush1.bf16.msra.mxu1 %v8374_v50 }
  0xea   : > { %1208 = vmatprep.subr.bf16.mxu0 %v8379_v25  ;;  %2657 = vmatprep.subr.bf16.mxu1 %v8379_v25  ;;  %v8413_v25 = vld [vmem:[#allocation4 + $0x294] ss:$8 sps:$4 sm:$0xff]  }
  0xed   : > { %1209 = vmatpush1.bf16.msra.mxu0 %v8377_v54  ;;  %2658 = vmatpush1.bf16.msra.mxu1 %v8377_v54  ;;  %v8419_v54 = vld [vmem:[#allocation4 + $0x2b4] ss:$8 sps:$4 sm:$0xff]  }
  0xee   : > { %1210 = vmatprep.subr.bf16.mxu0 %v8382_v56  ;;  %2659 = vmatprep.subr.bf16.mxu1 %v8382_v56  ;;  %v9442_v56 = vsel %vm9325_vm6, %v7329_v20, %v1305_v2  ;;  %v8438_v2 = vld [vmem:[#allocation4 + $0x320] ss:$8 sps:$4 sm:$0xff]   ;;  %v8453_v20 = vld [vmem:[#allocation4 + $0x364] ss:$8 sps:$4 sm:$0xff]  }
  0xef   : > { %v7333_v27 = vcombine.low %v9442_v56, %v9446_v31 }
  0xf1   : > { %1211 = vmatpush1.bf16.msra.mxu0 %v8380_v57  ;;  %2660 = vmatpush1.bf16.msra.mxu1 %v8380_v57  ;;  %v8422_v57 = vld [vmem:[#allocation4 + $0x2c4] ss:$8 sps:$4 sm:$0xff]  }
  0xf2   : > { %1212 = vmatprep.subr.bf16.mxu0 %v8385_v60  ;;  %2661 = vmatprep.subr.bf16.mxu1 %v8385_v60  ;;  %v8420_v60 = vld [vmem:[#allocation4 + $0x2c0] ss:$8 sps:$4 sm:$0xff]  }
  0xf5   : > { %1213 = vmatpush1.bf16.msra.mxu0 %v8383_v61  ;;  %2662 = vmatpush1.bf16.msra.mxu1 %v8383_v61  ;;  %v8432_v61 = vld [vmem:[#allocation4 + $0x300] ss:$8 sps:$4 sm:$0xff]  }
  0xf6   : > { %1235 = vmatprep.subr.bf16.mxu0 %v8389_v63  ;;  %2684 = vmatprep.subr.bf16.mxu1 %v8389_v63  ;;  %v8437_v63 = vld [vmem:[#allocation4 + $0x314] ss:$8 sps:$4 sm:$0xff]  }
  0xf8   : > { %1215 = vmatmul.mubr.bf16.vlgmr.msra.gmra.mrb[0].mxu0 %v7281_v10  ;;  %2664 = vmatmul.mubr.bf16.vlgmr.msra.gmra.mrb[0].mxu1 %v7433_v19  ;;  %v8406_v19 = vld [vmem:[#allocation4 + $0x280] ss:$8 sps:$4 sm:$0xff]   ;;  %v8446_v10 = vld [vmem:[#allocation4 + $0x344] ss:$8 sps:$4 sm:$0xff]  }
  0xf9   : > { %1236 = vmatpush1.bf16.msra.mxu0 %v8387_v4  ;;  %2685 = vmatpush1.bf16.msra.mxu1 %v8387_v4  ;;  %v8443_v4 = vld [vmem:[#allocation4 + $0x334] ss:$8 sps:$4 sm:$0xff]  }
  0xfa   : > { %1237 = vmatprep.subr.bf16.mxu0 %v8395_v58  ;;  %2686 = vmatprep.subr.bf16.mxu1 %v8395_v58  ;;  %v8444_v58 = vld [vmem:[#allocation4 + $0x340] ss:$8 sps:$4 sm:$0xff]  }
  0xfb   : > { %1224 = vmatprep.mubr.bf16.mxu0 %v7285_v14  ;;  %2673 = vmatprep.mubr.bf16.mxu1 %v7437_v24  ;;  %v8755_v24 = vld [vmem:[%s9121_s30 + $0x8] sm:$0xf]  ;;  %v8457_v14 = vld [vmem:[#allocation4 + $0x374] ss:$8 sps:$4 sm:$0xff]  }
  0xfc   : > { %v7283_v50 = vcombine.low %v8755_v24, %v9428_v49 }
  0xfd   : > { %1238 = vmatpush1.bf16.msra.mxu0 %v8393_v23  ;;  %2687 = vmatpush1.bf16.msra.mxu1 %v8393_v23  ;;  %v8451_v23 = vld [vmem:[#allocation4 + $0x360] ss:$8 sps:$4 sm:$0xff]  }
  0xfe   : > { %1239 = vmatprep.subr.bf16.mxu0 %v8399_v30  ;;  %2688 = vmatprep.subr.bf16.mxu1 %v8399_v30  ;;  %v7331_v30 = vrot.slane %v1290_v26, 9 }
 0x100   : > { %1225 = vmatmul.mubr.bf16.gmra.mrb[4].mxu0 %v7284_v48  ;;  %2674 = vmatmul.mubr.bf16.gmra.mrb[4].mxu1 %v7436_v37  ;;  %v8414_v37 = vld [vmem:[#allocation4 + $0x2a0] ss:$8 sps:$4 sm:$0xff]   ;;  %v8757_v48 = vld [vmem:[%s9121_s30 + $0x64] sm:$0x11] }
 0x101   : > { %1240 = vmatpush1.bf16.msra.mxu0 %v8397_v35  ;;  %2689 = vmatpush1.bf16.msra.mxu1 %v8397_v35  ;;  %v1325_v35 = vrot.slane %v1319_v21, 4 }
 0x102   : > { %1241 = vmatprep.subr.bf16.mxu0 %v8405_v46  ;;  %2690 = vmatprep.subr.bf16.mxu1 %v8405_v46  ;;  %v1326_v46 = vrot.slane %v8757_v48, 5 }
 0x103   : > { %1267 = vmatprep.mubr.bf16.mxu0 %v8922_v51  ;;  %2716 = vmatprep.mubr.bf16.mxu1 %v8922_v51 }
 0x104   : > { %v1327_v24 = vsel %vm9325_vm6, %v1325_v35, %v1326_v46 }
 0x105   : > { %1242 = vmatpush1.bf16.msra.mxu0 %v8403_v28  ;;  %2691 = vmatpush1.bf16.msra.mxu1 %v8403_v28  ;;  %v8455_v28 = vld [vmem:[#allocation4 + $0x370] ss:$8 sps:$4 sm:$0xff]  }
 0x106   : > { %1600 = vmatprep.subr.bf16.mxu0 %v8408_v29  ;;  %3045 = vmatprep.subr.bf16.mxu1 %v8408_v29  ;;  %v8460_v29 = vld [vmem:[#allocation4 + $0x384] ss:$8 sps:$4 sm:$0xff]  }
 0x108   : > { %7327 = vmatmul.mubr.msk.bf16.vlgmr.msra.gmra.mrb[0].mxu0 %vm10503_vm3, %v7283_v50  ;;  %7479 = vmatmul.mubr.msk.bf16.vlgmr.msra.gmra.mrb[0].mxu1 %vm10503_vm3, %v7435_v38  ;;  %v7334_v38 = vcombine.high %v9442_v56, %v9446_v31  ;;  %v8458_v50 = vld [vmem:[#allocation4 + $0x380] ss:$8 sps:$4 sm:$0xff]   ;;  %v1289_v56 = vld [vmem:[%s9121_s30 + $0x8] sm:$0xe] }
 0x109   : > { %1601 = vmatpush1.bf16.msra.mxu0 %v8406_v19  ;;  %3046 = vmatpush1.bf16.msra.mxu1 %v8406_v19  ;;  %v1320_v19 = vsel %vm9325_vm6, %v7331_v30, %v1319_v21  ;;  %v7330_v62 = vrot.slane %v1289_v56, 9  ;;  %v360_v21 = vld [vmem:[#allocation2 + $0x28] sm:$0x11] }
 0x10a   : > { %1602 = vmatprep.subr.bf16.mxu0 %v8413_v25  ;;  %3047 = vmatprep.subr.bf16.mxu1 %v8413_v25  ;;  %v8463_v25 = vld [vmem:[#allocation4 + $0x394] ss:$8 sps:$4 sm:$0xff]   ;;  %v7336_v31 = vcombine.low %v1320_v19, %v1327_v24 }
 0x10b   : > { %1277 = vmatprep.mubr.bf16.mxu0 %v8922_v51  ;;  %2726 = vmatprep.mubr.bf16.mxu1 %v8922_v51 }
 0x10d   : > { %1603 = vmatpush1.bf16.msra.mxu0 %v8411_v3  ;;  %3048 = vmatpush1.bf16.msra.mxu1 %v8411_v3  ;;  %v7337_v3 = vcombine.high %v1320_v19, %v1327_v24 }
 0x10e   : > { %1604 = vmatprep.subr.bf16.mxu0 %v8416_v7  ;;  %3049 = vmatprep.subr.bf16.mxu1 %v8416_v7  ;;  %v8461_v7 = vld [vmem:[#allocation4 + $0x390] ss:$8 sps:$4 sm:$0xff]  }
 0x110   : > { %7328 = vmatmul.mubr.msk.bf16.gmra.mrb[4].mxu0 %vm10503_vm3, %v7286_v15  ;;  %7480 = vmatmul.mubr.msk.bf16.gmra.mrb[4].mxu1 %vm10503_vm3, %v7438_v17  ;;  %v8431_v15 = vld [vmem:[#allocation4 + $0x2f4] ss:$8 sps:$4 sm:$0xff]   ;;  %v8429_v17 = vld [vmem:[#allocation4 + $0x2f0] ss:$8 sps:$4 sm:$0xff]  }
 0x111   : > { %1605 = vmatpush1.bf16.msra.mxu0 %v8414_v37  ;;  %3050 = vmatpush1.bf16.msra.mxu1 %v8414_v37  ;;  %v1309_v37 = vrot.slane %v9428_v49, 5  ;;  %v8469_v49 = vld [vmem:[#allocation4 + $0x3b4] ss:$8 sps:$4 sm:$0xff]  }
 0x112   : > { %1606 = vmatprep.subr.bf16.mxu0 %v8419_v54  ;;  %3051 = vmatprep.subr.bf16.mxu1 %v8419_v54  ;;  %v8466_v54 = vld [vmem:[#allocation4 + $0x3a4] ss:$8 sps:$4 sm:$0xff]  }
 0x113   : > { %1632 = vmatprep.mubr.bf16.mxu0 %v7334_v38  ;;  %3077 = vmatprep.mubr.bf16.mxu1 %v7486_v34  ;;  %v8434_v34 = vld [vmem:[#allocation4 + $0x304] ss:$8 sps:$4 sm:$0xff]  }
 0x115   : > { %1607 = vmatpush1.bf16.msra.mxu0 %v8417_v32  ;;  %3052 = vmatpush1.bf16.msra.mxu1 %v8417_v32  ;;  %v8758_v32 = vld [vmem:[%s9121_s30 + $0x30] sm:$0x1] }
 0x116   : > { %1608 = vmatprep.subr.bf16.mxu0 %v8422_v57  ;;  %3053 = vmatprep.subr.bf16.mxu1 %v8422_v57  ;;  %v1315_v38 = vrot.slane %v8758_v32, 5  ;;  %v8467_v57 = vld [vmem:[#allocation4 + $0x3b0] ss:$8 sps:$4 sm:$0xff]  }
 0x119   : > { %1609 = vmatpush1.bf16.msra.mxu0 %v8420_v60  ;;  %3054 = vmatpush1.bf16.msra.mxu1 %v8420_v60 }
 0x11a   : > { %1610 = vmatprep.subr.bf16.mxu0 %v8425_v59  ;;  %3055 = vmatprep.subr.bf16.mxu1 %v8425_v59 }
 0x11d   : > { %1611 = vmatpush1.bf16.msra.mxu0 %v8423_v22  ;;  %3056 = vmatpush1.bf16.msra.mxu1 %v8423_v22  ;;  %v8490_v22 = vld [vmem:[#allocation7 + $0x1a4] ss:$8 sps:$4 sm:$0xff]  }
 0x11e   : > { %1612 = vmatprep.subr.bf16.mxu0 %v8428_v40  ;;  %3057 = vmatprep.subr.bf16.mxu1 %v8428_v40  ;;  %v8488_v40 = vld [vmem:[#allocation7 + $0x1a0] ss:$8 sps:$4 sm:$0xff]  }
 0x121   : > { %1613 = vmatpush1.bf16.msra.mxu0 %v8426_v44  ;;  %3058 = vmatpush1.bf16.msra.mxu1 %v8426_v44  ;;  %v8493_v44 = vld [vmem:[#allocation7 + $0x1b4] ss:$8 sps:$4 sm:$0xff]  }
 0x122   : > { %1614 = vmatprep.subr.bf16.mxu0 %v8431_v15  ;;  %3059 = vmatprep.subr.bf16.mxu1 %v8431_v15  ;;  %v8491_v15 = vld [vmem:[#allocation7 + $0x1b0] ss:$8 sps:$4 sm:$0xff]  }
 0x125   : > { %1615 = vmatpush1.bf16.msra.mxu0 %v8429_v17  ;;  %3060 = vmatpush1.bf16.msra.mxu1 %v8429_v17  ;;  %v8496_v17 = vld [vmem:[#allocation7 + $0x1c4] ss:$8 sps:$4 sm:$0xff]  }
 0x126   : > { %1616 = vmatprep.subr.bf16.mxu0 %v8434_v34  ;;  %3061 = vmatprep.subr.bf16.mxu1 %v8434_v34  ;;  %v8494_v34 = vld [vmem:[#allocation7 + $0x1c0] ss:$8 sps:$4 sm:$0xff]  }
 0x129   : > { %1617 = vmatpush1.bf16.msra.mxu0 %v8432_v61  ;;  %3062 = vmatpush1.bf16.msra.mxu1 %v8432_v61  ;;  %v1715_v61 = vlaneseq }
 0x12a   : > { %1618 = vmatprep.subr.bf16.mxu0 %v8437_v63  ;;  %3063 = vmatprep.subr.bf16.mxu1 %v8437_v63 }
 0x12d   : > { %1619 = vmatpush1.bf16.msra.mxu0 %v8435_v0  ;;  %3064 = vmatpush1.bf16.msra.mxu1 %v8435_v0  ;;  %v9517_v0 = vshrl.u32 %v1715_v61, 7 }
 0x12e   : > { %1620 = vmatprep.subr.bf16.mxu0 %v8440_v1  ;;  %3065 = vmatprep.subr.bf16.mxu1 %v8440_v1  ;;  %v343_v1 = vld [vmem:[#allocation2 + $0x10] sm:$0x1] }
 0x131   : > { %1621 = vmatpush1.bf16.msra.mxu0 %v8438_v2  ;;  %3066 = vmatpush1.bf16.msra.mxu1 %v8438_v2  ;;  %v344_v2 = vsel %vm9513_vm11, 0, %v343_v1 }
 0x132   : > { %1622 = vmatprep.subr.bf16.mxu0 %v8443_v4  ;;  %3067 = vmatprep.subr.bf16.mxu1 %v8443_v4  ;;  %345 = vst [vmem:[#allocation2 + $0x10] sm:$0x1] %v344_v2 }
 0x135   : > { %1623 = vmatpush1.bf16.msra.mxu0 %v8441_v8  ;;  %3068 = vmatpush1.bf16.msra.mxu1 %v8441_v8  ;;  %v335_v8 = vld [vmem:[#allocation2] sm:$0x11] }
 0x136   : > { %1624 = vmatprep.subr.bf16.mxu0 %v8446_v10  ;;  %3069 = vmatprep.subr.bf16.mxu1 %v8446_v10 }
 0x139   : > { %1625 = vmatpush1.bf16.msra.mxu0 %v8444_v58  ;;  %3070 = vmatpush1.bf16.msra.mxu1 %v8444_v58  ;;  %v336_v58 = vsel %vm9530_vm4, 0, %v335_v8  ;;  %v400_v46 = vld [vmem:[#allocation2 + $0x10] sm:$0xf] }
 0x13a   : > { %1626 = vmatprep.subr.bf16.mxu0 %v8449_v16  ;;  %3071 = vmatprep.subr.bf16.mxu1 %v8449_v16  ;;  %v9537_v16 = vsub.s32 0, %v9517_v0  ;;  %337 = vst [vmem:[#allocation2] sm:$0x11] %v336_v58 }
 0x13d   : > { %1627 = vmatpush1.bf16.msra.mxu0 %v8447_v18  ;;  %3072 = vmatpush1.bf16.msra.mxu1 %v8447_v18  ;;  %v417_v18 = vld [vmem:[%s10491_s2] sm:$0x3] }
 0x13e   : > { %1628 = vmatprep.subr.bf16.mxu0 %v8453_v20  ;;  %3073 = vmatprep.subr.bf16.mxu1 %v8453_v20  ;;  %v9545_v20 = vsub.s32 1, %v9517_v0  ;;  %v9562_v30 = vrot.slane %v417_v18, %v9537_v16 }
 0x140   : > { %v9571_v48 = vrot.slane %v417_v18, %v9545_v20 }
 0x141   : > { %1629 = vmatpush1.bf16.msra.mxu0 %v8451_v23  ;;  %3074 = vmatpush1.bf16.msra.mxu1 %v8451_v23 }
 0x142   : > { %1630 = vmatprep.subr.bf16.mxu0 %v8457_v14  ;;  %3075 = vmatprep.subr.bf16.mxu1 %v8457_v14 }
 0x145   : > { %1631 = vmatpush1.bf16.msra.mxu0 %v8455_v28  ;;  %3076 = vmatpush1.bf16.msra.mxu1 %v8455_v28  ;;  %v338_v28 = vld [vmem:[#allocation2 + $0x8] sm:$0x11] }
 0x146   : > { %1653 = vmatprep.subr.bf16.mxu0 %v8460_v29  ;;  %3098 = vmatprep.subr.bf16.mxu1 %v8460_v29  ;;  %v346_v29 = vld [vmem:[#allocation2 + $0x3c] sm:$0x11]  ;;  %v339_v19 = vsel %vm9530_vm4, 0, %v338_v28 }
 0x147   : > { %v347_v24 = vsel %vm9530_vm4, 0, %v346_v29  ;;  %340 = vst [vmem:[#allocation2 + $0x8] sm:$0x11] %v339_v19 }
 0x148   : > { %1633 = vmatmul.mubr.bf16.vlgmr.msra.gmra.mrb[0].mxu0 %v7333_v27  ;;  %3078 = vmatmul.mubr.bf16.vlgmr.msra.gmra.mrb[0].mxu1 %v7485_v41  ;;  %v1314_v41 = vrot.slane %v1309_v37, 4  ;;  %v401_v27 = vsel %vm9555_vm9, 0, %v400_v46  ;;  %348 = vst [vmem:[#allocation2 + $0x3c] sm:$0x11] %v347_v24 }
 0x149   : > { %1654 = vmatpush1.bf16.msra.mxu0 %v8458_v50  ;;  %3099 = vmatpush1.bf16.msra.mxu1 %v8458_v50  ;;  %402 = vst [vmem:[#allocation2 + $0x10] sm:$0xf] %v401_v27 }
 0x14a   : > { %1655 = vmatprep.subr.bf16.mxu0 %v8463_v25  ;;  %3100 = vmatprep.subr.bf16.mxu1 %v8463_v25  ;;  %v1316_v60 = vsel %vm9325_vm6, %v1314_v41, %v1315_v38  ;;  %v363_v38 = vld [vmem:[#allocation2 + $0x30] sm:$0x11] }
 0x14b   : > { %1642 = vmatprep.mubr.bf16.mxu0 %v7337_v3  ;;  %3087 = vmatprep.mubr.bf16.mxu1 %v7489_v55  ;;  %v1310_v55 = vsel %vm9325_vm6, %v7330_v62, %v1309_v37  ;;  %v381_v3 = vld [vmem:[#allocation2] sm:$0xf] }
 0x14c   : > { %v7335_v59 = vcombine.low %v1310_v55, %v1316_v60 }
 0x14d   : > { %1656 = vmatpush1.bf16.msra.mxu0 %v8461_v7  ;;  %3101 = vmatpush1.bf16.msra.mxu1 %v8461_v7 }
 0x14e   : > { %1657 = vmatprep.subr.bf16.mxu0 %v8466_v54  ;;  %3102 = vmatprep.subr.bf16.mxu1 %v8466_v54 }
 0x150   : > { %1643 = vmatmul.mubr.bf16.gmra.mrb[4].mxu0 %v7336_v31  ;;  %3088 = vmatmul.mubr.bf16.gmra.mrb[4].mxu1 %v7488_v39  ;;  %v8475_v39 = vld [vmem:[#allocation7 + $0x154] ss:$8 sps:$4 sm:$0xff]   ;;  %v382_v31 = vsel %vm9566_vm12, 0, %v381_v3 }
 0x151   : > { %1658 = vmatpush1.bf16.msra.mxu0 %v8464_v47  ;;  %3103 = vmatpush1.bf16.msra.mxu1 %v8464_v47  ;;  %383 = vst [vmem:[#allocation2] sm:$0xf] %v382_v31 }
 0x152   : > { %1659 = vmatprep.subr.bf16.mxu0 %v8469_v49  ;;  %3104 = vmatprep.subr.bf16.mxu1 %v8469_v49  ;;  %v370_v49 = vld [vmem:[#allocation2 + $0x64] sm:$0x11] }
 0x153   : > { %1685 = vmatprep.mubr.bf16.mxu0 %v8922_v51  ;;  %3130 = vmatprep.mubr.bf16.mxu1 %v8922_v51 }
 0x155   : > { %1660 = vmatpush1.bf16.msra.mxu0 %v8467_v57  ;;  %3105 = vmatpush1.bf16.msra.mxu1 %v8467_v57 }
 0x156   : > { %3710 = vmatprep.subr.bf16.mxu0 %v8472_v53  ;;  %5024 = vmatprep.subr.bf16.mxu1 %v8472_v53 }
 0x158   : > { %7379 = vmatmul.mubr.msk.bf16.vlgmr.msra.gmra.mrb[0].mxu0 %vm10503_vm3, %v7335_v59  ;;  %7531 = vmatmul.mubr.msk.bf16.vlgmr.msra.gmra.mrb[0].mxu1 %vm10503_vm3, %v7487_v9  ;;  %v8476_v9 = vld [vmem:[#allocation7 + $0x160] ss:$8 sps:$4 sm:$0xff]  }
 0x159   : > { %1695 = vmatprep.mubr.bf16.mxu0 %v8922_v51  ;;  %3140 = vmatprep.mubr.bf16.mxu1 %v8922_v51 }
 0x15a   : > { %3711 = vmatpush1.bf16.msra.mxu0 %v8470_v52  ;;  %5025 = vmatpush1.bf16.msra.mxu1 %v8470_v52 }
 0x15b   : > { %3712 = vmatprep.subr.bf16.mxu0 %v8475_v39  ;;  %5026 = vmatprep.subr.bf16.mxu1 %v8475_v39 }
 0x15e   : > { %3713 = vmatpush1.bf16.msra.mxu0 %v8473_v5  ;;  %5027 = vmatpush1.bf16.msra.mxu1 %v8473_v5 }
 0x15f   : > { %3714 = vmatprep.subr.bf16.mxu0 %v8478_v6  ;;  %5028 = vmatprep.subr.bf16.mxu1 %v8478_v6 }
 0x160   : > { %7380 = vmatmul.mubr.msk.bf16.gmra.mrb[4].mxu0 %vm10503_vm3, %v7338_v33  ;;  %7532 = vmatmul.mubr.msk.bf16.gmra.mrb[4].mxu1 %vm10503_vm3, %v7490_v45  ;;  %v8487_v33 = vld [vmem:[#allocation7 + $0x194] ss:$8 sps:$4 sm:$0xff]   ;;  %v8485_v45 = vld [vmem:[#allocation7 + $0x190] ss:$8 sps:$4 sm:$0xff]   ;;  %vm9549_vm3 = vmor %vm358_vm15, %vm356_vm14  ;;  %vm10537_vm14 = vcmask 516096  }
 0x161   : > { %v361_v14 = vsel %vm9549_vm3, 0, %v360_v21  ;;  %vm9639_vm15 = vmand %vm10537_vm14, %vm355_vm0 }
 0x162   : > { %3715 = vmatpush1.bf16.msra.mxu0 %v8476_v9  ;;  %5029 = vmatpush1.bf16.msra.mxu1 %v8476_v9  ;;  %362 = vst [vmem:[#allocation2 + $0x28] sm:$0x11] %v361_v14  ;;  %vm9650_vm14 = vmand %vm386_vm8, %vm329_vm10  ;;  %vm1850_vm8 = vcmask 1040640  }
 0x163   : > { %3716 = vmatprep.subr.bf16.mxu0 %v8481_v42  ;;  %5030 = vmatprep.subr.bf16.mxu1 %v8481_v42  ;;  %vm1851_vm7 = vmand %vm1850_vm8, %vm329_vm10 }
 0x166   : > { %3717 = vmatpush1.bf16.msra.mxu0 %v8479_v11  ;;  %5031 = vmatpush1.bf16.msra.mxu1 %v8479_v11 }
 0x167   : > { %3718 = vmatprep.subr.bf16.mxu0 %v8484_v43  ;;  %5032 = vmatprep.subr.bf16.mxu1 %v8484_v43  ;;  %v364_v43 = vsel %vm9549_vm3, 0, %v363_v38 }
 0x168   : > { %365 = vst [vmem:[#allocation2 + $0x30] sm:$0x11] %v364_v43 }
 0x16a   : > { %3719 = vmatpush1.bf16.msra.mxu0 %v8482_v12  ;;  %5033 = vmatpush1.bf16.msra.mxu1 %v8482_v12  ;;  %v371_v12 = vsel %vm9549_vm3, 0, %v370_v49 }
 0x16b   : > { %3720 = vmatprep.subr.bf16.mxu0 %v8487_v33  ;;  %5034 = vmatprep.subr.bf16.mxu1 %v8487_v33  ;;  %372 = vst [vmem:[#allocation2 + $0x64] sm:$0x11] %v371_v12 }
 0x16e   : > { %3721 = vmatpush1.bf16.msra.mxu0 %v8485_v45  ;;  %5035 = vmatpush1.bf16.msra.mxu1 %v8485_v45 }
 0x16f   : > { %3722 = vmatprep.subr.bf16.mxu0 %v8490_v22  ;;  %5036 = vmatprep.subr.bf16.mxu1 %v8490_v22 }
 0x172   : > { %3723 = vmatpush1.bf16.msra.mxu0 %v8488_v40  ;;  %5037 = vmatpush1.bf16.msra.mxu1 %v8488_v40 }
 0x173   : > { %3724 = vmatprep.subr.bf16.mxu0 %v8493_v44  ;;  %5038 = vmatprep.subr.bf16.mxu1 %v8493_v44  ;;  %v8499_v44 = vld [vmem:[#allocation7 + $0x1d4] ss:$8 sps:$4 sm:$0xff]  }
 0x176   : > { %3725 = vmatpush1.bf16.msra.mxu0 %v8491_v15  ;;  %5039 = vmatpush1.bf16.msra.mxu1 %v8491_v15 }
 0x177   : > { %3726 = vmatprep.subr.bf16.mxu0 %v8496_v17  ;;  %5040 = vmatprep.subr.bf16.mxu1 %v8496_v17 }
 0x17a   : > { %3727 = vmatpush1.bf16.msra.mxu0 %v8494_v34  ;;  %5041 = vmatpush1.bf16.msra.mxu1 %v8494_v34 }
 0x17b   : > { %3728 = vmatprep.subr.bf16.mxu0 %v8499_v44  ;;  %5042 = vmatprep.subr.bf16.mxu1 %v8499_v44 }
 0x22b   : > { %v1687_v50 = vpop.f32.mrb[0].mxu0  ;;  %v3132_v25 = vpop.f32.mrb[0].mxu1 }
 0x22c   : > { %v1725_v7 = vadd.f32 %v9562_v30, %v1687_v50  ;;  %v3159_v37 = vadd.f32 %v3132_v25, %v9562_v30  ;;  %v1689_v54 = vpop.f32.mrb[1].mxu0  ;;  %v3134_v56 = vpop.f32.mrb[1].mxu1 }
 0x22d   : > { %v1726_v47 = vadd.f32 %v9571_v48, %v1689_v54  ;;  %v3160_v62 = vadd.f32 %v3134_v56, %v9571_v48  ;;  %v1691_v41 = vpop.f32.mrb[2].mxu0  ;;  %v3136_v32 = vpop.f32.mrb[2].mxu1  ;;  %v8497_v54 = vld [vmem:[#allocation7 + $0x1d0] ss:$8 sps:$4 sm:$0xff]  }
 0x22e   : > { %v1733_v57 = vmax.f32 %v1725_v7, 0.0  ;;  %v3167_v55 = vmax.f32 %v3159_v37, 0.0  ;;  %v1727_v60 = vadd.f32 %v9562_v30, %v1691_v41  ;;  %v3161_v59 = vadd.f32 %v3136_v32, %v9562_v30  ;;  %v1693_v52 = vpop.f32.mrb[3].mxu0  ;;  %v3138_v53 = vpop.f32.mrb[3].mxu1  ;;  %v8502_v41 = vld [vmem:[#allocation7 + $0x1e4] ss:$8 sps:$4 sm:$0xff]   ;;  %3729 = vmatpush1.bf16.msra.mxu0 %v8497_v54  ;;  %5043 = vmatpush1.bf16.msra.mxu1 %v8497_v54 }
 0x22f   : > { %v1734_v39 = vmax.f32 %v1726_v47, 0.0  ;;  %v3168_v5 = vmax.f32 %v3160_v62, 0.0  ;;  %v1728_v6 = vadd.f32 %v9571_v48, %v1693_v52  ;;  %v3162_v9 = vadd.f32 %v3138_v53, %v9571_v48  ;;  %3730 = vmatprep.subr.bf16.mxu0 %v8502_v41  ;;  %5044 = vmatprep.subr.bf16.mxu1 %v8502_v41 }
 0x230   : > { %v1735_v42 = vmax.f32 %v1727_v60, 0.0  ;;  %v3169_v11 = vmax.f32 %v3161_v59, 0.0 }
 0x231   : > { %v7915_v33 = vpack.c.bf16 %v1734_v39, %v1733_v57  ;;  %v7919_v45 = vpack.c.bf16 %v3168_v5, %v3167_v55  ;;  %v1736_v22 = vmax.f32 %v1728_v6, 0.0  ;;  %v3170_v40 = vmax.f32 %v3162_v9, 0.0  ;;  %v8500_v55 = vld [vmem:[#allocation7 + $0x1e0] ss:$8 sps:$4 sm:$0xff]   ;;  %v8505_v9 = vld [vmem:[#allocation7 + $0x1f4] ss:$8 sps:$4 sm:$0xff]  }
 0x232   : > { %3731 = vmatpush1.bf16.msra.mxu0 %v8500_v55  ;;  %5045 = vmatpush1.bf16.msra.mxu1 %v8500_v55 }
 0x233   : > { %v9593_v15 = vpack.c.bf16 %v1736_v22, %v1735_v42  ;;  %v9595_v17 = vpack.c.bf16 %v3170_v40, %v3169_v11  ;;  %v1697_v34 = vpop.f32.mrb[4].mxu0  ;;  %v3142_v61 = vpop.f32.mrb[4].mxu1  ;;  %v3196_v18 = vshrl.u32 %v7919_v45, 16  ;;  %v3199_v21 = vshll.u32 %v7919_v45, 16  ;;  %v8503_v45 = vld [vmem:[#allocation7 + $0x1f0] ss:$8 sps:$4 sm:$0xff]   ;;  %3732 = vmatprep.subr.bf16.mxu0 %v8505_v9  ;;  %5046 = vmatprep.subr.bf16.mxu1 %v8505_v9 }
 0x234   : > { %v1729_v1 = vadd.f32 %v9562_v30, %v1697_v34  ;;  %v3163_v2 = vadd.f32 %v3142_v61, %v9562_v30  ;;  %v1699_v8 = vpop.f32.mrb[5].mxu0  ;;  %v3144_v58 = vpop.f32.mrb[5].mxu1  ;;  %v1764_v27 = vshrl.u32 %v7915_v33, 16  ;;  %v1767_v19 = vshll.u32 %v7915_v33, 16  ;;  %v373_v34 = vld [vmem:[#allocation2 + $0x6c] sm:$0x11] }
 0x235   : > { %v1772_v14 = vshrl.u32 %v9593_v15, 16  ;;  %v3204_v46 = vshrl.u32 %v9595_v17, 16  ;;  %v1701_v28 = vpop.f32.mrb[6].mxu0  ;;  %v3146_v29 = vpop.f32.mrb[6].mxu1  ;;  %v1730_v25 = vadd.f32 %v9571_v48, %v1699_v8  ;;  %v3164_v3 = vadd.f32 %v3144_v58, %v9571_v48  ;;  %v349_v61 = vld [vmem:[#allocation2 + $0x44] sm:$0x11] }
 0x236   : > { %v1737_v24 = vmax.f32 %v1729_v1, 0.0  ;;  %v3171_v50 = vmax.f32 %v3163_v2, 0.0  ;;  %v1703_v7 = vpop.f32.mrb[7].mxu0  ;;  %v3148_v37 = vpop.f32.mrb[7].mxu1  ;;  %v1731_v47 = vadd.f32 %v9562_v30, %v1701_v28  ;;  %v3165_v62 = vadd.f32 %v3146_v29, %v9562_v30  ;;  %v388_v29 = vld [vmem:[#allocation2 + $0x28] sm:$0x1]  ;;  %3733 = vmatpush1.bf16.msra.mxu0 %v8503_v45  ;;  %5047 = vmatpush1.bf16.msra.mxu1 %v8503_v45 }
 0x237   : > { %v9603_v56 = vrot.slane %v1772_v14, 7  ;;  %v9605_v31 = vrot.slane %v3204_v46, 7  ;;  %v1738_v32 = vmax.f32 %v1730_v25, 0.0  ;;  %v3172_v38 = vmax.f32 %v3164_v3, 0.0  ;;  %v391_v3 = vld [vmem:[#allocation2 + $0x3c] sm:$0xf] }
 0x238   : > { %v1732_v49 = vadd.f32 %v9571_v48, %v1703_v7  ;;  %v3166_v57 = vadd.f32 %v3148_v37, %v9571_v48  ;;  %v1739_v60 = vmax.f32 %v1731_v47, 0.0  ;;  %v3173_v59 = vmax.f32 %v3165_v62, 0.0  ;;  %v8506_v7 = vld [vmem:[#allocation7 + $0x200] ss:$8 sps:$4 sm:$0xff]   ;;  %v352_v37 = vld [vmem:[#allocation2 + $0x4c] sm:$0x1] }
 0x239   : > { %v3198_v52 = vrot.slane %v3196_v18, 7  ;;  %v1766_v53 = vrot.slane %v1764_v27, 7  ;;  %v7917_v39 = vpack.c.bf16 %v1738_v32, %v1737_v24  ;;  %v9611_v5 = vpack.c.bf16 %v3172_v38, %v3171_v50  ;;  %v8508_v18 = vld [vmem:[#allocation7 + $0x204] ss:$8 sps:$4 sm:$0xff]   ;;  %v376_v32 = vld [vmem:[#allocation2 + $0x74] sm:$0x1] }
 0x23a   : > { %v1740_v30 = vmax.f32 %v1732_v49, 0.0  ;;  %v3174_v6 = vmax.f32 %v3166_v57, 0.0  ;;  %v3207_v42 = vshll.u32 %v9595_v17, 16  ;;  %v1775_v48 = vshll.u32 %v9593_v15, 16  ;;  %v395_v27 = vld [vmem:[#allocation2 + $0x64] sm:$0x1]  ;;  %3734 = vmatprep.subr.bf16.mxu0 %v8508_v18  ;;  %5048 = vmatprep.subr.bf16.mxu1 %v8508_v18 }
 0x23b   : > { %v3201_v11 = vor.u32 %v3199_v21, %v3198_v52  ;;  %v1769_v43 = vor.u32 %v1767_v19, %v1766_v53  ;;  %v1781_v12 = vshrl.u32 %v7917_v39, 16  ;;  %v3213_v33 = vshrl.u32 %v9611_v5, 16  ;;  %v367_v19 = vld [vmem:[#allocation2 + $0x38] sm:$0x1]  ;;  %v8511_v57 = vld [vmem:[#allocation7 + $0x214] ss:$8 sps:$4 sm:$0xff]   ;;  %3735 = vmatpush1.bf16.msra.mxu0 %v8506_v7  ;;  %5049 = vmatpush1.bf16.msra.mxu1 %v8506_v7 }
 0x23c   : > { %v7918_v22 = vpack.c.bf16 %v1740_v30, %v1739_v60  ;;  %v7922_v40 = vpack.c.bf16 %v3174_v6, %v3173_v59  ;;  %v3202_v44 = vrot.slane %v3198_v52, 4  ;;  %v3209_v15 = vor.u32 %v3207_v42, %v9605_v31  ;;  %v8509_v6 = vld [vmem:[#allocation7 + $0x210] ss:$8 sps:$4 sm:$0xff]   ;;  %3736 = vmatprep.subr.bf16.mxu0 %v8511_v57  ;;  %5050 = vmatprep.subr.bf16.mxu1 %v8511_v57  ;;  %v8512_v45 = vld [vmem:[#allocation7 + $0x220] ss:$8 sps:$4 sm:$0xff]  }
 0x23d   : > { %3229 = vrot.lane.b32.xlu1 %v3201_v11, %s8923_s29  ;;  %1797 = vrot.lane.b32.xlu0 %v1769_v43, %s8923_s29  ;;  %v1783_v1 = vrot.slane %v1781_v12, 7  ;;  %v1784_v2 = vshll.u32 %v7917_v39, 16  ;;  %v1770_v8 = vrot.slane %v1766_v53, 4  ;;  %v1777_v58 = vor.u32 %v1775_v48, %v9603_v56  ;;  %v8514_v48 = vld [vmem:[#allocation7 + $0x224] ss:$8 sps:$4 sm:$0xff]  }
 0x23e   : > { %v9626_v21 = vrot.slane %v3213_v33, 7  ;;  %v1789_v14 = vshrl.u32 %v7918_v22, 16  ;;  %v3221_v46 = vshrl.u32 %v7922_v40, 16  ;;  %v1779_v28 = vrot.slane %v9603_v56, 4  ;;  %v8515_v17 = vld [vmem:[#allocation7 + $0x230] ss:$8 sps:$4 sm:$0xff]  }
 0x23f   : > { %v1792_v24 = vshll.u32 %v7918_v22, 16  ;;  %v3210_v50 = vsel %vm9620_vm13, %v3202_v44, %v3209_v15  ;;  %v1778_v25 = vsel %vm9620_vm13, %v1770_v8, %v1777_v58  ;;  %v3224_v62 = vshll.u32 %v7922_v40, 16  ;;  %3737 = vmatpush1.bf16.msra.mxu0 %v8509_v6  ;;  %5051 = vmatpush1.bf16.msra.mxu1 %v8509_v6  ;;  %v8517_v40 = vld [vmem:[#allocation7 + $0x234] ss:$8 sps:$4 sm:$0xff]   ;;  %v8520_v8 = vld [vmem:[#allocation7 + $0x244] ss:$8 sps:$4 sm:$0xff]  }
 0x240   : > { %v1791_v54 = vrot.slane %v1789_v14, 7  ;;  %v9633_v47 = vrot.slane %v3221_v46, 7  ;;  %v1786_v56 = vor.u32 %v1784_v2, %v1783_v1  ;;  %v374_v38 = vsel %vm9549_vm3, 0, %v373_v34  ;;  %3738 = vmatprep.subr.bf16.mxu0 %v8514_v48  ;;  %5052 = vmatprep.subr.bf16.mxu1 %v8514_v48  ;;  %v3268_v58 = vld [vmem:[#allocation2 + $0x10] sm:$0xf] }
 0x241   : > { %3231 = vrot.lane.b32.xlu1 %v3210_v50, %s8923_s29  ;;  %1801 = vrot.lane.b32.xlu0 %v1779_v28, %s8923_s29  ;;  %v350_v49 = vsel %vm9530_vm4, 0, %v349_v61  ;;  %v1787_v55 = vrot.slane %v1783_v1, 4  ;;  %v3219_v59 = vrot.slane %v9626_v21, 4  ;;  %375 = vst [vmem:[#allocation2 + $0x6c] sm:$0x11] %v374_v38  ;;  %v389_v10 = vsel %vm9650_vm14, 0, %v388_v29 }
 0x242   : > { %v1794_v60 = vor.u32 %v1792_v24, %v1791_v54  ;;  %v3226_v52 = vor.u32 %v3224_v62, %v9633_v47  ;;  %351 = vst [vmem:[#allocation2 + $0x44] sm:$0x11] %v350_v49  ;;  %v396_v23 = vsel %vm9650_vm14, 0, %v395_v27  ;;  %v392_v39 = vsel %vm9566_vm12, 0, %v391_v3  ;;  %390 = vst [vmem:[#allocation2 + $0x28] sm:$0x1] %v389_v10 }
 0x243   : > { %v368_v30 = vsel %vm9639_vm15, 0, %v367_v19  ;;  %397 = vst [vmem:[#allocation2 + $0x64] sm:$0x1] %v396_v23  ;;  %393 = vst [vmem:[#allocation2 + $0x3c] sm:$0xf] %v392_v39  ;;  %v353_v11 = vsel %vm9513_vm11, 0, %v352_v37  ;;  %3739 = vmatpush1.bf16.msra.mxu0 %v8512_v45  ;;  %5053 = vmatpush1.bf16.msra.mxu1 %v8512_v45 }
 0x244   : > { %v1795_v9 = vsel %vm9620_vm13, %v1787_v55, %v1794_v60  ;;  %v3227_v42 = vsel %vm9620_vm13, %v3219_v59, %v3226_v52  ;;  %369 = vst [vmem:[#allocation2 + $0x38] sm:$0x1] %v368_v30  ;;  %v377_v43 = vsel %vm9639_vm15, 0, %v376_v32  ;;  %354 = vst [vmem:[#allocation2 + $0x4c] sm:$0x1] %v353_v11  ;;  %vm405_vm3 = vcmask 516352   ;;  %3740 = vmatprep.subr.bf16.mxu0 %v8517_v40  ;;  %5054 = vmatprep.subr.bf16.mxu1 %v8517_v40 }
 0x245   : > { %1803 = vrot.lane.b32.xlu1 %v1786_v56, %s8923_s29  ;;  %1799 = vrot.lane.b32.xlu0 %v1778_v25, %s8923_s29  ;;  %378 = vst [vmem:[#allocation2 + $0x74] sm:$0x1] %v377_v43  ;;  %v3211_v12 = vrot.slane %v9605_v31, 4  ;;  %v1796_v33 = vrot.slane %v1791_v54, 4  ;;  %v3216_v22 = vshll.u32 %v9611_v5, 16  ;;  %vm9677_vm11 = vmand %vm405_vm3, %vm329_vm10  ;;  %v3228_v1 = vrot.slane %v9633_v47, 4 }
 0x246   : > { %vm1836_vm4 = vcmask 1047556   ;;  %vm1815_vm3 = vcmask 261120   ;;  %v1839_v29 = vld [vmem:[#allocation2] sm:$0xff]  ;;  %v1856_v7 = vld [vmem:[#allocation2 + $0x30] sm:$0x1]  ;;  %vm9714_vm10 = vmor %vm9524_vm1, %vm1851_vm7 }
 0x247   : > { %v3218_v31 = vor.u32 %v3216_v22, %v9626_v21  ;;  %3741 = vmatpush1.bf16.msra.mxu0 %v8515_v17  ;;  %5055 = vmatpush1.bf16.msra.mxu1 %v8515_v17  ;;  %vm1837_vm15 = vmand %vm1836_vm4, %vm357_vm5  ;;  %v1842_v21 = vld [vmem:[#allocation2 + $0x8] sm:$0xf] }
 0x248   : > { %3763 = vmatprep.subr.bf16.mxu0 %v8520_v8  ;;  %5077 = vmatprep.subr.bf16.mxu1 %v8520_v8 }
 0x249   : > { %3233 = vrot.lane.b32.xlu1 %v3211_v12, %s8923_s29  ;;  %1807 = vrot.lane.b32.xlu0 %v1796_v33, %s8923_s29  ;;  %v1853_v62 = vld [vmem:[#allocation2 + $0x28] sm:$0x11]  ;;  %v1862_v55 = vld [vmem:[#allocation2 + $0x44] sm:$0xf] }
 0x24a   : > { %v1859_v10 = vld [vmem:[#allocation2 + $0x3c] sm:$0xff] }
 0x24b   : > { %v407_v44 = vld [vmem:[#allocation2 + $0x38] sm:$0x1]  ;;  %v410_v15 = vld [vmem:[#allocation2 + $0x4c] sm:$0xf] }
 0x24c   : > { %v408_v5 = vsel %vm9677_vm11, 0, %v407_v44  ;;  %v411_v34 = vsel %vm9555_vm9, 0, %v410_v15  ;;  %v414_v61 = vld [vmem:[#allocation2 + $0x74] sm:$0x1]  ;;  %vm1834_vm9 = vcmask 1043712  }
 0x24d   : > { %1805 = vrot.lane.b32.xlu1 %v1795_v9, %s8923_s29  ;;  %3235 = vrot.lane.b32.xlu0 %v3218_v31, %s8923_s29  ;;  %409 = vst [vmem:[#allocation2 + $0x38] sm:$0x1] %v408_v5  ;;  %412 = vst [vmem:[#allocation2 + $0x4c] sm:$0xf] %v411_v34  ;;  %v415_v2 = vsel %vm9677_vm11, 0, %v414_v61 }
 0x24e   : > { %416 = vst [vmem:[#allocation2 + $0x74] sm:$0x1] %v415_v2  ;;  %vm1835_vm13 = vmand %vm1834_vm9, %vm355_vm0  ;;  %vm10548_vm0 = vcmask 257024   ;;  %v1870_v31 = vld [vmem:[#allocation2 + $0x6c] sm:$0x1] }
 0x24f   : > { %vm9697_vm11 = vmor %vm1837_vm15, %vm1835_vm13  ;;  %v1867_v34 = vld [vmem:[#allocation2 + $0x64] sm:$0x11] }
 0x250   : > { %vm9728_vm7 = vmor %vm1836_vm4, %vm1834_vm9 }
 0x251   : > { %3239 = vrot.lane.b32.xlu1 %v3228_v1, %s8923_s29  ;;  %3237 = vrot.lane.b32.xlu0 %v3227_v42, %s8923_s29  ;;  %vm10551_vm1 = vmmov %vm10548_vm0 }
 0x252   : > { %vm10552_vm5 = vmmov %vm10548_vm0 }
 0x254   : > { %v3276_v63 = vld [vmem:[#allocation2 + $0x38] sm:$0x1] }
 0x2af   : > { %v3230_v26 = vpop.permute.xlu1 %3229  ;;  %v1798_v18 = vpop.permute.xlu0 %1797 }
 0x2b0   : > { %v3241_v14 = vrot.slane %v3230_v26, 4  ;;  %v1809_v28 = vrot.slane %v1798_v18, 4 }
 0x2b2   : > { %v3269_v27 = vsel %vm9566_vm12, %v3241_v14, %v3268_v58  ;;  %v1816_v19 = vsel %vm1815_vm3, %v1809_v28, %v1798_v18  ;;  %v1843_v24 = vsel %vm9566_vm12, %v1809_v28, %v1842_v21  ;;  %v3247_v30 = vsel %vm1815_vm3, %v3241_v14, %v3230_v26 }
 0x2b3   : > { %3270 = vst [vmem:[#allocation2 + $0x10] sm:$0xf] %v3269_v27  ;;  %v9709_v50 = vsel %vm9697_vm11, %v1816_v19, %v1839_v29  ;;  %1844 = vst [vmem:[#allocation2 + $0x8] sm:$0xf] %v1843_v24  ;;  %v3232_v25 = vpop.permute.xlu1 %3231  ;;  %v1802_v3 = vpop.permute.xlu0 %1801 }
 0x2b4   : > { %1841 = vst [vmem:[#allocation2] sm:$0xff] %v9709_v50  ;;  %v3242_v37 = vrot.slane %v3232_v25, 4  ;;  %v1811_v47 = vrot.slane %v1802_v3, 4  ;;  %v3346_v56 = vshrl.u32 %v9709_v50, 16  ;;  %v3349_v41 = vshll.u32 %v9709_v50, 16 }
 0x2b6   : > { %3272 = vst.msk [vmem:[#allocation2 + $0x24] sm:$0xf] %vm10548_vm0, %v3242_v37  ;;  %v1818_v32 = vsel %vm1815_vm3, %v1811_v47, %v1802_v3  ;;  %v1857_v38 = vsel %vm9650_vm14, %v1811_v47, %v1856_v7  ;;  %v3348_v49 = vrot.slane %v3346_v56, 4  ;;  %v3351_v59 = vrot.slane %v3349_v41, 5  ;;  %v3282_v7 = vld [vmem:[#allocation2 + $0x4c] sm:$0xf] }
 0x2b7   : > { %v1854_v4 = vsel %vm9714_vm10, %v1818_v32, %v1853_v62  ;;  %1858 = vst [vmem:[#allocation2 + $0x30] sm:$0x1] %v1857_v38  ;;  %v1804_v57 = vpop.permute.xlu1 %1803  ;;  %v1800_v60 = vpop.permute.xlu0 %1799  ;;  %v3248_v42 = vsel %vm1815_vm3, %v3242_v37, %v3232_v25 }
 0x2b8   : > { %1855 = vst [vmem:[#allocation2 + $0x28] sm:$0x11] %v1854_v4  ;;  %v1812_v52 = vrot.slane %v1804_v57, 4  ;;  %v1810_v39 = vrot.slane %v1800_v60, 4  ;;  %v3352_v6 = vor.u32 %v3351_v59, %v3348_v49 }
 0x2ba   : > { %v3265_v9 = vld [vmem:[#allocation2 + $0x8] sm:$0xff]  ;;  %v1819_v11 = vsel %vm1815_vm3, %v1812_v52, %v1804_v57  ;;  %v1863_v43 = vsel %vm9566_vm12, %v1812_v52, %v1862_v55  ;;  %v1817_v48 = vsel %vm1815_vm3, %v1810_v39, %v1800_v60  ;;  %1849 = vst.msk [vmem:[#allocation2 + $0x1c] sm:$0xf] %vm10551_vm1, %v1810_v39  ;;  %v9739_v12 = vld [vmem:[#allocation2 + $0x10] sm:$0xf]  ;;  %v9753_v44 = vrot.slane %v3352_v6, 4 }
 0x2bb   : > { %v9743_v33 = vsel %vm9697_vm11, %v3247_v30, %v3265_v9  ;;  %v9747_v45 = vsel %vm9697_vm11, %v1819_v11, %v1859_v10  ;;  %1864 = vst [vmem:[#allocation2 + $0x44] sm:$0xf] %v1863_v43  ;;  %1848 = vst.msk [vmem:[#allocation2 + $0x14] sm:$0xff] %vm9728_vm7, %v1817_v48  ;;  %v3234_v22 = vpop.permute.xlu1 %3233  ;;  %v1808_v40 = vpop.permute.xlu0 %1807  ;;  %v4675_v17 = vshrl.u32 %v9739_v12, 16  ;;  %v4678_v58 = vshll.u32 %v9739_v12, 16 }
 0x2bc   : > { %3271 = vst.msk [vmem:[#allocation2 + $0x1c] sm:$0xff] %vm9728_vm7, %v3248_v42  ;;  %3267 = vst [vmem:[#allocation2 + $0x8] sm:$0xff] %v9743_v33  ;;  %v3243_v5 = vrot.slane %v3234_v22, 4  ;;  %v1814_v15 = vrot.slane %v1808_v40, 4  ;;  %v4661_v61 = vshrl.u32 %v9743_v33, 16  ;;  %v4664_v1 = vshll.u32 %v9743_v33, 16 }
 0x2bd   : > { %1861 = vst [vmem:[#allocation2 + $0x3c] sm:$0xff] %v9747_v45  ;;  %v3394_v2 = vshrl.u32 %v9747_v45, 16  ;;  %v3397_v8 = vshll.u32 %v9747_v45, 16  ;;  %v9762_v26 = vrot.slane %v4675_v17, 4  ;;  %v9771_v27 = vld [vmem:[#allocation2 + $0x24] sm:$0xf] }
 0x2be   : > { %v3249_v18 = vsel %vm1815_vm3, %v3243_v5, %v3234_v22  ;;  %v3273_v21 = vld [vmem:[#allocation2 + $0x30] sm:$0x11]  ;;  %v3277_v14 = vsel %vm9650_vm14, %v3243_v5, %v3276_v63  ;;  %v1821_v28 = vsel %vm1815_vm3, %v1814_v15, %v1808_v40  ;;  %v1871_v29 = vsel %vm9650_vm14, %v1814_v15, %v1870_v31 }
 0x2bf   : > { %v3274_v19 = vsel %vm9714_vm10, %v3249_v18, %v3273_v21  ;;  %3278 = vst [vmem:[#allocation2 + $0x38] sm:$0x1] %v3277_v14  ;;  %v1868_v24 = vsel %vm9714_vm10, %v1821_v28, %v1867_v34  ;;  %1872 = vst [vmem:[#allocation2 + $0x6c] sm:$0x1] %v1871_v29  ;;  %v1806_v25 = vpop.permute.xlu1 %1805  ;;  %v3236_v3 = vpop.permute.xlu0 %3235  ;;  %v9777_v37 = vld [vmem:[#allocation2 + $0x28] sm:$0x11] }
 0x2c0   : > { %v4663_v47 = vrot.slane %v4661_v61, 4  ;;  %v4666_v62 = vrot.slane %v4664_v1, 5  ;;  %3275 = vst [vmem:[#allocation2 + $0x30] sm:$0x11] %v3274_v19  ;;  %1869 = vst [vmem:[#allocation2 + $0x64] sm:$0x11] %v1868_v24 }
 0x2c1   : > { %v1813_v56 = vrot.slane %v1806_v25, 4  ;;  %v3244_v41 = vrot.slane %v3236_v3, 4  ;;  %v3379_v32 = vshll.u32 %v9777_v37, 16  ;;  %v3396_v38 = vrot.slane %v3394_v2, 4  ;;  %v3290_v11 = vld [vmem:[#allocation2 + $0x74] sm:$0x1] }
 0x2c2   : > { %v4667_v49 = vor.u32 %v4666_v62, %v4663_v47  ;;  %v3399_v4 = vrot.slane %v3397_v8, 5  ;;  %v9780_v57 = vrot.slane %v4678_v58, 5  ;;  %v4684_v55 = vshll.u32 %v9771_v27, 16  ;;  %v3279_v52 = vld [vmem:[#allocation2 + $0x44] sm:$0xff]  ;;  %v9788_v39 = vld [vmem:[#allocation2 + $0x14] sm:$0xff] }
 0x2c3   : > { %v1820_v60 = vsel %vm1815_vm3, %v1813_v56, %v1806_v25  ;;  %1866 = vst.msk [vmem:[#allocation2 + $0x58] sm:$0xf] %vm10552_vm5, %v1813_v56  ;;  %v3250_v59 = vsel %vm1815_vm3, %v3244_v41, %v3236_v3  ;;  %v3283_v10 = vsel %vm9566_vm12, %v3244_v41, %v3282_v7  ;;  %v3381_v30 = vrot.slane %v3379_v32, 5  ;;  %v9790_v6 = vld [vmem:[#allocation2 + $0x1c] sm:$0xff]  ;;  %v3240_v42 = vpop.permute.xlu1 %3239  ;;  %v3238_v43 = vpop.permute.xlu0 %3237  ;;  %vm10553_vm12 = vmmov %vm10548_vm0  ;;  %v9809_v18 = vld [vmem:[#allocation2 + $0x8] sm:$0xf] }
 0x2c4   : > { %1865 = vst.msk [vmem:[#allocation2 + $0x50] sm:$0xff] %vm9728_vm7, %v1820_v60  ;;  %v9796_v9 = vsel %vm9697_vm11, %v3250_v59, %v3279_v52  ;;  %3284 = vst [vmem:[#allocation2 + $0x4c] sm:$0xf] %v3283_v10  ;;  %v3355_v48 = vshll.u32 %v9788_v39, 16  ;;  %v3373_v35 = vshrl.u32 %v9788_v39, 16  ;;  %v4668_v22 = vrot.slane %v4667_v49, 4 }
 0x2c5   : > { %3281 = vst [vmem:[#allocation2 + $0x44] sm:$0xff] %v9796_v9  ;;  %v3246_v63 = vrot.slane %v3240_v42, 4  ;;  %v3245_v40 = vrot.slane %v3238_v43, 4  ;;  %v4670_v31 = vshll.u32 %v9790_v6, 16  ;;  %v4688_v17 = vshrl.u32 %v9790_v6, 16 }
 0x2c6   : > { %v3357_v46 = vrot.slane %v3355_v48, 5  ;;  %v3375_v5 = vrot.slane %v3373_v35, 4  ;;  %v3400_v15 = vor.u32 %v3399_v4, %v3396_v38  ;;  %v4709_v34 = vshrl.u32 %v9796_v9, 16  ;;  %v3287_v1 = vld [vmem:[#allocation2 + $0x6c] sm:$0x11] }
 0x2c7   : > { %v3252_v61 = vsel %vm1815_vm3, %v3246_v63, %v3240_v42  ;;  %v3291_v2 = vsel %vm9650_vm14, %v3246_v63, %v3290_v11  ;;  %v3251_v8 = vsel %vm1815_vm3, %v3245_v40, %v3238_v43  ;;  %3286 = vst.msk [vmem:[#allocation2 + $0x60] sm:$0xf] %vm10553_vm12, %v3245_v40  ;;  %v4672_v58 = vrot.slane %v4670_v31, 5  ;;  %v9818_v28 = vld [vmem:[#allocation2 + $0x30] sm:$0x11] }
 0x2c8   : > { %v3288_v21 = vsel %vm9714_vm10, %v3252_v61, %v3287_v1  ;;  %3292 = vst [vmem:[#allocation2 + $0x74] sm:$0x1] %v3291_v2  ;;  %3285 = vst.msk [vmem:[#allocation2 + $0x58] sm:$0xff] %vm9728_vm7, %v3251_v8  ;;  %v3358_v14 = vsel %vm9147_vm2, %v9753_v44, %v3357_v46  ;;  %v3376_v53 = vor.u32 %v3375_v5, %v3357_v46  ;;  %v4690_v29 = vrot.slane %v4688_v17, 4  ;;  %v9820_v19 = vld [vmem:[#allocation2 + $0x64] sm:$0x11] }
 0x2c9   : > { %3289 = vst [vmem:[#allocation2 + $0x6c] sm:$0x11] %v3288_v21  ;;  %v4673_v24 = vsel %vm9147_vm2, %v4668_v22, %v4672_v58  ;;  %v4694_v54 = vshll.u32 %v9818_v28, 16  ;;  %v3401_v25 = vrot.slane %v3400_v15, 4  ;;  %v3427_v23 = vshll.u32 %v9820_v19, 16 }
 0x2ca   : > { %v3377_v3 = vrot.slane %v3376_v53, 4  ;;  %v4691_v7 = vor.u32 %v4690_v29, %v4672_v58  ;;  %v4711_v47 = vrot.slane %v4709_v34, 4  ;;  %v4712_v44 = vshll.u32 %v9796_v9, 16  ;;  %v9835_v52 = vld [vmem:[#allocation2 + $0x1c] sm:$0xf] }
 0x2cb   : > { %v4696_v62 = vrot.slane %v4694_v54, 5  ;;  %v9827_v56 = vld [vmem:[#allocation2 + $0x50] sm:$0xff]  ;;  %v3429_v41 = vrot.slane %v3427_v23, 5  ;;  %v3360_v32 = vshrl.u32 %v9809_v18, 16  ;;  %v3363_v38 = vshll.u32 %v9809_v18, 16 }
 0x2cc   : > { %v3382_v49 = vsel %vm9147_vm2, %v3377_v3, %v3381_v30  ;;  %v4692_v4 = vrot.slane %v4691_v7, 4  ;;  %v3403_v60 = vshll.u32 %v9827_v56, 16  ;;  %v3421_v59 = vshrl.u32 %v9827_v56, 16  ;;  %v8518_v11 = vld [vmem:[#allocation7 + $0x240] ss:$8 sps:$4 sm:$0xff]  }
 0x2cd   : > { %v7537_v10 = vcombine.low %v3358_v14, %v3382_v49  ;;  %v7538_v42 = vcombine.high %v3358_v14, %v3382_v49  ;;  %v4714_v43 = vrot.slane %v4712_v44, 5  ;;  %v3362_v48 = vrot.slane %v3360_v32, 4  ;;  %v8523_v22 = vld [vmem:[#allocation7 + $0x254] ss:$8 sps:$4 sm:$0xff]   ;;  %v9848_v58 = vld [vmem:[#allocation2 + $0x30] sm:$0x1] }
 0x2ce   : > { %v4697_v35 = vsel %vm9147_vm2, %v4692_v4, %v4696_v62  ;;  %v3405_v63 = vrot.slane %v3403_v60, 5  ;;  %v3423_v40 = vrot.slane %v3421_v59, 4  ;;  %v3365_v31 = vrot.slane %v3363_v38, 5  ;;  %v8521_v21 = vld [vmem:[#allocation7 + $0x250] ss:$8 sps:$4 sm:$0xff]  }
 0x2cf   : > { %3742 = vmatprep.mubr.bf16.mxu0 %v7538_v42  ;;  %v7685_v30 = vcombine.low %v4673_v24, %v4697_v35  ;;  %v7686_v17 = vcombine.high %v4673_v24, %v4697_v35  ;;  %v9839_v46 = vld [vmem:[#allocation2 + $0x58] sm:$0xff]  ;;  %v4715_v5 = vor.u32 %v4714_v43, %v4711_v47  ;;  %v3369_v15 = vshll.u32 %v9835_v52, 16 }
 0x2d0   : > { %3743 = vmatmul.mubr.bf16.vlgmr.msra.gmra.mrb[8].mxu0 %v7537_v10  ;;  %v3406_v34 = vsel %vm9147_vm2, %v3401_v25, %v3405_v63  ;;  %v3424_v61 = vor.u32 %v3423_v40, %v3405_v63  ;;  %v9844_v1 = vld [vmem:[#allocation2 + $0x6c] sm:$0x11]  ;;  %v4718_v2 = vshll.u32 %v9839_v46, 16  ;;  %v4736_v8 = vshrl.u32 %v9839_v46, 16  ;;  %v8526_v25 = vld [vmem:[#allocation7 + $0x264] ss:$8 sps:$4 sm:$0xff]  }
 0x2d1   : > { %3764 = vmatpush1.bf16.msra.mxu0 %v8518_v11  ;;  %5056 = vmatprep.mubr.bf16.mxu1 %v7686_v17  ;;  %v4716_v14 = vrot.slane %v4715_v5, 4  ;;  %v4742_v53 = vshll.u32 %v9844_v1, 16  ;;  %v3366_v29 = vor.u32 %v3365_v31, %v3362_v48  ;;  %v9851_v24 = vrot.slane %v3369_v15, 5  ;;  %v9861_v59 = vld [vmem:[#allocation2 + $0x38] sm:$0x1] }
 0x2d2   : > { %5057 = vmatmul.mubr.bf16.vlgmr.msra.gmra.mrb[8].mxu1 %v7685_v30  ;;  %3765 = vmatprep.subr.bf16.mxu0 %v8523_v22  ;;  %v3425_v54 = vrot.slane %v3424_v61, 4  ;;  %v4720_v23 = vrot.slane %v4718_v2, 5  ;;  %v4738_v3 = vrot.slane %v4736_v8, 4  ;;  %v3383_v7 = vshrl.u32 %v9835_v52, 16  ;;  %v9863_v10 = vld [vmem:[#allocation2 + $0x44] sm:$0xf] }
 0x2d3   : > { %5078 = vmatpush1.bf16.msra.mxu1 %v8518_v11  ;;  %v4744_v47 = vrot.slane %v4742_v53, 5  ;;  %v3367_v44 = vrot.slane %v3366_v29, 4  ;;  %v3389_v62 = vshll.u32 %v9848_v58, 16  ;;  %v4681_v32 = vor.u32 %v9780_v57, %v9762_v26  ;;  %v8524_v11 = vld [vmem:[#allocation7 + $0x260] ss:$8 sps:$4 sm:$0xff]  }
 0x2d4   : > { %v3430_v38 = vsel %vm9147_vm2, %v3425_v54, %v3429_v41  ;;  %5079 = vmatprep.subr.bf16.mxu1 %v8523_v22  ;;  %v4721_v49 = vsel %vm9147_vm2, %v4716_v14, %v4720_v23  ;;  %v4739_v4 = vor.u32 %v4738_v3, %v4720_v23  ;;  %v3385_v60 = vrot.slane %v3383_v7, 4  ;;  %v9868_v41 = vld [vmem:[#allocation2 + $0x58] sm:$0xf]  ;;  %v8529_v48 = vld [vmem:[#allocation7 + $0x274] ss:$8 sps:$4 sm:$0xff]  }
 0x2d5   : > { %3766 = vmatpush1.bf16.msra.mxu0 %v8521_v21  ;;  %v7541_v42 = vcombine.high %v3406_v34, %v3430_v38  ;;  %v7540_v43 = vcombine.low %v3406_v34, %v3430_v38  ;;  %v3372_v26 = vsel %vm9147_vm2, %v3367_v44, %v9851_v24  ;;  %v3391_v57 = vrot.slane %v3389_v62, 5  ;;  %v8527_v15 = vld [vmem:[#allocation7 + $0x270] ss:$8 sps:$4 sm:$0xff]   ;;  %v9887_v2 = vld [vmem:[#allocation2 + $0x6c] sm:$0x1] }
 0x2d6   : > { %3767 = vmatprep.subr.bf16.mxu0 %v8526_v25  ;;  %v4740_v35 = vrot.slane %v4739_v4, 4  ;;  %v3386_v22 = vor.u32 %v3385_v60, %v9851_v24  ;;  %v9871_v63 = vrot.slane %v4681_v32, 4  ;;  %v9875_v40 = vrot.slane %v4684_v55, 5  ;;  %v8532_v53 = vld [vmem:[#allocation7 + $0x4] ss:$8 sps:$4 sm:$0xff]  }
 0x2d7   : > { %3752 = vmatprep.mubr.bf16.mxu0 %v7541_v42  ;;  %5080 = vmatpush1.bf16.msra.mxu1 %v8521_v21  ;;  %v4698_v31 = vshrl.u32 %v9771_v27, 16  ;;  %v4704_v30 = vshll.u32 %v9861_v59, 16  ;;  %v3408_v17 = vshrl.u32 %v9863_v10, 16  ;;  %v3411_v5 = vshll.u32 %v9863_v10, 16  ;;  %v9891_v54 = vld [vmem:[#allocation2 + $0x4c] sm:$0xf] }
 0x2d8   : > { %3753 = vmatmul.mubr.bf16.gmra.mrb[12].mxu0 %v7540_v43  ;;  %v4745_v34 = vsel %vm9147_vm2, %v4740_v35, %v4744_v47  ;;  %5081 = vmatprep.subr.bf16.mxu1 %v8526_v25  ;;  %v3387_v61 = vrot.slane %v3386_v22, 4  ;;  %v4687_v55 = vsel %vm9147_vm2, %v9871_v63, %v9875_v40  ;;  %v3417_v8 = vshll.u32 %v9868_v41, 16  ;;  %v9895_v47 = vld [vmem:[#allocation2 + $0x60] sm:$0xf]  ;;  %v9902_v60 = vld [vmem:[#allocation2 + $0x74] sm:$0x1] }
 0x2d9   : > { %3768 = vmatpush1.bf16.msra.mxu0 %v8524_v11  ;;  %v7689_v21 = vcombine.high %v4721_v49, %v4745_v34  ;;  %v7688_v14 = vcombine.low %v4721_v49, %v4745_v34  ;;  %3795 = vmatprep.mubr.bf16.mxu0 %v8922_v51  ;;  %v4700_v29 = vrot.slane %v4698_v31, 4  ;;  %v4706_v24 = vrot.slane %v4704_v30, 5 }
 0x2da   : > { %3769 = vmatprep.subr.bf16.mxu0 %v8529_v48  ;;  %v3392_v25 = vsel %vm9147_vm2, %v3387_v61, %v3391_v57  ;;  %v3410_v23 = vrot.slane %v3408_v17, 4  ;;  %v3413_v3 = vrot.slane %v3411_v5, 5  ;;  %v3419_v7 = vrot.slane %v3417_v8, 5 }
 0x2db   : > { %5066 = vmatprep.mubr.bf16.mxu1 %v7689_v21  ;;  %5082 = vmatpush1.bf16.msra.mxu1 %v8524_v11  ;;  %v7539_v44 = vcombine.low %v3372_v26, %v3392_v25  ;;  %v4701_v62 = vor.u32 %v4700_v29, %v9875_v40  ;;  %v3431_v32 = vshrl.u32 %v9868_v41, 16  ;;  %v3437_v38 = vshll.u32 %v9887_v2, 16  ;;  %v8530_v11 = vld [vmem:[#allocation7] ss:$8 sps:$4 sm:$0xff]   ;;  %v8533_v25 = vld [vmem:[#allocation7 + $0x10] ss:$8 sps:$4 sm:$0xff]  }
 0x2dc   : > { %5067 = vmatmul.mubr.bf16.gmra.mrb[12].mxu1 %v7688_v14  ;;  %5083 = vmatprep.subr.bf16.mxu1 %v8529_v48  ;;  %v3414_v49 = vor.u32 %v3413_v3, %v3410_v23  ;;  %v7586_v4 = vcombine.high %v9709_v50, %v9788_v39  ;;  %v4723_v42 = vshrl.u32 %v9891_v54, 16  ;;  %v4726_v43 = vshll.u32 %v9891_v54, 16  ;;  %v8535_v48 = vld [vmem:[#allocation7 + $0x14] ss:$8 sps:$4 sm:$0xff]  }
 0x2dd   : > { %3770 = vmatpush1.bf16.msra.mxu0 %v8527_v15  ;;  %5109 = vmatprep.mubr.bf16.mxu1 %v8922_v51  ;;  %v4702_v26 = vrot.slane %v4701_v62, 4  ;;  %v3433_v57 = vrot.slane %v3431_v32, 4  ;;  %v3439_v35 = vrot.slane %v3437_v38, 5  ;;  %v4732_v22 = vshll.u32 %v9895_v47, 16  ;;  %v4158_v32 = vld [vmem:[#allocation2] sm:$0xee] }
 0x2de   : > { %4052 = vmatprep.subr.bf16.mxu0 %v8532_v53  ;;  %v3415_v63 = vrot.slane %v3414_v49, 4  ;;  %v4725_v40 = vrot.slane %v4723_v42, 4  ;;  %v4728_v31 = vrot.slane %v4726_v43, 5  ;;  %v4746_v30 = vshrl.u32 %v9895_v47, 16 }
 0x2df   : > { %5084 = vmatpush1.bf16.msra.mxu1 %v8527_v15  ;;  %v4707_v17 = vsel %vm9147_vm2, %v4702_v26, %v4706_v24  ;;  %v3434_v5 = vor.u32 %v3433_v57, %v3419_v7  ;;  %v4734_v34 = vrot.slane %v4732_v22, 5  ;;  %v4752_v61 = vshll.u32 %v9902_v60, 16  ;;  %v5472_v26 = vld [vmem:[#allocation2 + $0x8] sm:$0xee] }
 0x2e0   : > { %vm10554_vm14 = vcmask 523264   ;;  %5366 = vmatprep.subr.bf16.mxu1 %v8532_v53  ;;  %v7687_v8 = vcombine.low %v4687_v55, %v4707_v17  ;;  %v3420_v21 = vsel %vm9147_vm2, %v3415_v63, %v3419_v7  ;;  %v4729_v14 = vor.u32 %v4728_v31, %v4725_v40  ;;  %v8538_v53 = vld [vmem:[#allocation7 + $0x24] ss:$8 sps:$4 sm:$0xff]   ;;  %v8536_v40 = vld [vmem:[#allocation7 + $0x20] ss:$8 sps:$4 sm:$0xff]  }
 0x2e1   : > { %7583 = vmatmul.mubr.msk.bf16.vlgmr.msra.gmra.mrb[8].mxu0 %vm10554_vm14, %v7539_v44  ;;  %v4748_v29 = vrot.slane %v4746_v30, 4  ;;  %v3435_v15 = vrot.slane %v3434_v5, 4  ;;  %v4754_v23 = vrot.slane %v4752_v61, 5  ;;  %v7734_v24 = vcombine.high %v9743_v33, %v9790_v6  ;;  %vm10555_vm9 = vmmov %vm10554_vm14  ;;  %v4160_v61 = vld [vmem:[#allocation2 + $0x3c] sm:$0xee] }
 0x2e2   : > { %4053 = vmatpush1.bf16.msra.mxu0 %v8530_v11  ;;  %3805 = vmatprep.mubr.bf16.mxu0 %v8922_v51  ;;  %v7585_v3 = vcombine.low %v9709_v50, %v9788_v39  ;;  %v4730_v55 = vrot.slane %v4729_v14, 4  ;;  %v7589_v7 = vcombine.high %v9747_v45, %v9827_v56  ;;  %v7733_v62 = vcombine.low %v9743_v33, %v9790_v6  ;;  %vm10556_vm4 = vmmov %vm10555_vm9  ;;  %v8589_v50 = vld [vmem:[#allocation7 + $0x134] ss:$8 sps:$4 sm:$0xff]   ;;  %v8593_v33 = vld [vmem:[#allocation7 + $0x284] ss:$8 sps:$4 sm:$0xff]  }
 0x2e3   : > { %4054 = vmatprep.subr.bf16.mxu0 %v8535_v48  ;;  %v4749_v44 = vor.u32 %v4748_v29, %v4734_v34  ;;  %v3440_v38 = vsel %vm9147_vm2, %v3435_v15, %v3439_v35  ;;  %v7737_v49 = vcombine.high %v9796_v9, %v9839_v46  ;;  %v7588_v42 = vcombine.low %v9747_v45, %v9827_v56  ;;  %v5474_v29 = vld [vmem:[#allocation2 + $0x44] sm:$0xee] }
 0x2e4   : > { %v7736_v43 = vcombine.low %v9796_v9, %v9839_v46  ;;  %7731 = vmatmul.mubr.msk.bf16.vlgmr.msra.gmra.mrb[8].mxu1 %vm10555_vm9, %v7687_v8  ;;  %v7542_v57 = vcombine.low %v3420_v21, %v3440_v38  ;;  %v4735_v22 = vsel %vm9147_vm2, %v4730_v55, %v4734_v34  ;;  %v7587_v35 = vcombine.low %v9809_v18, %v9835_v52  ;;  %v8541_v34 = vld [vmem:[#allocation7 + $0x34] ss:$8 sps:$4 sm:$0xff]   ;;  %v4159_v38 = vld [vmem:[#allocation2 + $0x8] sm:$0xe]  ;;  %v8601_v9 = vld [vmem:[#allocation7 + $0x2a4] ss:$8 sps:$4 sm:$0xff]  }
 0x2e5   : > { %v4750_v63 = vrot.slane %v4749_v44, 4  ;;  %5367 = vmatpush1.bf16.msra.mxu1 %v8530_v11  ;;  %v7735_v31 = vcombine.low %v9739_v12, %v9771_v27  ;;  %v7590_v30 = vcombine.low %v9863_v10, %v9868_v41  ;;  %v7633_v17 = vrot.slane %v4158_v32, 9  ;;  %5119 = vmatprep.mubr.bf16.mxu1 %v8922_v51  ;;  %v8594_v45 = vld [vmem:[#allocation7 + $0x290] ss:$8 sps:$4 sm:$0xff]   ;;  %v8604_v18 = vld [vmem:[#allocation7 + $0x2b4] ss:$8 sps:$4 sm:$0xff]  }
 0x2e6   : > { %4055 = vmatpush1.bf16.msra.mxu0 %v8533_v25  ;;  %v4172_v5 = vrot.slane %v9788_v39, 5  ;;  %5368 = vmatprep.subr.bf16.mxu1 %v8535_v48  ;;  %v4179_v21 = vrot.slane %v9777_v37, 5  ;;  %v7738_v11 = vcombine.low %v9891_v54, %v9895_v47  ;;  %v7781_v14 = vrot.slane %v5472_v26, 9  ;;  %v8539_v26 = vld [vmem:[#allocation7 + $0x30] ss:$8 sps:$4 sm:$0xff]  }
 0x2e7   : > { %4056 = vmatprep.subr.bf16.mxu0 %v8538_v53  ;;  %v4755_v8 = vsel %vm9147_vm2, %v4750_v63, %v4754_v23  ;;  %v5486_v48 = vrot.slane %v9790_v6, 5  ;;  %v5493_v36 = vrot.slane %v9818_v28, 5  ;;  %v7635_v37 = vrot.slane %v4160_v61, 9  ;;  %v8544_v28 = vld [vmem:[#allocation7 + $0x44] ss:$8 sps:$4 sm:$0xff]   ;;  %vm10557_vm2 = vmmov %vm10556_vm4 }
 0x2e8   : > { %v7690_v15 = vcombine.low %v4735_v22, %v4755_v8  ;;  %v9950_v55 = vsel %vm9325_vm6, %v7633_v17, %v4172_v5  ;;  %v4178_v44 = vrot.slane %v4172_v5, 4  ;;  %v4186_v23 = vrot.slane %v9827_v56, 5  ;;  %v8587_v39 = vld [vmem:[#allocation7 + $0x130] ss:$8 sps:$4 sm:$0xff]   ;;  %v8591_v6 = vld [vmem:[#allocation7 + $0x280] ss:$8 sps:$4 sm:$0xff]   ;;  %vm10559_vm13 = vmmov %vm10557_vm2 }
 0x2e9   : > { %7584 = vmatmul.mubr.msk.bf16.gmra.mrb[12].mxu0 %vm10556_vm4, %v7542_v57  ;;  %v4193_v32 = vrot.slane %v9820_v19, 5  ;;  %5369 = vmatpush1.bf16.msra.mxu1 %v8533_v25  ;;  %v9963_v63 = vsel %vm9325_vm6, %v7781_v14, %v5486_v48  ;;  %v5492_v57 = vrot.slane %v5486_v48, 4  ;;  %v7783_v17 = vrot.slane %v5474_v29, 9  ;;  %v8599_v56 = vld [vmem:[#allocation7 + $0x2a0] ss:$8 sps:$4 sm:$0xff]   ;;  %vm10560_vm15 = vmmov %vm10557_vm2 }
 0x2ea   : > { %4057 = vmatpush1.bf16.msra.mxu0 %v8536_v40  ;;  %v9959_v22 = vsel %vm9325_vm6, %v4178_v44, %v4179_v21  ;;  %4084 = vmatprep.mubr.bf16.mxu0 %v7586_v4  ;;  %v9974_v5 = vsel %vm9325_vm6, %v7635_v37, %v4186_v23  ;;  %v4192_v61 = vrot.slane %v4186_v23, 4  ;;  %v5500_v4 = vrot.slane %v9839_v46, 5  ;;  %v8547_v23 = vld [vmem:[#allocation7 + $0x54] ss:$8 sps:$4 sm:$0xff]   ;;  %v8602_v12 = vld [vmem:[#allocation7 + $0x2b0] ss:$8 sps:$4 sm:$0xff]   ;;  %vm10561_vm8 = vmmov %vm10557_vm2 }
 0x2eb   : > { %4058 = vmatprep.subr.bf16.mxu0 %v8541_v34  ;;  %v7638_v25 = vcombine.high %v9950_v55, %v9959_v22  ;;  %5370 = vmatprep.subr.bf16.mxu1 %v8538_v53  ;;  %v9978_v8 = vsel %vm9325_vm6, %v5492_v57, %v5493_v36  ;;  %v5507_v21 = vrot.slane %v9844_v1, 5  ;;  %v7634_v14 = vrot.slane %v4159_v38, 9  ;;  %v8542_v36 = vld [vmem:[#allocation7 + $0x40] ss:$8 sps:$4 sm:$0xff]   ;;  %v5473_v57 = vld [vmem:[#allocation2 + $0x10] sm:$0xe]  ;;  %vm10569_vm3 = vmmov %vm10557_vm2 }
 0x2ec   : > { %7732 = vmatmul.mubr.msk.bf16.gmra.mrb[12].mxu1 %vm10557_vm2, %v7690_v15  ;;  %v9989_v53 = vsel %vm9325_vm6, %v4192_v61, %v4193_v32  ;;  %v4176_v48 = vrot.slane %v9835_v52, 5  ;;  %v5506_v37 = vrot.slane %v5500_v4, 4  ;;  %v10001_v32 = vsel %vm9325_vm6, %v7783_v17, %v5500_v4  ;;  %v4161_v1 = vld [vmem:[#allocation2 + $0x44] sm:$0xe]  ;;  %v5475_v44 = vld [vmem:[#allocation2 + $0x4c] sm:$0xe]  ;;  %vm10571_vm11 = vmmov %vm10557_vm2 }
 0x2ed   : > { %5371 = vmatpush1.bf16.msra.mxu1 %v8536_v40  ;;  %5398 = vmatprep.mubr.bf16.mxu1 %v7734_v24  ;;  %v4182_v40 = vrot.slane %v9848_v58, 5  ;;  %v5490_v24 = vrot.slane %v9771_v27, 5  ;;  %v5496_v29 = vrot.slane %v9861_v59, 5  ;;  %v4190_v4 = vrot.slane %v9868_v41, 5  ;;  %v8550_v17 = vld [vmem:[#allocation7 + $0x64] ss:$8 sps:$4 sm:$0xff]   ;;  %vm10572_vm10 = vmmov %vm10557_vm2 }
 0x2ee   : > { %4059 = vmatpush1.bf16.msra.mxu0 %v8539_v26  ;;  %v4181_v38 = vrot.slane %v4176_v48, 4  ;;  %5372 = vmatprep.subr.bf16.mxu1 %v8541_v34  ;;  %v10006_v61 = vsel %vm9325_vm6, %v5506_v37, %v5507_v21  ;;  %v10010_v15 = vsel %vm9325_vm6, %v7634_v14, %v4176_v48  ;;  %v8545_v21 = vld [vmem:[#allocation7 + $0x50] ss:$8 sps:$4 sm:$0xff]   ;;  %v7782_v59 = vrot.slane %v5473_v57, 9  ;;  %v8608_v27 = vld [vmem:[#allocation7 + $0x2c4] ss:$8 sps:$4 sm:$0xff]   ;;  %vm10573_vm0 = vmmov %vm10557_vm2 }
 0x2ef   : > { %4060 = vmatprep.subr.bf16.mxu0 %v8544_v28  ;;  %v5495_v48 = vrot.slane %v5490_v24, 4  ;;  %v4196_v37 = vrot.slane %v9887_v2, 5  ;;  %v7636_v58 = vrot.slane %v4161_v1, 9  ;;  %v4195_v19 = vrot.slane %v4190_v4, 4  ;;  %v8606_v52 = vld [vmem:[#allocation7 + $0x2c0] ss:$8 sps:$4 sm:$0xff]  }
 0x2f0   : > { %v10020_v34 = vsel %vm9325_vm6, %v4181_v38, %v4182_v40  ;;  %v10028_v38 = vsel %vm9325_vm6, %v7782_v59, %v5490_v24  ;;  %v5504_v40 = vrot.slane %v9895_v47, 5  ;;  %v5510_v57 = vrot.slane %v9902_v60, 5  ;;  %v8548_v24 = vld [vmem:[#allocation7 + $0x60] ss:$8 sps:$4 sm:$0xff]   ;;  %v8553_v60 = vld [vmem:[#allocation7 + $0x74] ss:$8 sps:$4 sm:$0xff]  }
 0x2f1   : > { %5373 = vmatpush1.bf16.msra.mxu1 %v8539_v26  ;;  %v7639_v14 = vcombine.low %v10010_v15, %v10020_v34  ;;  %v10032_v26 = vsel %vm9325_vm6, %v5495_v48, %v5496_v29  ;;  %v10044_v1 = vsel %vm9325_vm6, %v4195_v19, %v4196_v37  ;;  %v7784_v59 = vrot.slane %v5475_v44, 9  ;;  %v8556_v44 = vld [vmem:[#allocation7 + $0x84] ss:$8 sps:$4 sm:$0xff]   ;;  %v8611_v10 = vld [vmem:[#allocation7 + $0x2d4] ss:$8 sps:$4 sm:$0xff]  }
 0x2f2   : > { %4061 = vmatpush1.bf16.msra.mxu0 %v8542_v36  ;;  %5374 = vmatprep.subr.bf16.mxu1 %v8544_v28  ;;  %v10040_v28 = vsel %vm9325_vm6, %v7636_v58, %v4190_v4  ;;  %v5509_v48 = vrot.slane %v5504_v40, 4  ;;  %v8559_v4 = vld [vmem:[#allocation7 + $0x94] ss:$8 sps:$4 sm:$0xff]   ;;  %v8562_v37 = vld [vmem:[#allocation7 + $0xa4] ss:$8 sps:$4 sm:$0xff]   ;;  %v10562_v46 = vcombine.high %v9963_v63, %v9978_v8  ;;  %vm6079_vm7 = vcmask 1041409  }
 0x2f3   : > { %4062 = vmatprep.subr.bf16.mxu0 %v8547_v23  ;;  %v7642_v29 = vcombine.low %v10040_v28, %v10044_v1  ;;  %v10050_v2 = vsel %vm9325_vm6, %v7784_v59, %v5504_v40  ;;  %v8560_v40 = vld [vmem:[#allocation7 + $0xa0] ss:$8 sps:$4 sm:$0xff]   ;;  %v8571_v59 = vld [vmem:[#allocation7 + $0xd4] ss:$8 sps:$4 sm:$0xff]   ;;  %v8609_v41 = vld [vmem:[#allocation7 + $0x2d0] ss:$8 sps:$4 sm:$0xff]  }
 0x2f4   : > { %v10054_v58 = vsel %vm9325_vm6, %v5509_v48, %v5510_v57  ;;  %v8568_v57 = vld [vmem:[#allocation7 + $0xc4] ss:$8 sps:$4 sm:$0xff]   ;;  %v8569_v48 = vld [vmem:[#allocation7 + $0xd0] ss:$8 sps:$4 sm:$0xff]   ;;  %vm10558_vm6 = vmmov %vm10557_vm2  ;;  %vm6773_vm1 = vcmask 1046528   ;;  %vm6828_vm5 = vcmask 785408  }
 0x2f5   : > { %5375 = vmatpush1.bf16.msra.mxu1 %v8542_v36  ;;  %v7790_v19 = vcombine.low %v10050_v2, %v10054_v58  ;;  %v8551_v36 = vld [vmem:[#allocation7 + $0x70] ss:$8 sps:$4 sm:$0xff]   ;;  %v8612_v54 = vld [vmem:[#allocation7 + $0x2e0] ss:$8 sps:$4 sm:$0xff]   ;;  %v8617_v47 = vld [vmem:[#allocation7 + $0x2f4] ss:$8 sps:$4 sm:$0xff]  }
 0x2f6   : > { %4063 = vmatpush1.bf16.msra.mxu0 %v8545_v21  ;;  %5376 = vmatprep.subr.bf16.mxu1 %v8547_v23  ;;  %v8554_v23 = vld [vmem:[#allocation7 + $0x80] ss:$8 sps:$4 sm:$0xff]   ;;  %v8656_v15 = vld [vmem:[%s10494_s5 + $0x48] sm:$0xff]   ;;  %v8665_v1 = vld [vmem:[%s10494_s5 + $0xd0] sm:$0xff]  }
 0x2f7   : > { %4064 = vmatprep.subr.bf16.mxu0 %v8550_v17  ;;  %v8659_v34 = vld [vmem:[%s10494_s5 + $0x80] sm:$0xff]   ;;  %v8663_v2 = vld [vmem:[%s10494_s5 + $0x88] sm:$0xff]   ;;  %v8664_v28 = vld [vmem:[%s10494_s5 + $0x58] sm:$0xff]  }
 0x2f8   : > { %v8667_v58 = vld [vmem:[%s10494_s5 + $0x90] sm:$0xff]  }
 0x2f9   : > { %5377 = vmatpush1.bf16.msra.mxu1 %v8545_v21  ;;  %v8565_v21 = vld [vmem:[#allocation7 + $0xb4] ss:$8 sps:$4 sm:$0xff]  }
 0x2fa   : > { %4065 = vmatpush1.bf16.msra.mxu0 %v8548_v24  ;;  %5378 = vmatprep.subr.bf16.mxu1 %v8550_v17  ;;  %v8563_v17 = vld [vmem:[#allocation7 + $0xb0] ss:$8 sps:$4 sm:$0xff]  }
 0x2fb   : > { %4066 = vmatprep.subr.bf16.mxu0 %v8553_v60 }
 0x2fd   : > { %5379 = vmatpush1.bf16.msra.mxu1 %v8548_v24  ;;  %v8566_v24 = vld [vmem:[#allocation7 + $0xc0] ss:$8 sps:$4 sm:$0xff]  }
 0x2fe   : > { %4067 = vmatpush1.bf16.msra.mxu0 %v8551_v36  ;;  %5380 = vmatprep.subr.bf16.mxu1 %v8553_v60  ;;  %v8574_v60 = vld [vmem:[#allocation7 + $0xe4] ss:$8 sps:$4 sm:$0xff]  }
 0x2ff   : > { %4068 = vmatprep.subr.bf16.mxu0 %v8556_v44 }
 0x301   : > { %5381 = vmatpush1.bf16.msra.mxu1 %v8551_v36  ;;  %v8572_v36 = vld [vmem:[#allocation7 + $0xe0] ss:$8 sps:$4 sm:$0xff]  }
 0x302   : > { %4069 = vmatpush1.bf16.msra.mxu0 %v8554_v23  ;;  %5382 = vmatprep.subr.bf16.mxu1 %v8556_v44  ;;  %v8577_v44 = vld [vmem:[#allocation7 + $0xf4] ss:$8 sps:$4 sm:$0xff]  }
 0x303   : > { %4070 = vmatprep.subr.bf16.mxu0 %v8559_v4 }
 0x305   : > { %5383 = vmatpush1.bf16.msra.mxu1 %v8554_v23  ;;  %v8575_v23 = vld [vmem:[#allocation7 + $0xf0] ss:$8 sps:$4 sm:$0xff]  }
 0x306   : > { %4071 = vmatpush1.bf16.msra.mxu0 %v8557_v13  ;;  %5384 = vmatprep.subr.bf16.mxu1 %v8559_v4  ;;  %v8580_v4 = vld [vmem:[#allocation7 + $0x104] ss:$8 sps:$4 sm:$0xff]  }
 0x307   : > { %4072 = vmatprep.subr.bf16.mxu0 %v8562_v37 }
 0x309   : > { %5385 = vmatpush1.bf16.msra.mxu1 %v8557_v13  ;;  %v8578_v13 = vld [vmem:[#allocation7 + $0x100] ss:$8 sps:$4 sm:$0xff]  }
 0x30a   : > { %4073 = vmatpush1.bf16.msra.mxu0 %v8560_v40  ;;  %5386 = vmatprep.subr.bf16.mxu1 %v8562_v37  ;;  %v8583_v37 = vld [vmem:[#allocation7 + $0x114] ss:$8 sps:$4 sm:$0xff]  }
 0x30b   : > { %4074 = vmatprep.subr.bf16.mxu0 %v8565_v21 }
 0x30d   : > { %5387 = vmatpush1.bf16.msra.mxu1 %v8560_v40  ;;  %v8581_v40 = vld [vmem:[#allocation7 + $0x110] ss:$8 sps:$4 sm:$0xff]  }
 0x30e   : > { %4075 = vmatpush1.bf16.msra.mxu0 %v8563_v17  ;;  %5388 = vmatprep.subr.bf16.mxu1 %v8565_v21  ;;  %v8586_v21 = vld [vmem:[#allocation7 + $0x124] ss:$8 sps:$4 sm:$0xff]  }
 0x30f   : > { %4076 = vmatprep.subr.bf16.mxu0 %v8568_v57 }
 0x311   : > { %5389 = vmatpush1.bf16.msra.mxu1 %v8563_v17  ;;  %v8584_v17 = vld [vmem:[#allocation7 + $0x120] ss:$8 sps:$4 sm:$0xff]  }
 0x312   : > { %4077 = vmatpush1.bf16.msra.mxu0 %v8566_v24  ;;  %5390 = vmatprep.subr.bf16.mxu1 %v8568_v57  ;;  %v8632_v57 = vld [vmem:[#allocation7 + $0x344] ss:$8 sps:$4 sm:$0xff]  }
 0x313   : > { %4078 = vmatprep.subr.bf16.mxu0 %v8571_v59 }
 0x315   : > { %5391 = vmatpush1.bf16.msra.mxu1 %v8566_v24  ;;  %v8630_v24 = vld [vmem:[#allocation7 + $0x340] ss:$8 sps:$4 sm:$0xff]  }
 0x316   : > { %4079 = vmatpush1.bf16.msra.mxu0 %v8569_v48  ;;  %5392 = vmatprep.subr.bf16.mxu1 %v8571_v59  ;;  %v8635_v59 = vld [vmem:[#allocation7 + $0x354] ss:$8 sps:$4 sm:$0xff]  }
 0x317   : > { %4080 = vmatprep.subr.bf16.mxu0 %v8574_v60 }
 0x319   : > { %5393 = vmatpush1.bf16.msra.mxu1 %v8569_v48  ;;  %v8633_v48 = vld [vmem:[#allocation7 + $0x350] ss:$8 sps:$4 sm:$0xff]  }
 0x31a   : > { %4081 = vmatpush1.bf16.msra.mxu0 %v8572_v36  ;;  %5394 = vmatprep.subr.bf16.mxu1 %v8574_v60  ;;  %v8638_v60 = vld [vmem:[#allocation7 + $0x364] ss:$8 sps:$4 sm:$0xff]  }
 0x31b   : > { %4082 = vmatprep.subr.bf16.mxu0 %v8577_v44 }
 0x31d   : > { %5395 = vmatpush1.bf16.msra.mxu1 %v8572_v36  ;;  %v8636_v36 = vld [vmem:[#allocation7 + $0x360] ss:$8 sps:$4 sm:$0xff]  }
 0x31e   : > { %4083 = vmatpush1.bf16.msra.mxu0 %v8575_v23  ;;  %5396 = vmatprep.subr.bf16.mxu1 %v8577_v44  ;;  %v8641_v44 = vld [vmem:[#allocation7 + $0x374] ss:$8 sps:$4 sm:$0xff]  }
 0x31f   : > { %4105 = vmatprep.subr.bf16.mxu0 %v8580_v4 }
 0x321   : > { %4085 = vmatmul.mubr.bf16.vlgmr.msra.gmra.mrb[8].mxu0 %v7585_v3  ;;  %5397 = vmatpush1.bf16.msra.mxu1 %v8575_v23  ;;  %v8596_v3 = vld [vmem:[#allocation7 + $0x294] ss:$8 sps:$4 sm:$0xff]   ;;  %v8639_v23 = vld [vmem:[#allocation7 + $0x370] ss:$8 sps:$4 sm:$0xff]  }
 0x322   : > { %4094 = vmatprep.mubr.bf16.mxu0 %v7589_v7  ;;  %4106 = vmatpush1.bf16.msra.mxu0 %v8578_v13  ;;  %v8614_v7 = vld [vmem:[#allocation7 + $0x2e4] ss:$8 sps:$4 sm:$0xff]  }
 0x323   : > { %4107 = vmatprep.subr.bf16.mxu0 %v8583_v37  ;;  %5419 = vmatprep.subr.bf16.mxu1 %v8580_v4  ;;  %v8644_v4 = vld [vmem:[#allocation7 + $0x384] ss:$8 sps:$4 sm:$0xff]  }
 0x324   : > { %5399 = vmatmul.mubr.bf16.vlgmr.msra.gmra.mrb[8].mxu1 %v7733_v62  ;;  %v8615_v62 = vld [vmem:[#allocation7 + $0x2f0] ss:$8 sps:$4 sm:$0xff]  }
 0x325   : > { %5408 = vmatprep.mubr.bf16.mxu1 %v7737_v49  ;;  %5420 = vmatpush1.bf16.msra.mxu1 %v8578_v13  ;;  %v8620_v49 = vld [vmem:[#allocation7 + $0x304] ss:$8 sps:$4 sm:$0xff]   ;;  %v8642_v13 = vld [vmem:[#allocation7 + $0x380] ss:$8 sps:$4 sm:$0xff]  }
 0x326   : > { %4108 = vmatpush1.bf16.msra.mxu0 %v8581_v40  ;;  %5421 = vmatprep.subr.bf16.mxu1 %v8583_v37  ;;  %v8647_v37 = vld [vmem:[#allocation7 + $0x394] ss:$8 sps:$4 sm:$0xff]  }
 0x327   : > { %4109 = vmatprep.subr.bf16.mxu0 %v8586_v21 }
 0x329   : > { %4095 = vmatmul.mubr.bf16.gmra.mrb[12].mxu0 %v7588_v42  ;;  %5422 = vmatpush1.bf16.msra.mxu1 %v8581_v40  ;;  %v8618_v42 = vld [vmem:[#allocation7 + $0x300] ss:$8 sps:$4 sm:$0xff]   ;;  %v10563_v40 = vcombine.low %v9950_v55, %v9959_v22  ;;  %v10566_v55 = vcombine.high %v10001_v32, %v10006_v61  ;;  %v8653_v22 = vld [vmem:[#allocation7 + $0x3b4] ss:$8 sps:$4 sm:$0xff]  }
 0x32a   : > { %4110 = vmatpush1.bf16.msra.mxu0 %v8584_v17  ;;  %4137 = vmatprep.mubr.bf16.mxu0 %v8922_v51 }
 0x32b   : > { %4111 = vmatprep.subr.bf16.mxu0 %v8589_v50  ;;  %5423 = vmatprep.subr.bf16.mxu1 %v8586_v21  ;;  %v10564_v21 = vcombine.high %v9974_v5, %v9989_v53 }
 0x32c   : > { %5409 = vmatmul.mubr.bf16.gmra.mrb[12].mxu1 %v7736_v43  ;;  %v8623_v43 = vld [vmem:[#allocation7 + $0x314] ss:$8 sps:$4 sm:$0xff]  }
 0x32d   : > { %5424 = vmatpush1.bf16.msra.mxu1 %v8584_v17  ;;  %5451 = vmatprep.mubr.bf16.mxu1 %v8922_v51  ;;  %v8645_v17 = vld [vmem:[#allocation7 + $0x390] ss:$8 sps:$4 sm:$0xff]  }
 0x32e   : > { %4112 = vmatpush1.bf16.msra.mxu0 %v8587_v39  ;;  %5425 = vmatprep.subr.bf16.mxu1 %v8589_v50  ;;  %v8650_v50 = vld [vmem:[#allocation7 + $0x3a4] ss:$8 sps:$4 sm:$0xff]  }
 0x32f   : > { %4467 = vmatprep.subr.bf16.mxu0 %v8593_v33 }
 0x331   : > { %7631 = vmatmul.mubr.msk.bf16.vlgmr.msra.gmra.mrb[8].mxu0 %vm10558_vm6, %v7587_v35  ;;  %5426 = vmatpush1.bf16.msra.mxu1 %v8587_v39  ;;  %v8621_v35 = vld [vmem:[#allocation7 + $0x310] ss:$8 sps:$4 sm:$0xff]   ;;  %v10565_v39 = vcombine.low %v9963_v63, %v9978_v8  ;;  %v10568_v63 = vcombine.low %v10001_v32, %v10006_v61  ;;  %v8654_v8 = vld [vmem:[%s10494_s5 + $0x40] sm:$0xff]  }
 0x332   : > { %4468 = vmatpush1.bf16.msra.mxu0 %v8591_v6  ;;  %4147 = vmatprep.mubr.bf16.mxu0 %v8922_v51  ;;  %v8657_v32 = vld [vmem:[%s10494_s5 + $0xc0] sm:$0xff]   ;;  %v8658_v61 = vld [vmem:[%s10494_s5 + $0x8] sm:$0xff]  }
 0x333   : > { %4469 = vmatprep.subr.bf16.mxu0 %v8596_v3  ;;  %5780 = vmatprep.subr.bf16.mxu1 %v8593_v33  ;;  %v8648_v33 = vld [vmem:[#allocation7 + $0x3a0] ss:$8 sps:$4 sm:$0xff]  }
 0x334   : > { %7779 = vmatmul.mubr.msk.bf16.vlgmr.msra.gmra.mrb[8].mxu1 %vm10559_vm13, %v7735_v31  ;;  %v8626_v31 = vld [vmem:[#allocation7 + $0x324] ss:$8 sps:$4 sm:$0xff]  }
 0x335   : > { %5781 = vmatpush1.bf16.msra.mxu1 %v8591_v6  ;;  %5461 = vmatprep.mubr.bf16.mxu1 %v8922_v51  ;;  %v10567_v6 = vcombine.low %v9974_v5, %v9989_v53  ;;  %v10570_v5 = vcombine.low %v10028_v38, %v10032_v26  ;;  %v8655_v53 = vld [vmem:[%s10494_s5] sm:$0xff]   ;;  %v8661_v38 = vld [vmem:[%s10494_s5 + $0xc8] sm:$0xff]   ;;  %v8662_v26 = vld [vmem:[%s10494_s5 + $0x10] sm:$0xff]  }
 0x336   : > { %4470 = vmatpush1.bf16.msra.mxu0 %v8594_v45  ;;  %5782 = vmatprep.subr.bf16.mxu1 %v8596_v3  ;;  %v8651_v3 = vld [vmem:[#allocation7 + $0x3b0] ss:$8 sps:$4 sm:$0xff]  }
 0x337   : > { %4471 = vmatprep.subr.bf16.mxu0 %v8601_v9 }
 0x339   : > { %7632 = vmatmul.mubr.msk.bf16.gmra.mrb[12].mxu0 %vm10560_vm15, %v7590_v30  ;;  %5783 = vmatpush1.bf16.msra.mxu1 %v8594_v45  ;;  %v8624_v30 = vld [vmem:[#allocation7 + $0x320] ss:$8 sps:$4 sm:$0xff]  }
 0x33a   : > { %4472 = vmatpush1.bf16.msra.mxu0 %v8599_v56  ;;  %4499 = vmatprep.mubr.bf16.mxu0 %v7638_v25  ;;  %v8627_v25 = vld [vmem:[#allocation7 + $0x330] ss:$8 sps:$4 sm:$0xff]   ;;  %v8669_v45 = vld [vmem:[%s10494_s5 + $0xd8] sm:$0xff]  }
 0x33b   : > { %4473 = vmatprep.subr.bf16.mxu0 %v8604_v18  ;;  %5784 = vmatprep.subr.bf16.mxu1 %v8601_v9  ;;  %v8670_v9 = vld [vmem:[%s10494_s5 + $0x20] sm:$0xff]  }
 0x33c   : > { %7780 = vmatmul.mubr.msk.bf16.gmra.mrb[12].mxu1 %vm10561_vm8, %v7738_v11  ;;  %v8629_v11 = vld [vmem:[#allocation7 + $0x334] ss:$8 sps:$4 sm:$0xff]  }
 0x33d   : > { %5785 = vmatpush1.bf16.msra.mxu1 %v8599_v56  ;;  %5812 = vmatprep.mubr.bf16.mxu1 %v10562_v46  ;;  %v8671_v56 = vld [vmem:[%s10494_s5 + $0x98] sm:$0xff]   ;;  %v8676_v46 = vld [vmem:[%s10494_s5 + $0x70] sm:$0xff]  }
 0x33e   : > { %4474 = vmatpush1.bf16.msra.mxu0 %v8602_v12  ;;  %5786 = vmatprep.subr.bf16.mxu1 %v8604_v18  ;;  %v8672_v18 = vld [vmem:[%s10494_s5 + $0x68] sm:$0xff]  }
 0x33f   : > { %4475 = vmatprep.subr.bf16.mxu0 %v8608_v27 }
 0x341   : > { %5787 = vmatpush1.bf16.msra.mxu1 %v8602_v12  ;;  %v8673_v12 = vld [vmem:[%s10494_s5 + $0xe0] sm:$0xff]  }
 0x342   : > { %4476 = vmatpush1.bf16.msra.mxu0 %v8606_v52  ;;  %5788 = vmatprep.subr.bf16.mxu1 %v8608_v27  ;;  %v8674_v27 = vld [vmem:[%s10494_s5 + $0x28] sm:$0xff]  }
 0x343   : > { %4477 = vmatprep.subr.bf16.mxu0 %v8611_v10 }
 0x345   : > { %5789 = vmatpush1.bf16.msra.mxu1 %v8606_v52  ;;  %v8675_v52 = vld [vmem:[%s10494_s5 + $0xa0] sm:$0xff]  }
 0x346   : > { %4478 = vmatpush1.bf16.msra.mxu0 %v8609_v41  ;;  %5790 = vmatprep.subr.bf16.mxu1 %v8611_v10  ;;  %v8677_v10 = vld [vmem:[%s10494_s5 + $0xe8] sm:$0xff]  }
 0x347   : > { %4479 = vmatprep.subr.bf16.mxu0 %v8614_v7 }
 0x349   : > { %5791 = vmatpush1.bf16.msra.mxu1 %v8609_v41  ;;  %v8678_v41 = vld [vmem:[%s10494_s5 + $0x30] sm:$0xff]  }
 0x34a   : > { %4480 = vmatpush1.bf16.msra.mxu0 %v8612_v54  ;;  %5792 = vmatprep.subr.bf16.mxu1 %v8614_v7  ;;  %v8679_v7 = vld [vmem:[%s10494_s5 + $0xa8] sm:$0xff]  }
 0x34b   : > { %4481 = vmatprep.subr.bf16.mxu0 %v8617_v47 }
 0x34d   : > { %5793 = vmatpush1.bf16.msra.mxu1 %v8612_v54  ;;  %v8680_v54 = vld [vmem:[%s10494_s5 + $0x78] sm:$0xff]  }
 0x34e   : > { %4482 = vmatpush1.bf16.msra.mxu0 %v8615_v62  ;;  %5794 = vmatprep.subr.bf16.mxu1 %v8617_v47  ;;  %v8681_v47 = vld [vmem:[%s10494_s5 + $0xf0] sm:$0xff]  }
 0x34f   : > { %4483 = vmatprep.subr.bf16.mxu0 %v8620_v49 }
 0x351   : > { %5795 = vmatpush1.bf16.msra.mxu1 %v8615_v62  ;;  %v8682_v62 = vld [vmem:[%s10494_s5 + $0x38] sm:$0xff]  }
 0x352   : > { %4484 = vmatpush1.bf16.msra.mxu0 %v8618_v42  ;;  %5796 = vmatprep.subr.bf16.mxu1 %v8620_v49  ;;  %v8683_v49 = vld [vmem:[%s10494_s5 + $0xb0] sm:$0xff]  }
 0x353   : > { %4485 = vmatprep.subr.bf16.mxu0 %v8623_v43 }
 0x355   : > { %5797 = vmatpush1.bf16.msra.mxu1 %v8618_v42  ;;  %v8684_v42 = vld [vmem:[%s10494_s5 + $0xf8] sm:$0xff]  }
 0x356   : > { %4486 = vmatpush1.bf16.msra.mxu0 %v8621_v35  ;;  %5798 = vmatprep.subr.bf16.mxu1 %v8623_v43  ;;  %v8688_v43 = vld [vmem:[#allocation9 + $0x4] ss:$16 sps:$4 sm:$0xff]  }
 0x357   : > { %4487 = vmatprep.subr.bf16.mxu0 %v8626_v31 }
 0x359   : > { %5799 = vmatpush1.bf16.msra.mxu1 %v8621_v35  ;;  %v8685_v35 = vld [vmem:[%s10494_s5 + $0xb8] sm:$0xff]  }
 0x35a   : > { %4488 = vmatpush1.bf16.msra.mxu0 %v8624_v30  ;;  %5800 = vmatprep.subr.bf16.mxu1 %v8626_v31  ;;  %v8691_v31 = vld [vmem:[#allocation9 + $0xc] ss:$16 sps:$4 sm:$0xff]  }
 0x35b   : > { %4489 = vmatprep.subr.bf16.mxu0 %v8629_v11 }
 0x35d   : > { %5801 = vmatpush1.bf16.msra.mxu1 %v8624_v30  ;;  %v418_v30 = vld [vmem:[%s10493_s4] sm:$0x3] }
 0x35e   : > { %4490 = vmatpush1.bf16.msra.mxu0 %v8627_v25  ;;  %5802 = vmatprep.subr.bf16.mxu1 %v8629_v11  ;;  %v4585_v11 = vrot.slane %v418_v30, %v9537_v16 }
 0x35f   : > { %4491 = vmatprep.subr.bf16.mxu0 %v8632_v57 }
 0x361   : > { %5803 = vmatpush1.bf16.msra.mxu1 %v8627_v25 }
 0x362   : > { %4492 = vmatpush1.bf16.msra.mxu0 %v8630_v24  ;;  %5804 = vmatprep.subr.bf16.mxu1 %v8632_v57  ;;  %v4589_v57 = vrot.slane %v418_v30, %v9545_v20 }
 0x363   : > { %4493 = vmatprep.subr.bf16.mxu0 %v8635_v59 }
 0x365   : > { %5805 = vmatpush1.bf16.msra.mxu1 %v8630_v24 }
 0x366   : > { %4494 = vmatpush1.bf16.msra.mxu0 %v8633_v48  ;;  %5806 = vmatprep.subr.bf16.mxu1 %v8635_v59 }
 0x367   : > { %4495 = vmatprep.subr.bf16.mxu0 %v8638_v60 }
 0x369   : > { %5807 = vmatpush1.bf16.msra.mxu1 %v8633_v48 }
 0x36a   : > { %4496 = vmatpush1.bf16.msra.mxu0 %v8636_v36  ;;  %5808 = vmatprep.subr.bf16.mxu1 %v8638_v60 }
 0x36b   : > { %4497 = vmatprep.subr.bf16.mxu0 %v8641_v44 }
 0x36d   : > { %5809 = vmatpush1.bf16.msra.mxu1 %v8636_v36 }
 0x36e   : > { %4498 = vmatpush1.bf16.msra.mxu0 %v8639_v23  ;;  %5810 = vmatprep.subr.bf16.mxu1 %v8641_v44 }
 0x36f   : > { %4520 = vmatprep.subr.bf16.mxu0 %v8644_v4 }
 0x371   : > { %4500 = vmatmul.mubr.bf16.vlgmr.msra.gmra.mrb[8].mxu0 %v10563_v40  ;;  %5811 = vmatpush1.bf16.msra.mxu1 %v8639_v23 }
 0x372   : > { %4509 = vmatprep.mubr.bf16.mxu0 %v10564_v21  ;;  %4521 = vmatpush1.bf16.msra.mxu0 %v8642_v13 }
 0x373   : > { %4522 = vmatprep.subr.bf16.mxu0 %v8647_v37  ;;  %5833 = vmatprep.subr.bf16.mxu1 %v8644_v4 }
 0x374   : > { %5813 = vmatmul.mubr.bf16.vlgmr.msra.gmra.mrb[8].mxu1 %v10565_v39 }
 0x375   : > { %5822 = vmatprep.mubr.bf16.mxu1 %v10566_v55  ;;  %5834 = vmatpush1.bf16.msra.mxu1 %v8642_v13 }
 0x376   : > { %4523 = vmatpush1.bf16.msra.mxu0 %v8645_v17  ;;  %5835 = vmatprep.subr.bf16.mxu1 %v8647_v37 }
 0x377   : > { %4524 = vmatprep.subr.bf16.mxu0 %v8650_v50 }
 0x379   : > { %4510 = vmatmul.mubr.bf16.gmra.mrb[12].mxu0 %v10567_v6  ;;  %5836 = vmatpush1.bf16.msra.mxu1 %v8645_v17 }
 0x37a   : > { %4525 = vmatpush1.bf16.msra.mxu0 %v8648_v33  ;;  %4552 = vmatprep.mubr.bf16.mxu0 %v8922_v51 }
 0x37b   : > { %4526 = vmatprep.subr.bf16.mxu0 %v8653_v22  ;;  %5837 = vmatprep.subr.bf16.mxu1 %v8650_v50 }
 0x37c   : > { %5823 = vmatmul.mubr.bf16.gmra.mrb[12].mxu1 %v10568_v63 }
 0x37d   : > { %5838 = vmatpush1.bf16.msra.mxu1 %v8648_v33  ;;  %5865 = vmatprep.mubr.bf16.mxu1 %v8922_v51 }
 0x37e   : > { %4527 = vmatpush1.bf16.msra.mxu0 %v8651_v3  ;;  %5839 = vmatprep.subr.bf16.mxu1 %v8653_v22 }
 0x37f   : > { %7933 = vmatprep.subr.bf16.mxu0 %v8654_v8 }
 0x381   : > { %7683 = vmatmul.mubr.msk.bf16.vlgmr.msra.gmra.mrb[8].mxu0 %vm10569_vm3, %v7639_v14  ;;  %5840 = vmatpush1.bf16.msra.mxu1 %v8651_v3  ;;  %v8660_v14 = vld [vmem:[%s10494_s5 + $0x50] sm:$0xff]  }
 0x382   : > { %4562 = vmatprep.mubr.bf16.mxu0 %v8922_v51  ;;  %7934 = vmatpush3.bf16.msra.mxu0 %v8655_v53 }
 0x383   : > { %7935 = vmatprep.subr.bf16.mxu0 %v8656_v15  ;;  %7955 = vmatprep.subr.bf16.mxu1 %v8657_v32 }
 0x384   : > { %7831 = vmatmul.mubr.msk.bf16.vlgmr.msra.gmra.mrb[8].mxu1 %vm10571_vm11, %v10570_v5 }
 0x385   : > { %5875 = vmatprep.mubr.bf16.mxu1 %v8922_v51  ;;  %7956 = vmatpush3.bf16.msra.mxu1 %v8659_v34 }
 0x386   : > { %7936 = vmatpush3.bf16.msra.mxu0 %v8658_v61  ;;  %7957 = vmatprep.subr.bf16.mxu1 %v8661_v38 }
 0x387   : > { %7937 = vmatprep.subr.bf16.mxu0 %v8660_v14 }
 0x389   : > { %7684 = vmatmul.mubr.msk.bf16.gmra.mrb[12].mxu0 %vm10572_vm10, %v7642_v29  ;;  %7958 = vmatpush3.bf16.msra.mxu1 %v8663_v2  ;;  %v8666_v29 = vld [vmem:[%s10494_s5 + $0x18] sm:$0xff]  }
 0x38a   : > { %7938 = vmatpush3.bf16.msra.mxu0 %v8662_v26  ;;  %7959 = vmatprep.subr.bf16.mxu1 %v8665_v1 }
 0x38b   : > { %7939 = vmatprep.subr.bf16.mxu0 %v8664_v28 }
 0x38c   : > { %7832 = vmatmul.mubr.msk.bf16.gmra.mrb[12].mxu1 %vm10573_vm0, %v7790_v19  ;;  %v8668_v19 = vld [vmem:[%s10494_s5 + $0x60] sm:$0xff]  }
 0x38d   : > { %7960 = vmatpush3.bf16.msra.mxu1 %v8667_v58 }
 0x38e   : > { %7940 = vmatpush3.bf16.msra.mxu0 %v8666_v29  ;;  %7961 = vmatprep.subr.bf16.mxu1 %v8669_v45 }
 0x38f   : > { %7941 = vmatprep.subr.bf16.mxu0 %v8668_v19 }
 0x391   : > { %7962 = vmatpush3.bf16.msra.mxu1 %v8671_v56 }
 0x392   : > { %7942 = vmatpush3.bf16.msra.mxu0 %v8670_v9  ;;  %7963 = vmatprep.subr.bf16.mxu1 %v8673_v12 }
 0x393   : > { %7943 = vmatprep.subr.bf16.mxu0 %v8672_v18 }
 0x395   : > { %7964 = vmatpush3.bf16.msra.mxu1 %v8675_v52 }
 0x396   : > { %7944 = vmatpush3.bf16.msra.mxu0 %v8674_v27  ;;  %7965 = vmatprep.subr.bf16.mxu1 %v8677_v10 }
 0x397   : > { %7945 = vmatprep.subr.bf16.mxu0 %v8676_v46 }
 0x399   : > { %7966 = vmatpush3.bf16.msra.mxu1 %v8679_v7 }
 0x39a   : > { %7946 = vmatpush3.bf16.msra.mxu0 %v8678_v41  ;;  %7967 = vmatprep.subr.bf16.mxu1 %v8681_v47 }
 0x39b   : > { %7947 = vmatprep.subr.bf16.mxu0 %v8680_v54 }
 0x39d   : > { %7968 = vmatpush3.bf16.msra.mxu1 %v8683_v49 }
 0x39e   : > { %7948 = vmatpush3.bf16.msra.mxu0 %v8682_v62  ;;  %7969 = vmatprep.subr.bf16.mxu1 %v8684_v42 }
 0x39f   : > { %6558 = vmatprep.subr.bf16.mxu0 %v8688_v43 }
 0x3a1   : > { %7970 = vmatpush3.bf16.msra.mxu1 %v8685_v35 }
 0x3a2   : > { %6599 = vmatprep.subr.bf16.mxu1 %v8691_v31 }
 0x454   : > { %v4554_v25 = vpop.f32.mrb[8].mxu0 }
 0x455   : > { %v4556_v24 = vpop.f32.mrb[9].mxu0  ;;  %v10241_v48 = vadd.f32 %v4585_v11, %v4554_v25 }
 0x456   : > { %v4558_v59 = vpop.f32.mrb[10].mxu0  ;;  %v10245_v44 = vadd.f32 %v4589_v57, %v4556_v24 }
 0x457   : > { %v10243_v60 = vadd.f32 %v4585_v11, %v4558_v59  ;;  %v4560_v36 = vpop.f32.mrb[11].mxu0  ;;  %v5867_v13 = vpop.f32.mrb[8].mxu1 }
 0x458   : > { %v10247_v23 = vadd.f32 %v4589_v57, %v4560_v36  ;;  %v5869_v40 = vpop.f32.mrb[9].mxu1  ;;  %v10253_v39 = vadd.f32 %v5867_v13, %v4585_v11 }
 0x459   : > { %v5926_v4 = vadd.f32 %v10243_v60, %v10241_v48  ;;  %v5871_v17 = vpop.f32.mrb[10].mxu1  ;;  %v10257_v3 = vadd.f32 %v5869_v40, %v4589_v57 }
 0x45a   : > { %v5933_v37 = vadd.f32 %v10247_v23, %v10245_v44  ;;  %v10255_v33 = vadd.f32 %v5871_v17, %v4585_v11  ;;  %v5873_v55 = vpop.f32.mrb[11].mxu1 }
 0x45b   : > { %v5927_v21 = vrot.slane %v5926_v4, 4  ;;  %v10259_v63 = vadd.f32 %v5873_v55, %v4589_v57 }
 0x45c   : > { %v5934_v50 = vrot.slane %v5933_v37, 4  ;;  %v4564_v22 = vpop.f32.mrb[12].mxu0  ;;  %v5940_v53 = vadd.f32 %v10255_v33, %v10253_v39 }
 0x45d   : > { %v5928_v6 = vadd.f32 %v5927_v21, %v5926_v4  ;;  %v4566_v5 = vpop.f32.mrb[13].mxu0  ;;  %v5947_v61 = vadd.f32 %v10259_v63, %v10257_v3  ;;  %v10265_v34 = vadd.f32 %v4585_v11, %v4564_v22 }
 0x45e   : > { %v5935_v8 = vadd.f32 %v5934_v50, %v5933_v37  ;;  %v4568_v15 = vpop.f32.mrb[14].mxu0  ;;  %v5941_v2 = vrot.slane %v5940_v53, 4  ;;  %v10269_v28 = vadd.f32 %v4589_v57, %v4566_v5 }
 0x45f   : > { %v5929_v32 = vrot.slane %v5928_v6, 2  ;;  %v10267_v14 = vadd.f32 %v4585_v11, %v4568_v15  ;;  %v4570_v38 = vpop.f32.mrb[15].mxu0  ;;  %v5948_v58 = vrot.slane %v5947_v61, 4  ;;  %v5877_v45 = vpop.f32.mrb[12].mxu1 }
 0x460   : > { %v5936_v26 = vrot.slane %v5935_v8, 2  ;;  %v10271_v1 = vadd.f32 %v4589_v57, %v4570_v38  ;;  %v5942_v56 = vadd.f32 %v5941_v2, %v5940_v53  ;;  %v5879_v12 = vpop.f32.mrb[13].mxu1  ;;  %v10277_v10 = vadd.f32 %v5877_v45, %v4585_v11 }
 0x461   : > { %v5930_v29 = vadd.f32 %v5929_v32, %v5928_v6  ;;  %v5954_v19 = vadd.f32 %v10267_v14, %v10265_v34  ;;  %v5949_v52 = vadd.f32 %v5948_v58, %v5947_v61  ;;  %v5881_v41 = vpop.f32.mrb[14].mxu1  ;;  %v10281_v35 = vadd.f32 %v5879_v12, %v4589_v57 }
 0x462   : > { %v5937_v9 = vadd.f32 %v5936_v26, %v5935_v8  ;;  %v5961_v18 = vadd.f32 %v10271_v1, %v10269_v28  ;;  %v5943_v54 = vrot.slane %v5942_v56, 2  ;;  %v10279_v62 = vadd.f32 %v5881_v41, %v4585_v11  ;;  %v5883_v49 = vpop.f32.mrb[15].mxu1 }
 0x463   : > { %v5931_v27 = vrot.slane %v5930_v29, 1  ;;  %v5955_v46 = vrot.slane %v5954_v19, 4  ;;  %v5950_v42 = vrot.slane %v5949_v52, 2  ;;  %v10283_v31 = vadd.f32 %v5883_v49, %v4589_v57 }
 0x464   : > { %v5938_v7 = vrot.slane %v5937_v9, 1  ;;  %v5962_v47 = vrot.slane %v5961_v18, 4  ;;  %v5944_v30 = vadd.f32 %v5943_v54, %v5942_v56  ;;  %v5968_v24 = vadd.f32 %v10279_v62, %v10277_v10 }
 0x465   : > { %v5956_v43 = vadd.f32 %v5955_v46, %v5954_v19  ;;  %v5932_v59 = vadd.f32 %v5931_v27, %v5930_v29  ;;  %v5951_v36 = vadd.f32 %v5950_v42, %v5949_v52  ;;  %v5975_v13 = vadd.f32 %v10283_v31, %v10281_v35 }
 0x466   : > { %v5963_v25 = vadd.f32 %v5962_v47, %v5961_v18  ;;  %v5939_v11 = vadd.f32 %v5938_v7, %v5937_v9  ;;  %v5945_v37 = vrot.slane %v5944_v30, 1  ;;  %v5969_v21 = vrot.slane %v5968_v24, 4 }
 0x467   : > { %v5957_v4 = vrot.slane %v5956_v43, 2  ;;  %v5952_v17 = vrot.slane %v5951_v36, 1  ;;  %v5976_v55 = vrot.slane %v5975_v13, 4  ;;  %v5983_v6 = vmul.f32 0.0625, %v5932_v59 }
 0x468   : > { %v5964_v40 = vrot.slane %v5963_v25, 2  ;;  %v5970_v22 = vadd.f32 %v5969_v21, %v5968_v24  ;;  %v5984_v53 = vmul.f32 0.0625, %v5939_v11  ;;  %v5946_v15 = vadd.f32 %v5945_v37, %v5944_v30  ;;  %v8686_v21 = vld [vmem:[#allocation9] ss:$16 sps:$4 sm:$0xff]  }
 0x469   : > { %v5958_v50 = vadd.f32 %v5957_v4, %v5956_v43  ;;  %v5977_v8 = vadd.f32 %v5976_v55, %v5975_v13  ;;  %v5953_v38 = vadd.f32 %v5952_v17, %v5951_v36  ;;  %v5991_v19 = vpack.c.bf16 %v5983_v6, %v5983_v6 }
 0x46a   : > { %v5965_v57 = vadd.f32 %v5964_v40, %v5963_v25  ;;  %v5971_v61 = vrot.slane %v5970_v22, 2  ;;  %v5985_v56 = vmul.f32 0.0625, %v5946_v15  ;;  %v5992_v27 = vpack.c.bf16 %v5984_v53, %v5984_v53  ;;  %v8692_v53 = vld [vmem:[#allocation9 + $0x20] ss:$16 sps:$4 sm:$0xff]  }
 0x46b   : > { %v5959_v5 = vrot.slane %v5958_v50, 1  ;;  %v5978_v2 = vrot.slane %v5977_v8, 2  ;;  %v5986_v52 = vmul.f32 0.0625, %v5953_v38  ;;  %v6071_v47 = vunpack.c.l.b16 %v5991_v19  ;;  %v8703_v19 = vld [vmem:[#allocation9 + $0x4c] ss:$16 sps:$4 sm:$0xff]  }
 0x46c   : > { %v5966_v32 = vrot.slane %v5965_v57, 1  ;;  %v5972_v58 = vadd.f32 %v5971_v61, %v5970_v22  ;;  %v5993_v43 = vpack.c.bf16 %v5985_v56, %v5985_v56  ;;  %v6072_v25 = vunpack.c.l.b16 %v5992_v27  ;;  %v8700_v61 = vld [vmem:[#allocation9 + $0x44] ss:$16 sps:$4 sm:$0xff]   ;;  %v8707_v27 = vld [vmem:[#allocation9 + $0x68] ss:$16 sps:$4 sm:$0xff]  }
 0x46d   : > { %v5960_v26 = vadd.f32 %v5959_v5, %v5958_v50  ;;  %v5979_v9 = vadd.f32 %v5978_v2, %v5977_v8  ;;  %v5994_v4 = vpack.c.bf16 %v5986_v52, %v5986_v52  ;;  %v8698_v2 = vld [vmem:[#allocation9 + $0x40] ss:$16 sps:$4 sm:$0xff]   ;;  %v8712_v56 = vld [vmem:[#allocation9 + $0x84] ss:$16 sps:$4 sm:$0xff]   ;;  %v8715_v52 = vld [vmem:[#allocation9 + $0x8c] ss:$16 sps:$4 sm:$0xff]  }
 0x46e   : > { %v5967_v29 = vadd.f32 %v5966_v32, %v5965_v57  ;;  %v5973_v12 = vrot.slane %v5972_v58, 1  ;;  %v6073_v17 = vunpack.c.l.b16 %v5993_v43  ;;  %v8694_v57 = vld [vmem:[#allocation9 + $0x24] ss:$16 sps:$4 sm:$0xff]   ;;  %v8689_v32 = vld [vmem:[#allocation9 + $0x8] ss:$16 sps:$4 sm:$0xff]  }
 0x46f   : > { %v5987_v45 = vmul.f32 0.0625, %v5960_v26  ;;  %v5980_v41 = vrot.slane %v5979_v9, 1  ;;  %v6074_v22 = vunpack.c.l.b16 %v5994_v4  ;;  %v8697_v26 = vld [vmem:[#allocation9 + $0x2c] ss:$16 sps:$4 sm:$0xff]  }
 0x470   : > { %v5988_v18 = vmul.f32 0.0625, %v5967_v29  ;;  %v5974_v7 = vadd.f32 %v5973_v12, %v5972_v58  ;;  %v8695_v29 = vld [vmem:[#allocation9 + $0x28] ss:$16 sps:$4 sm:$0xff]   ;;  %v8706_v58 = vld [vmem:[#allocation9 + $0x64] ss:$16 sps:$4 sm:$0xff]  }
 0x471   : > { %v5995_v46 = vpack.c.bf16 %v5987_v45, %v5987_v45  ;;  %v5981_v42 = vadd.f32 %v5980_v41, %v5979_v9  ;;  %v8704_v45 = vld [vmem:[#allocation9 + $0x60] ss:$16 sps:$4 sm:$0xff]   ;;  %v8701_v9 = vld [vmem:[#allocation9 + $0x48] ss:$16 sps:$4 sm:$0xff]   ;;  %v8718_v41 = vld [vmem:[#allocation9 + $0xa4] ss:$16 sps:$4 sm:$0xff]  }
 0x472   : > { %v5996_v54 = vpack.c.bf16 %v5988_v18, %v5988_v18  ;;  %v5989_v30 = vmul.f32 0.0625, %v5974_v7  ;;  %v8709_v18 = vld [vmem:[#allocation9 + $0x6c] ss:$16 sps:$4 sm:$0xff]   ;;  %v8710_v12 = vld [vmem:[#allocation9 + $0x80] ss:$16 sps:$4 sm:$0xff]  }
 0x473   : > { %v6075_v49 = vunpack.c.l.b16 %v5995_v46  ;;  %v5990_v59 = vmul.f32 0.0625, %v5981_v42  ;;  %v8713_v46 = vld [vmem:[#allocation9 + $0x88] ss:$16 sps:$4 sm:$0xff]   ;;  %v8727_v43 = vld [vmem:[#allocation9 + $0xcc] ss:$16 sps:$4 sm:$0xff]  }
 0x474   : > { %v6076_v24 = vunpack.c.l.b16 %v5996_v54  ;;  %v5997_v13 = vpack.c.bf16 %v5989_v30, %v5989_v30  ;;  %v8719_v7 = vld [vmem:[#allocation9 + $0xa8] ss:$16 sps:$4 sm:$0xff]   ;;  %v8721_v54 = vld [vmem:[#allocation9 + $0xac] ss:$16 sps:$4 sm:$0xff]   ;;  %v8730_v30 = vld [vmem:[#allocation9 + $0xe4] ss:$16 sps:$4 sm:$0xff]  }
 0x475   : > { %v6080_v36 = vsel %vm6079_vm7, %v6075_v49, %v6071_v47  ;;  %v5998_v40 = vpack.c.bf16 %v5990_v59, %v5990_v59  ;;  %v8722_v47 = vld [vmem:[#allocation9 + $0xc0] ss:$16 sps:$4 sm:$0xff]   ;;  %v8724_v49 = vld [vmem:[#allocation9 + $0xc4] ss:$16 sps:$4 sm:$0xff]   ;;  %v8725_v42 = vld [vmem:[#allocation9 + $0xc8] ss:$16 sps:$4 sm:$0xff]  }
 0x476   : > { %v6081_v11 = vsel %vm6079_vm7, %v6076_v24, %v6072_v25  ;;  %v6077_v50 = vunpack.c.l.b16 %v5997_v13  ;;  %v6084_v55 = vpack.c.b16 %v6080_v36, %v6080_v36  ;;  %v8728_v25 = vld [vmem:[#allocation9 + $0xe0] ss:$16 sps:$4 sm:$0xff]   ;;  %v8733_v24 = vld [vmem:[#allocation9 + $0xec] ss:$16 sps:$4 sm:$0xff]  }
 0x477   : > { %v6085_v37 = vpack.c.b16 %v6081_v11, %v6081_v11  ;;  %v6078_v6 = vunpack.c.l.b16 %v5998_v40  ;;  %v6672_v59 = vld [vmem:[%s9121_s30] sm:$0xff]  ;;  %v6674_v36 = vld [vmem:[%s9121_s30 + $0x14] sm:$0xff]  ;;  %v6673_v11 = vld [vmem:[%s9121_s30 + $0x8] ss:$20 sps:$4 sm:$0xff]  }
 0x478   : > { %v6082_v5 = vsel %vm6079_vm7, %v6077_v50, %v6073_v17  ;;  %v6684_v4 = vunpack.c.l.bf16 %v6672_v59  ;;  %v6685_v13 = vunpack.c.h.bf16 %v6672_v59  ;;  %v8731_v40 = vld [vmem:[#allocation9 + $0xe8] ss:$16 sps:$4 sm:$0xff]   ;;  %v6688_v17 = vunpack.c.h.bf16 %v6674_v36  ;;  %v6897_v59 = vld [vmem:[%s9121_s30 + $0x8] sm:$0xff] }
 0x479   : > { %6316 = vmatprep.mubr.bf16.mxu0 %v6085_v37  ;;  %v6083_v8 = vsel %vm6079_vm7, %v6078_v6, %v6074_v22  ;;  %v6086_v38 = vpack.c.b16 %v6082_v5, %v6082_v5  ;;  %v6676_v37 = vld [vmem:[%s9121_s30 + $0x28] sm:$0x11]  ;;  %v6686_v50 = vunpack.c.l.bf16 %v6673_v11  ;;  %v6678_v22 = vld [vmem:[%s9121_s30 + $0x3c] sm:$0xff] }
 0x47a   : > { %6317 = vmatmul.mubr.bf16.vlgmr.msra.gmra.mrb[16].mxu0 %v6084_v55  ;;  %v6087_v15 = vpack.c.b16 %v6083_v8, %v6083_v8  ;;  %v6689_v55 = vunpack.c.h.bf16 %v6673_v11  ;;  %v6774_v6 = vrot.slane %v6684_v4, 1  ;;  %v6777_v5 = vrot.slane %v6685_v13, 1 }
 0x47b   : > { %6559 = vmatpush1.bf16.msra.mxu0 %v8686_v21  ;;  %6590 = vmatprep.mubr.bf16.mxu0 %v8922_v51  ;;  %v6687_v21 = vunpack.c.l.bf16 %v6674_v36  ;;  %v6690_v8 = vunpack.c.l.bf16 %v6676_v37 }
 0x47c   : > { %6560 = vmatprep.subr.bf16.mxu0 %v8694_v57  ;;  %6356 = vmatprep.mubr.bf16.mxu1 %v6087_v15  ;;  %v6677_v57 = vld [vmem:[%s9121_s30 + $0x30] sm:$0x1] }
 0x47d   : > { %6357 = vmatmul.mubr.bf16.vlgmr.msra.gmra.mrb[16].mxu1 %v6086_v38  ;;  %v6775_v15 = vrot.slane %v6687_v21, 1  ;;  %v6781_v38 = vrot.slane %v6689_v55, 1 }
 0x47e   : > { %6600 = vmatpush1.bf16.msra.mxu1 %v8689_v32  ;;  %6631 = vmatprep.mubr.bf16.mxu1 %v8922_v51  ;;  %v8716_v51 = vld [vmem:[#allocation9 + $0xa0] ss:$16 sps:$4 sm:$0xff]   ;;  %v6778_v32 = vrot.slane %v6688_v17, 1 }
 0x47f   : > { %6561 = vmatpush1.bf16.msra.mxu0 %v8692_v53  ;;  %6601 = vmatprep.subr.bf16.mxu1 %v8697_v26  ;;  %v6691_v53 = vunpack.c.h.bf16 %v6676_v37  ;;  %v6783_v26 = vrot.slane %v6690_v8, 1 }
 0x480   : > { %6562 = vmatprep.subr.bf16.mxu0 %v8700_v61  ;;  %v6780_v61 = vrot.slane %v6686_v50, 1  ;;  %v6899_v50 = vld [vmem:[%s9121_s30 + $0x1c] sm:$0xff] }
 0x482   : > { %6602 = vmatpush1.bf16.msra.mxu1 %v8695_v29  ;;  %v6785_v29 = vrot.slane %v6691_v53, 1 }
 0x483   : > { %6563 = vmatpush1.bf16.msra.mxu0 %v8698_v2  ;;  %6603 = vmatprep.subr.bf16.mxu1 %v8703_v19  ;;  %v6692_v2 = vunpack.c.l.bf16 %v6677_v57  ;;  %v6693_v19 = vunpack.c.l.bf16 %v6678_v22 }
 0x484   : > { %6564 = vmatprep.subr.bf16.mxu0 %v8706_v58  ;;  %v6680_v58 = vld [vmem:[%s9121_s30 + $0x50] sm:$0xff] }
 0x486   : > { %6604 = vmatpush1.bf16.msra.mxu1 %v8701_v9  ;;  %v6779_v9 = vsel %vm6773_vm1, %v6777_v5, %v6778_v32 }
 0x487   : > { %6565 = vmatpush1.bf16.msra.mxu0 %v8704_v45  ;;  %6605 = vmatprep.subr.bf16.mxu1 %v8709_v18  ;;  %v6776_v45 = vsel %vm6773_vm1, %v6774_v6, %v6775_v15  ;;  %v6694_v18 = vunpack.c.h.bf16 %v6678_v22  ;;  %v6909_v6 = vunpack.c.l.bf16 %v6897_v59 }
 0x488   : > { %6566 = vmatprep.subr.bf16.mxu0 %v8712_v56  ;;  %v6782_v56 = vsel %vm6773_vm1, %v6780_v61, %v6781_v38  ;;  %v6910_v61 = vunpack.c.h.bf16 %v6897_v59 }
 0x48a   : > { %6606 = vmatpush1.bf16.msra.mxu1 %v8707_v27  ;;  %v8218_v27 = vpack.i.bf16 %v6779_v9, %v6776_v45  ;;  %v6998_v9 = vrot.slane %v6909_v6, 1 }
 0x48b   : > { %6567 = vmatpush1.bf16.msra.mxu0 %v8710_v12  ;;  %6607 = vmatprep.subr.bf16.mxu1 %v8715_v52  ;;  %v6679_v12 = vld [vmem:[%s9121_s30 + $0x44] ss:$20 sps:$4 sm:$0xff]   ;;  %v6784_v52 = vsel %vm6773_vm1, %v6775_v15, %v6783_v26  ;;  %v6913_v26 = vunpack.c.h.bf16 %v6899_v50 }
 0x48c   : > { %6568 = vmatprep.subr.bf16.mxu0 %v8718_v41  ;;  %v6682_v41 = vld [vmem:[%s9121_s30 + $0x64] sm:$0x11]  ;;  %8219 = vrot.lane.b32.xlu0 %v8218_v27, %s8924_s17 }
 0x48d   : > { %v6699_v11 = vunpack.c.l.bf16 %v6682_v41  ;;  %v6700_v21 = vunpack.c.h.bf16 %v6682_v41 }
 0x48e   : > { %6608 = vmatpush1.bf16.msra.mxu1 %v8713_v46  ;;  %v6786_v46 = vsel %vm6773_vm1, %v6778_v32, %v6785_v29  ;;  %v6901_v29 = vld [vmem:[%s9121_s30 + $0x30] sm:$0x11] }
 0x48f   : > { %6609 = vmatprep.subr.bf16.mxu1 %v8721_v54  ;;  %6569 = vmatpush1.bf16.msra.mxu0 %v8716_v51  ;;  %v6787_v51 = vrot.slane %v6692_v2, 1  ;;  %v6696_v54 = vunpack.c.l.bf16 %v6680_v58  ;;  %v6798_v22 = vrot.slane %v6699_v11, 1  ;;  %v6800_v53 = vrot.slane %v6700_v21, 1  ;;  %v6898_v2 = vld [vmem:[%s9121_s30 + $0x10] ss:$20 sps:$4 sm:$0xff]  }
 0x490   : > { %6570 = vmatprep.subr.bf16.mxu0 %v8724_v49  ;;  %v6789_v49 = vrot.slane %v6693_v19, 1  ;;  %v6914_v41 = vunpack.c.h.bf16 %v6898_v2 }
 0x491   : > { %v6790_v4 = vrot.slane %v6696_v54, 1  ;;  %v6916_v54 = vunpack.c.h.bf16 %v6901_v29 }
 0x492   : > { %6610 = vmatpush1.bf16.msra.mxu1 %v8719_v7  ;;  %v8223_v7 = vpack.i.bf16 %v6784_v52, %v6782_v56  ;;  %v6902_v56 = vld [vmem:[%s9121_s30 + $0x38] sm:$0x1]  ;;  %v7001_v52 = vrot.slane %v6910_v61, 1  ;;  %v7005_v59 = vrot.slane %v6914_v41, 1 }
 0x493   : > { %6611 = vmatprep.subr.bf16.mxu1 %v8727_v43  ;;  %6571 = vmatpush1.bf16.msra.mxu0 %v8722_v47  ;;  %v6697_v47 = vunpack.c.h.bf16 %v6680_v58  ;;  %v6788_v43 = vsel %vm6773_vm1, %v6781_v38, %v6787_v51  ;;  %v6791_v55 = vsel %vm6773_vm1, %v6789_v49, %v6790_v4  ;;  %v6799_v32 = vsel %vm6773_vm1, %v6790_v4, %v6798_v22 }
 0x494   : > { %6572 = vmatprep.subr.bf16.mxu0 %v8730_v30  ;;  %v6792_v30 = vrot.slane %v6694_v18, 1  ;;  %8224 = vrot.lane.b32.xlu1 %v8223_v7, %s8924_s17  ;;  %v8228_v36 = vpack.i.bf16 %v6788_v43, %v6786_v46  ;;  %v6912_v38 = vunpack.c.l.bf16 %v6899_v50  ;;  %v6903_v18 = vld [vmem:[%s9121_s30 + $0x44] sm:$0xff]  ;;  %v7002_v46 = vrot.slane %v6913_v26, 1 }
 0x495   : > { %v6793_v13 = vrot.slane %v6697_v47, 1  ;;  %v6911_v51 = vunpack.c.l.bf16 %v6898_v2  ;;  %v6915_v7 = vunpack.c.l.bf16 %v6901_v29  ;;  %v6905_v47 = vld [vmem:[%s9121_s30 + $0x58] sm:$0xff]  ;;  %v6917_v43 = vunpack.c.l.bf16 %v6902_v56 }
 0x496   : > { %6612 = vmatpush1.bf16.msra.mxu1 %v8725_v42  ;;  %v6683_v42 = vld [vmem:[%s9121_s30 + $0x6c] sm:$0x1]  ;;  %8229 = vrot.lane.b32.xlu0 %v8228_v36, %s8924_s17  ;;  %v6999_v27 = vrot.slane %v6912_v38, 1  ;;  %v7009_v4 = vrot.slane %v6916_v54, 1  ;;  %v6919_v11 = vunpack.c.h.bf16 %v6903_v18  ;;  %v6922_v50 = vunpack.c.h.bf16 %v6905_v47 }
 0x497   : > { %6613 = vmatprep.subr.bf16.mxu1 %v8733_v24  ;;  %6573 = vmatpush1.bf16.msra.mxu0 %v8728_v25  ;;  %v6695_v25 = vunpack.c.l.bf16 %v6679_v12  ;;  %v6698_v24 = vunpack.c.h.bf16 %v6679_v12  ;;  %v6701_v17 = vunpack.c.l.bf16 %v6683_v42  ;;  %v6794_v57 = vsel %vm6773_vm1, %v6792_v30, %v6793_v13 }
 0x498   : > { %v8233_v5 = vpack.i.bf16 %v6794_v57, %v6791_v55  ;;  %v6801_v19 = vsel %vm6773_vm1, %v6793_v13, %v6800_v53  ;;  %v7000_v49 = vsel %vm6773_vm1, %v6998_v9, %v6999_v27  ;;  %v7003_v42 = vsel %vm6773_vm1, %v7001_v52, %v7002_v46  ;;  %v6907_v57 = vld [vmem:[%s9121_s30 + $0x6c] sm:$0x11]  ;;  %v6908_v53 = vld [vmem:[%s9121_s30 + $0x74] sm:$0x1] }
 0x499   : > { %v6795_v37 = vrot.slane %v6695_v25, 1  ;;  %v6802_v15 = vrot.slane %v6701_v17, 1  ;;  %v6918_v30 = vunpack.c.l.bf16 %v6903_v18  ;;  %v8248_v25 = vpack.i.bf16 %v7003_v42, %v7000_v49 }
 0x49a   : > { %6614 = vmatpush1.bf16.msra.mxu1 %v8731_v40  ;;  %v6796_v40 = vrot.slane %v6698_v24, 1  ;;  %8234 = vrot.lane.b32.xlu1 %v8233_v5, %s8924_s17  ;;  %v7004_v24 = vrot.slane %v6911_v51, 1  ;;  %v7007_v36 = vrot.slane %v6915_v7, 1  ;;  %v7011_v13 = vrot.slane %v6917_v43, 1 }
 0x49b   : > { %v7013_v55 = vrot.slane %v6918_v30, 1  ;;  %v7010_v6 = vsel %vm6773_vm1, %v7002_v46, %v7009_v4  ;;  %v7017_v61 = vrot.slane %v6922_v50, 1  ;;  %v6924_v29 = vunpack.c.l.bf16 %v6907_v57 }
 0x49c   : > { %v6797_v8 = vsel %vm6773_vm1, %v6795_v37, %v6796_v40  ;;  %v6803_v45 = vsel %vm6773_vm1, %v6796_v40, %v6802_v15  ;;  %v6921_v37 = vunpack.c.l.bf16 %v6905_v47  ;;  %v6904_v40 = vld [vmem:[%s9121_s30 + $0x4c] ss:$20 sps:$4 sm:$0xff]   ;;  %v7006_v21 = vsel %vm6773_vm1, %v7004_v24, %v7005_v59  ;;  %s316_s30 = sand.u32 1, %s8905_s25  }
 0x49d   : > { %v8238_v58 = vpack.i.bf16 %v6799_v32, %v6797_v8  ;;  %v8243_v12 = vpack.i.bf16 %v6803_v45, %v6801_v19  ;;  %v7008_v17 = vsel %vm6773_vm1, %v6999_v27, %v7007_v36  ;;  %v7012_v5 = vsel %vm6773_vm1, %v7005_v59, %v7011_v13  ;;  %s7230_s19 = sshll.u32 %s316_s30, 6  ;;  %s10448_s28 = scalar_lea.sflag [#allocation6], %s316_s30 }
 0x49e   : > { %v8253_v22 = vpack.i.bf16 %v7008_v17, %v7006_v21  ;;  %v7014_v8 = vrot.slane %v6921_v37, 1  ;;  %v8258_v15 = vpack.i.bf16 %v7012_v5, %v7010_v6  ;;  %v7016_v32 = vrot.slane %v6919_v11, 1  ;;  %s10406_s15 = scalar_lea.vmem [#allocation10], %s7230_s19 }
 0x49f   : > { %8239 = vrot.lane.b32.xlu0 %v8238_v58, %s8924_s17  ;;  %8244 = vrot.lane.b32.xlu1 %v8243_v12, %s8924_s17  ;;  %v6920_v38 = vunpack.c.l.bf16 %v6904_v40  ;;  %v6923_v2 = vunpack.c.h.bf16 %v6904_v40  ;;  %v6925_v58 = vunpack.c.h.bf16 %v6907_v57  ;;  %v6926_v9 = vunpack.c.l.bf16 %v6908_v53  ;;  %s7127_s21 = sshll.u32 %s10406_s15, 4  ;;  %s10442_s21 = int_to_ptr.vmem [resolvable:$true] %s7127_s21 }
 0x4a0   : > { %v7015_v26 = vsel %vm6773_vm1, %v7013_v55, %v7014_v8  ;;  %v7018_v19 = vsel %vm6773_vm1, %v7016_v32, %v7017_v61  ;;  %v7022_v12 = vrot.slane %v6924_v29, 1  ;;  %s8843_s16 = scalar_lea.vmem %s10442_s21, 1024  ;;  %p8850_p13 = scmp.lt.s32.totalorder %s10442_s21, %s8848_s9 }
 0x4a1   : > { %v7019_v45 = vrot.slane %v6920_v38, 1  ;;  %v8263_v56 = vpack.i.bf16 %v7018_v19, %v7015_v26  ;;  %v7020_v18 = vrot.slane %v6923_v2, 1  ;;  %v7024_v27 = vrot.slane %v6925_v58, 1  ;;  %p8844_p4 = scmp.ne.s32.totalorder %s10442_s21, %s8843_s16  ;;  %p8851_p1 = scmp.lt.s32.totalorder %s8849_s10, %s8843_s16 }
 0x4a2   : > { %v7026_v52 = vrot.slane %v6926_v9, 1  ;;  %v7023_v51 = vsel %vm6773_vm1, %v7014_v8, %v7022_v12 }
 0x4a3   : > { %8249 = vrot.lane.b32.xlu0 %v8248_v25, %s8924_s17  ;;  %8254 = vrot.lane.b32.xlu1 %v8253_v22, %s8924_s17  ;;  %v7021_v46 = vsel %vm6773_vm1, %v7019_v45, %v7020_v18  ;;  %v7025_v41 = vsel %vm6773_vm1, %v7017_v61, %v7024_v27  ;;  %p8845_p8 = pnand %p8844_p4, %p10574_p7  ;;  %p8852_p6 = por %p8851_p1, %p8850_p13 }
 0x4a4   : > { %v8268_v7 = vpack.i.bf16 %v7023_v51, %v7021_v46  ;;  %v7027_v54 = vsel %vm6773_vm1, %v7020_v18, %v7026_v52  ;;  %v8925_v51 = vmov 1966171168  }
 0x4a5   : > { %v8273_v47 = vpack.i.bf16 %v7027_v54, %v7025_v41  ;;  %v6706_v41 = vunpack.c.l.s4 %v8925_v51  ;;  %p8846_p11 = pneg %p8845_p8 }
 0x4a7   : > { %8259 = vrot.lane.b32.xlu0 %v8258_v15, %s8924_s17  ;;  %8264 = vrot.lane.b32.xlu1 %v8263_v56, %s8924_s17  ;;  %v6707_v54 = vunpack.c.0.s8 %v6706_v41  ;;  %p8853_p9 = pnand %p8852_p6, %p8846_p11 }
 0x4ab   : > { %8269 = vrot.lane.b32.xlu0 %v8268_v7, %s8924_s17  ;;  %8274 = vrot.lane.b32.xlu1 %v8273_v47, %s8924_s17 }
 0x4fe   : > { %v10351_v21 = vpop.permute.xlu0 %8219 }
 0x4ff   : > { %v8222_v47 = vunpack.i.h.bf16 %v10351_v21 }
 0x506   : > { %v10353_v17 = vpop.permute.xlu1 %8224 }
 0x508   : > { %v8230_v2 = vpop.permute.xlu0 %8229 }
 0x50c   : > { %v8235_v26 = vpop.permute.xlu1 %8234 }
 0x511   : > { %v8245_v29 = vpop.permute.xlu1 %8244  ;;  %v8240_v19 = vpop.permute.xlu0 %8239 }
 0x515   : > { %v8255_v46 = vpop.permute.xlu1 %8254  ;;  %v8250_v7 = vpop.permute.xlu0 %8249 }
 0x54d   : > { %v7949_v49 = vpop.f32.mrb[16].mxu0 }
 0x54e   : > { %v7950_v42 = vpop.f32.mrb[17].mxu0 }
 0x54f   : > { %v7951_v43 = vadd.f32 %v7950_v42, %v7949_v49  ;;  %v7952_v30 = vpop.f32.mrb[18].mxu0  ;;  %v8221_v49 = vunpack.i.l.bf16 %v10351_v21  ;;  %v10357_v42 = vpop.permute.xlu1 %8264  ;;  %v8247_v21 = vunpack.i.h.bf16 %v8245_v29 }
 0x550   : > { %v7953_v25 = vpop.f32.mrb[19].mxu0  ;;  %v7971_v24 = vpop.f32.mrb[16].mxu1  ;;  %v8226_v30 = vunpack.i.l.bf16 %v10353_v17 }
 0x551   : > { %v7972_v59 = vpop.f32.mrb[17].mxu1  ;;  %v8232_v25 = vunpack.i.h.bf16 %v8230_v2 }
 0x552   : > { %v7973_v36 = vadd.f32 %v7972_v59, %v7971_v24  ;;  %v7974_v4 = vpop.f32.mrb[18].mxu1  ;;  %v8231_v24 = vunpack.i.l.bf16 %v8230_v2  ;;  %v8237_v59 = vunpack.i.h.bf16 %v8235_v26 }
 0x553   : > { %v7975_v13 = vpop.f32.mrb[19].mxu1  ;;  %v8260_v4 = vpop.permute.xlu0 %8259 }
 0x554   : > { %v6359_v11 = vadd.f32 %v7973_v36, %v7951_v43  ;;  %v8227_v43 = vunpack.i.h.bf16 %v10353_v17  ;;  %v8236_v36 = vunpack.i.l.bf16 %v8235_v26  ;;  %v6829_v17 = vsel %vm6828_vm5, %v8221_v49, %v8222_v47  ;;  %v10367_v2 = vpop.permute.xlu1 %8274 }
 0x555   : > { %v8261_v26 = vunpack.i.l.bf16 %v8260_v4  ;;  %v8276_v41 = vunpack.i.l.bf16 %v10367_v2  ;;  %v8266_v49 = vunpack.i.l.bf16 %v10357_v42 }
 0x556   : > { %v6364_v37 = vmax.f32 %v6359_v11, 0.0  ;;  %v6710_v11 = vsub.s32 %v6707_v54, %v9517_v0  ;;  %v6833_v0 = vsel %vm6828_vm5, %v8236_v36, %v8237_v59 }
 0x558   : > { %v6365_v40 = vpack.c.bf16 %v6364_v37, %v6364_v37  ;;  %v8242_v37 = vunpack.i.h.bf16 %v8240_v19 }
 0x55a   : > { %6591 = vmatmul.mubr.bf16.vlgmr.msra.gmra.mrb[20].mxu0 %v6365_v40  ;;  %6632 = vmatmul.mubr.bf16.vlgmr.msra.gmra.mrb[20].mxu1 %v6365_v40  ;;  %v8241_v40 = vunpack.i.l.bf16 %v8240_v19 }
 0x62d   : > { %v6592_v50 = vpop.f32.mrb[20].mxu0  ;;  %v6633_v55 = vpop.f32.mrb[20].mxu1 }
 0x62e   : > { %v7897_v57 = vmul.f32 -1.442695, %v6592_v50  ;;  %v7899_v22 = vmul.f32 -1.442695, %v6633_v55  ;;  %v6594_v6 = vpop.f32.mrb[21].mxu0  ;;  %v6635_v5 = vpop.f32.mrb[21].mxu1  ;;  %v8246_v50 = vunpack.i.l.bf16 %v8245_v29 }
 0x62f   : > { %v7898_v8 = vmul.f32 -1.442695, %v6594_v6  ;;  %v7900_v53 = vmul.f32 -1.442695, %v6635_v5  ;;  %v6596_v15 = vpop.f32.mrb[22].mxu0  ;;  %v6637_v32 = vpop.f32.mrb[22].mxu1  ;;  %v8256_v6 = vunpack.i.l.bf16 %v8255_v46 }
 0x630   : > { %8734 = vpow2.f32 %v7897_v57  ;;  %v6597_v61 = vpop.f32.mrb[23].mxu0  ;;  %v6638_v38 = vpop.f32.mrb[23].mxu1  ;;  %v8252_v57 = vunpack.i.h.bf16 %v8250_v7  ;;  %v6832_v15 = vsel %vm6828_vm5, %v8231_v24, %v8232_v25  ;;  %v6835_v19 = vsel %vm6828_vm5, %v8242_v37, %v8246_v50 }
 0x631   : > { %8736 = vpow2.f32 %v7899_v22  ;;  %v8251_v22 = vunpack.i.l.bf16 %v8250_v7  ;;  %v8257_v38 = vunpack.i.h.bf16 %v8255_v46  ;;  %v8267_v46 = vunpack.i.h.bf16 %v10357_v42 }
 0x632   : > { %8738 = vpow2.f32 %v7898_v8  ;;  %v6830_v8 = vsel %vm6828_vm5, %v8222_v47, %v8226_v30 }
 0x633   : > { %8740 = vpow2.f32 %v7900_v53  ;;  %v6831_v53 = vsel %vm6828_vm5, %v8227_v43, %v8231_v24  ;;  %v7054_v47 = vsel %vm6828_vm5, %v8257_v38, %v8261_v26 }
 0x63a   : > { %v8735_v58 = vpop.eup %8734 }
 0x63b   : > { %v8737_v45 = vpop.eup %8736  ;;  %v6652_v9 = vadd.f32 1.0, %v8735_v58  ;;  %v6834_v58 = vsel %vm6828_vm5, %v8237_v59, %v8241_v40 }
 0x63c   : > { %v8739_v56 = vpop.eup %8738  ;;  %v6654_v18 = vadd.f32 1.0, %v8737_v45  ;;  %v8262_v45 = vunpack.i.h.bf16 %v8260_v4 }
 0x63d   : > { %v8741_v12 = vpop.eup %8740  ;;  %8742 = vrcp.f32 %v6652_v9  ;;  %v6653_v27 = vadd.f32 1.0, %v8739_v56  ;;  %v6836_v56 = vsel %vm6828_vm5, %v8246_v50, %v8247_v21 }
 0x63e   : > { %8744 = vrcp.f32 %v6654_v18  ;;  %v6655_v52 = vadd.f32 1.0, %v8741_v12  ;;  %v7052_v18 = vsel %vm6828_vm5, %v8251_v22, %v8252_v57  ;;  %v7053_v12 = vsel %vm6828_vm5, %v8252_v57, %v8256_v6 }
 0x63f   : > { %8746 = vrcp.f32 %v6653_v27  ;;  %v10374_v27 = vpop.permute.xlu0 %8269  ;;  %v7055_v30 = vsel %vm6828_vm5, %v8261_v26, %v8262_v45 }
 0x640   : > { %8748 = vrcp.f32 %v6655_v52  ;;  %v8272_v51 = vunpack.i.h.bf16 %v10374_v27  ;;  %v8271_v24 = vunpack.i.l.bf16 %v10374_v27 }
 0x647   : > { %v8743_v13 = vpop.eup %8742 }
 0x648   : > { %v8745_v55 = vpop.eup %8744 }
 0x649   : > { %v8747_v5 = vpop.eup %8746 }
 0x64a   : > { %v8749_v32 = vpop.eup %8748  ;;  %v6704_v61 = vcombine.low %v8743_v13, %v8747_v5  ;;  %v8277_v13 = vunpack.i.h.bf16 %v10367_v2  ;;  %v7056_v2 = vsel %vm6828_vm5, %v8266_v49, %v8267_v46 }
 0x64b   : > { %v6929_v29 = vcombine.low %v8745_v55, %v8749_v32  ;;  %v7058_v55 = vsel %vm6828_vm5, %v8272_v51, %v8276_v41 }
 0x64c   : > { %v6711_v9 = vrot.slane %v6704_v61, %v6710_v11 }
 0x64d   : > { %v6936_v52 = vrot.slane %v6929_v29, %v6710_v11 }
 0x64e   : > { %v6719_v7 = vrot.slane %v6711_v9, %v6710_v11  ;;  %v6712_v54 = vcombine.high %v6711_v9, %v6711_v9 }
 0x64f   : > { %v6944_v43 = vrot.slane %v6936_v52, %v6710_v11  ;;  %v6937_v25 = vcombine.high %v6936_v52, %v6936_v52 }
 0x650   : > { %v6730_v59 = vrot.slane %v6719_v7, %v9537_v16  ;;  %v6734_v36 = vrot.slane %v6719_v7, %v9545_v20  ;;  %v6726_v4 = vrot.slane %v6712_v54, %v6710_v11 }
 0x651   : > { %v6955_v37 = vrot.slane %v6944_v43, %v9537_v16  ;;  %v6959_v40 = vrot.slane %v6944_v43, %v9545_v20  ;;  %v6951_v50 = vrot.slane %v6937_v25, %v6710_v11 }
 0x652   : > { %v6747_v21 = vmul.f32 %v6730_v59, %v10241_v48  ;;  %v6748_v57 = vmul.f32 %v6734_v36, %v10245_v44  ;;  %v6749_v22 = vmul.f32 %v6730_v59, %v10243_v60  ;;  %v6750_v6 = vmul.f32 %v6734_v36, %v10247_v23 }
 0x653   : > { %v6738_v5 = vrot.slane %v6726_v4, %v9537_v16  ;;  %v6742_v32 = vrot.slane %v6726_v4, %v9545_v20  ;;  %v6972_v61 = vmul.f32 %v6955_v37, %v10253_v39  ;;  %v6973_v11 = vmul.f32 %v6959_v40, %v10257_v3 }
 0x654   : > { %v6845_v38 = vadd.f32 %v6829_v17, %v6747_v21  ;;  %v6846_v26 = vadd.f32 %v6830_v8, %v6748_v57  ;;  %v6847_v29 = vadd.f32 %v6831_v53, %v6749_v22  ;;  %v6848_v48 = vadd.f32 %v6832_v15, %v6750_v6 }
 0x655   : > { %v6751_v44 = vmul.f32 %v6738_v5, %v10265_v34  ;;  %v6752_v60 = vmul.f32 %v6742_v32, %v10269_v28  ;;  %v6753_v23 = vmul.f32 %v6738_v5, %v10267_v14  ;;  %v6754_v45 = vmul.f32 %v6742_v32, %v10271_v1 }
 0x656   : > { %v6853_v9 = vmax.f32 %v6845_v38, 0.0  ;;  %v6854_v52 = vmax.f32 %v6846_v26, 0.0  ;;  %v6855_v51 = vmax.f32 %v6847_v29, 0.0  ;;  %v6856_v39 = vmax.f32 %v6848_v48, 0.0 }
 0x657   : > { %v6849_v7 = vadd.f32 %v6833_v0, %v6751_v44  ;;  %v6850_v3 = vadd.f32 %v6834_v58, %v6752_v60  ;;  %v6851_v17 = vadd.f32 %v6835_v19, %v6753_v23  ;;  %v6852_v54 = vadd.f32 %v6836_v56, %v6754_v45 }
 0x658   : > { %v7923_v43 = vpack.c.bf16 %v6854_v52, %v6853_v9  ;;  %v7924_v8 = vpack.c.bf16 %v6856_v39, %v6855_v51  ;;  %v7068_v53 = vadd.f32 %v7052_v18, %v6972_v61  ;;  %v7069_v15 = vadd.f32 %v7053_v12, %v6973_v11 }
 0x659   : > { %v6857_v25 = vmax.f32 %v6849_v7, 0.0  ;;  %v6858_v34 = vmax.f32 %v6850_v3, 0.0  ;;  %v6859_v59 = vmax.f32 %v6851_v17, 0.0  ;;  %v6860_v28 = vmax.f32 %v6852_v54, 0.0 }
 0x65a   : > { %6885 = vst [vmem:[%s10406_s15] sm:$0xff] %v7923_v43  ;;  %6886 = vst [vmem:[%s10406_s15 + $0x10] sm:$0xff] %v7924_v8  ;;  %v7076_v14 = vmax.f32 %v7068_v53, 0.0  ;;  %v7077_v1 = vmax.f32 %v7069_v15, 0.0  ;;  %v6974_v0 = vmul.f32 %v6955_v37, %v10255_v33  ;;  %v6975_v58 = vmul.f32 %v6959_v40, %v10259_v63 }
 0x65b   : > { %v7925_v19 = vpack.c.bf16 %v6858_v34, %v6857_v25  ;;  %v7926_v56 = vpack.c.bf16 %v6860_v28, %v6859_v59  ;;  %v6963_v18 = vrot.slane %v6951_v50, %v9537_v16  ;;  %v6967_v12 = vrot.slane %v6951_v50, %v9545_v20 }
 0x65c   : > { %v7927_v36 = vpack.c.bf16 %v7077_v1, %v7076_v14  ;;  %v7070_v4 = vadd.f32 %v7054_v47, %v6974_v0  ;;  %v7071_v21 = vadd.f32 %v7055_v30, %v6975_v58  ;;  %v7059_v57 = vsel %vm6828_vm5, %v8276_v41, %v8277_v13 }
 0x65d   : > { %6887 = vst [vmem:[%s10406_s15 + $0x20] sm:$0xff] %v7925_v19  ;;  %6888 = vst [vmem:[%s10406_s15 + $0x30] sm:$0xff] %v7926_v56  ;;  %v6976_v33 = vmul.f32 %v6963_v18, %v10277_v10  ;;  %v6977_v63 = vmul.f32 %v6967_v12, %v10281_v35  ;;  %v6978_v37 = vmul.f32 %v6963_v18, %v10279_v62 }
 0x65e   : > { %v6979_v16 = vmul.f32 %v6967_v12, %v10283_v31  ;;  %7108 = vst [vmem:[%s10406_s15 + $0x8] sm:$0xff] %v7927_v36  ;;  %v7078_v20 = vmax.f32 %v7070_v4, 0.0  ;;  %v7079_v47 = vmax.f32 %v7071_v21, 0.0  ;;  %v7057_v10 = vsel %vm6828_vm5, %v8267_v46, %v8271_v24 }
 0x65f   : > { %v7072_v35 = vadd.f32 %v7056_v2, %v6976_v33  ;;  %v7073_v62 = vadd.f32 %v7057_v10, %v6977_v63  ;;  %v7074_v31 = vadd.f32 %v7058_v55, %v6978_v37 }
 0x660   : > { %v7075_v41 = vadd.f32 %v7059_v57, %v6979_v16  ;;  %v7928_v30 = vpack.c.bf16 %v7079_v47, %v7078_v20 }
 0x661   : > { %v7080_v13 = vmax.f32 %v7072_v35, 0.0  ;;  %v7081_v40 = vmax.f32 %v7073_v62, 0.0  ;;  %v7082_v49 = vmax.f32 %v7074_v31, 0.0 }
 0x662   : > { %v7083_v50 = vmax.f32 %v7075_v41, 0.0  ;;  %7109 = vst [vmem:[%s10406_s15 + $0x18] sm:$0xff] %v7928_v30 }
 0x663   : > { %v7929_v42 = vpack.c.bf16 %v7081_v40, %v7080_v13 }
 0x664   : > { %v7930_v27 = vpack.c.bf16 %v7083_v50, %v7082_v49 }
 0x665   : > { %7110 = vst [vmem:[%s10406_s15 + $0x28] sm:$0xff] %v7929_v42 }
 0x666   : > { %7111 = vst [vmem:[%s10406_s15 + $0x38] sm:$0xff] %v7930_v27 }
 0x667   : > { %8856 = shalt.err (!%p8853_p9)
}
 0x668   : > { %s8857_s23 = scalar_lea.hbm %s10440_s13, 1024  ;;  %s8861_s14 = scalar_lea.hbm %s10496_s7, 2048 }
 0x669   : > { %p8858_p2 = scmp.ne.s32.totalorder %s10440_s13, %s8857_s23  ;;  %p8862_p5 = scmp.lt.u32.totalorder %s10440_s13, %s10496_s7 }
 0x66a   : > { %p8863_p10 = scmp.lt.u32.totalorder %s8861_s14, %s8857_s23  ;;  %p8865_p4 = scmp.lt.u32.totalorder %s8857_s23, %s10440_s13 }
 0x66b   : > { %p8859_p3 = pnand %p8858_p2, %p10574_p7 }
 0x66c   : > { %p8864_p12 = por %p8863_p10, %p8862_p5 }
 0x66d   : > { %p8860_p0 = pneg %p8859_p3 }
 0x66e   : > { %p8866_p8 = por %p8865_p4, %p8864_p12 }
 0x670   : > { %p8867_p11 = pnand %p8866_p8, %p8860_p0 }
 0x672   : > { %8870 = shalt.err (!%p8867_p11)
}
 0x673   : > { %s8927_s19 = smov 256   ;;  %s8928_s15 = smov 16  }
 0x674   : > { %8150 = dma.vmem_to_hbm [thread:$0]  (%p10574_p7), %s10442_s21, 1024, %s10440_s13, %s10448_s28, %s8927_s19, %s8927_s19, %s8928_s15  }
 0x675 PF: > { %p8172_p13 = scmp.ge.s32.totalorder %s8913_s27, 2  ;;  %s7142_s18 = sand.u32 1, %s8901_s24  }
 0x676   : > { %p10575_p1 = scmp.ne.s32.totalorder %s10510_s12, 0  ;;  %s7143_s22 = scalar_lea.sflag [#allocation6], %s7142_s18 }
 0x678   : > { %p8163_p6 = pnand %p8172_p13, %p10575_p1 }
 0x67a   : > { %8896 = dma.done.wait (!%p8163_p6), %s7143_s22, 1024  }
 0x67b   : > { %8898 = vsyncadd (!%p8163_p6), %s7143_s22, 4294966272  ;;  %s10576_s27 = sld [smem:[#allocation15_spill]]  ;;  %s10577_s26 = sld [smem:[#allocation14_spill]] }
 0x67c   : > { %s10578_s16 = sld [smem:[#allocation16_spill]]  ;;  %s10579_s24 = smov %s8905_s25 }
 0x681   : > { %p19_p9 = scmp.ge.s32.totalorder %s10576_s27, 4   ;;  %s10580_s25 = smov %s10577_s26 }
 0x682   : > { %s10581_s26 = smov %s10578_s16 }
 0x683   :  { %21 = sbr.rel (!%p19_p9) target bundleno = 5 (0x5), region = 100 }
 0x68a   :  { %7148 = vsyncpa [#allocation5], 1 }
 0x68b   :  { %7150 = vsyncpa [#allocation5 + $0x1], 1 }
 0x68c   :  { %7151 = vsyncpa [#allocation8], 1 }
 0x68d   :  { %7152 = vsyncpa [#allocation6], 1 }
 0x68e   :  { %7154 = vsyncpa [#allocation6 + $0x1], 1 }

</bundles_post_ra>
